<compile_context>
chip_gen: v7x
topology: tpu7x:2x2x1
jax: 0.10.0
libtpu: 0.0.40
codegen_flags: <defaults>
</compile_context>

<pallas_src>
import math

import numpy as np
import jax
import jax.numpy as jnp
from jax.experimental import pallas as pl
from jax.experimental.pallas import tpu as pltpu

# ----------------------------------------------------------------------------
# Config (small shapes consistent with the module's forward)
# ----------------------------------------------------------------------------
B = 2                      # batch
C, H, W = 4, 16, 16        # input_shape = (4, 16, 16)
P = 4                      # patch_size = (4, 4)
GRID = H // P              # 4
NUM_PATCHES = GRID * GRID  # 16
PATCH_DIM = C * P * P      # 64
E_ENC = 64                 # embed_dim_enc
E_DEC = 32                 # embed_dim_dec
N_LAYER_ENC = 2
N_LAYER_DEC = 1
N_HEAD_ENC = 4
N_HEAD_DEC = 4
MLP_RATIO = 2
MASK_RATIO = 0.75
LEN_KEEP = int(NUM_PATCHES * (1 - MASK_RATIO))   # 4
LN_EPS = 1e-5

T_ENC_PAD = 8    # 1 + LEN_KEEP = 5 tokens per image, padded to 8 sublanes
T_DEC_PAD = 24   # 1 + NUM_PATCHES = 17 tokens per image, padded to 24

_SLAB_ORDER = ('s64', 's192', 's128', 's96', 's32')
_NEG_INF = -1e30


# ----------------------------------------------------------------------------
# sincos positional embeddings (numpy, identical to the reference)
# ----------------------------------------------------------------------------
def get_1d_sincos_pos_embed_from_grid(embed_dim, pos):
    assert embed_dim % 2 == 0
    omega = np.arange(embed_dim // 2, dtype=np.float64)
    omega /= embed_dim / 2.0
    omega = 1.0 / 10000 ** omega
    pos = pos.reshape(-1)
    out = np.einsum('m,d->md', pos, omega)
    return np.concatenate([np.sin(out), np.cos(out)], axis=1)


def get_2d_sincos_pos_embed(embed_dim, grid_size, cls_token=False):
    grid_h = np.arange(grid_size, dtype=np.float32)
    grid_w = np.arange(grid_size, dtype=np.float32)
    grid = np.meshgrid(grid_w, grid_h)
    grid = np.stack(grid, axis=0).reshape([2, 1, grid_size, grid_size])
    emb_h = get_1d_sincos_pos_embed_from_grid(embed_dim // 2, grid[0])
    emb_w = get_1d_sincos_pos_embed_from_grid(embed_dim // 2, grid[1])
    pos_embed = np.concatenate([emb_h, emb_w], axis=1)
    if cls_token:
        pos_embed = np.concatenate([np.zeros([1, embed_dim]), pos_embed], axis=0)
    return pos_embed


# ----------------------------------------------------------------------------
# In-kernel building blocks (pure jnp on VMEM-resident values)
# ----------------------------------------------------------------------------
def _layernorm(x, g, b):
    mu = jnp.mean(x, axis=-1, keepdims=True)
    var = jnp.mean((x - mu) ** 2, axis=-1, keepdims=True)
    return (x - mu) * jax.lax.rsqrt(var + LN_EPS) * g + b


def _vit_block(x, Wf, prefix, dim, n_heads, attn_bias):
    """timm-style pre-LN block on a (T_total, dim) lane-dense slab.

    attn_bias: static (T_total, T_total) additive bias (0 valid / -1e30 masked)
    encoding both per-image block-diagonal structure and padded-key masking.
    """
    dh = dim // n_heads
    scale = 1.0 / math.sqrt(dh)

    h = _layernorm(x, Wf(prefix + 'ln1_g'), Wf(prefix + 'ln1_b'))

    # One fused qkv projection (E -> 3E); per-head q/k/v are cheap lane slices.
    qkv = (jnp.dot(h, Wf(prefix + 'qkv_w'), preferred_element_type=jnp.float32)
           + Wf(prefix + 'qkv_b'))

    heads = []
    for hh in range(n_heads):                      # static unroll
        q = qkv[:, hh * dh:(hh + 1) * dh] * scale          # fold 1/sqrt(Dh) into q
        k = qkv[:, dim + hh * dh: dim + (hh + 1) * dh]
        v = qkv[:, 2 * dim + hh * dh: 2 * dim + (hh + 1) * dh]
        s = jax.lax.dot_general(q, k, (((1,), (1,)), ((), ())),
                                preferred_element_type=jnp.float32) + attn_bias
        s = s - jnp.max(s, axis=-1, keepdims=True)
        p = jnp.exp(s)
        p = p * pl.reciprocal(jnp.sum(p, axis=-1, keepdims=True), approx=True)
        heads.append(jnp.dot(p, v, preferred_element_type=jnp.float32))

    o = jnp.concatenate(heads, axis=-1)            # (T_total, dim) lane concat
    x = x + (jnp.dot(o, Wf(prefix + 'proj_w'), preferred_element_type=jnp.float32)
             + Wf(prefix + 'proj_b'))

    h2 = _layernorm(x, Wf(prefix + 'ln2_g'), Wf(prefix + 'ln2_b'))
    # TODO(synk): torch nn.GELU default is exact erf; tanh approximation used here.
    hid = jax.nn.gelu(jnp.dot(h2, Wf(prefix + 'fc1_w'), preferred_element_type=jnp.float32)
                      + Wf(prefix + 'fc1_b'), approximate=True)
    return x + (jnp.dot(hid, Wf(prefix + 'fc2_w'), preferred_element_type=jnp.float32)
                + Wf(prefix + 'fc2_b'))


def _make_kernel(layout, Bx):
    te_tot = Bx * T_ENC_PAD
    td_tot = Bx * T_DEC_PAD

    def kernel(patches_ref, target_ref, keep_ref, restore_ref, maskcol_ref,
               s64_ref, s192_ref, s128_ref, s96_ref, s32_ref, loss_ref):
        slabs = {'s64': s64_ref, 's192': s192_ref, 's128': s128_ref,
                 's96': s96_ref, 's32': s32_ref}

        def Wf(name):
            slab, off, n = layout[name]            # static, 8-aligned sublane slice
            return slabs[slab][off:off + n, :]

        # Hoisted once per kernel (shared by all blocks of each stage).
        enc_bias = Wf('enc_attn_bias')[:, :te_tot]
        dec_bias = Wf('dec_attn_bias')[:, :td_tot]

        # ---------------- encoder ----------------
        emb = (jnp.dot(patches_ref[...], Wf('patch_w'), preferred_element_type=jnp.float32)
               + Wf('patch_b') + Wf('pos_patch'))                       # (B*L, E_ENC)
        # Gather kept tokens (block-diagonal one-hot) and drop in cls(+pos) rows.
        x = (jnp.dot(keep_ref[...], emb, preferred_element_type=jnp.float32)
             + Wf('cls_add'))                                           # (B*T_enc, E_ENC)
        for l in range(N_LAYER_ENC):
            x = _vit_block(x, Wf, f'enc{l}_', E_ENC, N_HEAD_ENC, enc_bias)
        latent = _layernorm(x, Wf('norm_enc_g'), Wf('norm_enc_b'))

        # ---------------- decoder ----------------
        lat = (jnp.dot(latent, Wf('dec_embed_w'), preferred_element_type=jnp.float32)
               + Wf('dec_embed_b'))
        maskcol = maskcol_ref[...]                                      # (B*T_dec, 1)
        d = (jnp.dot(restore_ref[...], lat, preferred_element_type=jnp.float32)
             + maskcol * Wf('mask_token') + Wf('dec_pos'))              # (B*T_dec, E_DEC)
        for l in range(N_LAYER_DEC):
            d = _vit_block(d, Wf, f'dec{l}_', E_DEC, N_HEAD_DEC, dec_bias)
        d = _layernorm(d, Wf('norm_dec_g'), Wf('norm_dec_b'))

        # ---------------- reconstruction head + masked MSE ----------------
        pred = (jnp.dot(d, Wf('head_w'), preferred_element_type=jnp.float32)
                + Wf('head_b'))                                         # (B*T_dec, 64)
        diff = pred - target_ref[...]
        mse = jnp.mean(diff * diff, axis=-1, keepdims=True)             # (B*T_dec, 1)
        loss = jnp.sum(mse * maskcol) / jnp.sum(maskcol)
        lane = jax.lax.broadcasted_iota(jnp.int32, (1, 128), 1)
        loss_ref[...] = jnp.where(lane == 0, loss, 0.0)

    return kernel


# ----------------------------------------------------------------------------
# Weight packing: everything into 5 lane-width-homogeneous VMEM slabs.
# ----------------------------------------------------------------------------
def _attn_bias_const(n_img, t_pad, t_valid, lane_pad):
    """Block-diagonal additive attention bias, padded to `lane_pad` lanes."""
    t_tot = n_img * t_pad
    r = np.arange(t_tot)[:, None]
    c = np.arange(t_tot)[None, :]
    valid = (r // t_pad == c // t_pad) & ((c % t_pad) < t_valid)
    out = np.zeros((t_tot, lane_pad), np.float32)
    out[:, :t_tot] = np.where(valid, 0.0, _NEG_INF).astype(np.float32)
    return out


def _pack_weights(params, Bx):
    """Returns ({slab_name: array}, {entry: (slab_name, row_off, n_rows)})."""
    pieces = {s: [] for s in _SLAB_ORDER}
    cursors = {s: 0 for s in _SLAB_ORDER}
    layout = {}

    def add(slab, name, arr):
        arr = jnp.asarray(arr, jnp.float32)
        if arr.ndim == 1:
            arr = arr.reshape(1, -1)
        r = arr.shape[0]
        r_pad = -(-r // 8) * 8                      # keep every offset 8-aligned
        if r_pad != r:
            arr = jnp.concatenate(
                [arr, jnp.zeros((r_pad - r, arr.shape[1]), jnp.float32)], axis=0)
        layout[name] = (slab, cursors[slab], r)
        pieces[slab].append(arr)
        cursors[slab] += r_pad

    # ---- patch embed / positional / static masks ----
    add('s64', 'patch_w', params['patch_w'])
    add('s64', 'patch_b', params['patch_b'])
    add('s64', 'pos_patch', jnp.tile(params['pos_embed'][0, 1:, :], (Bx, 1)))
    cls_pos = params['cls_token'].reshape(1, E_ENC) + params['pos_embed'][0, :1, :]
    cls_rows = np.zeros((Bx * T_ENC_PAD, 1), np.float32)
    cls_rows[::T_ENC_PAD] = 1.0                     # per-image row 0 gets cls(+pos)
    add('s64', 'cls_add', jnp.asarray(cls_rows) * cls_pos)
    add('s64', 'enc_attn_bias', _attn_bias_const(Bx, T_ENC_PAD, 1 + LEN_KEEP, E_ENC))
    add('s64', 'dec_attn_bias', _attn_bias_const(Bx, T_DEC_PAD, 1 + NUM_PATCHES, E_ENC))

    # ---- encoder blocks ----
    for l, blk in enumerate(params['enc_blocks']):
        p = f'enc{l}_'
        add('s64', p + 'ln1_g', blk['ln1_g']); add('s64', p + 'ln1_b', blk['ln1_b'])
        add('s192', p + 'qkv_w', blk['qkv_w']); add('s192', p + 'qkv_b', blk['qkv_b'])
        add('s64', p + 'proj_w', blk['proj_w']); add('s64', p + 'proj_b', blk['proj_b'])
        add('s64', p + 'ln2_g', blk['ln2_g']); add('s64', p + 'ln2_b', blk['ln2_b'])
        add('s128', p + 'fc1_w', blk['fc1_w']); add('s128', p + 'fc1_b', blk['fc1_b'])
        add('s64', p + 'fc2_w', blk['fc2_w']); add('s64', p + 'fc2_b', blk['fc2_b'])
    add('s64', 'norm_enc_g', params['norm_enc_g'])
    add('s64', 'norm_enc_b', params['norm_enc_b'])

    # ---- decoder embed / positional ----
    add('s32', 'dec_embed_w', params['dec_embed_w'])
    add('s32', 'dec_embed_b', params['dec_embed_b'])
    add('s32', 'mask_token', params['mask_token'].reshape(1, E_DEC))
    dec_pos = jnp.concatenate(
        [params['dec_pos_embed'][0],
         jnp.zeros((T_DEC_PAD - (NUM_PATCHES + 1), E_DEC), jnp.float32)], axis=0)
    add('s32', 'dec_pos', jnp.tile(dec_pos, (Bx, 1)))

    # ---- decoder blocks ----
    for l, blk in enumerate(params['dec_blocks']):
        p = f'dec{l}_'
        add('s32', p + 'ln1_g', blk['ln1_g']); add('s32', p + 'ln1_b', blk['ln1_b'])
        add('s96', p + 'qkv_w', blk['qkv_w']); add('s96', p + 'qkv_b', blk['qkv_b'])
        add('s32', p + 'proj_w', blk['proj_w']); add('s32', p + 'proj_b', blk['proj_b'])
        add('s32', p + 'ln2_g', blk['ln2_g']); add('s32', p + 'ln2_b', blk['ln2_b'])
        add('s64', p + 'fc1_w', blk['fc1_w']); add('s64', p + 'fc1_b', blk['fc1_b'])
        add('s32', p + 'fc2_w', blk['fc2_w']); add('s32', p + 'fc2_b', blk['fc2_b'])
    add('s32', 'norm_dec_g', params['norm_dec_g'])
    add('s32', 'norm_dec_b', params['norm_dec_b'])
    add('s64', 'head_w', params['head_w'])
    add('s64', 'head_b', params['head_b'])

    slabs = {s: jnp.concatenate(pieces[s], axis=0) for s in _SLAB_ORDER}
    return slabs, layout


# ----------------------------------------------------------------------------
# Parameter init (deterministic, xavier-uniform like the reference)
# ----------------------------------------------------------------------------
def _xavier(key, shape, fan_in, fan_out):
    lim = math.sqrt(6.0 / (fan_in + fan_out))
    return jax.random.uniform(key, shape, jnp.float32, -lim, lim)


def init_block(key, dim, mlp_ratio):
    hid = dim * mlp_ratio
    ks = jax.random.split(key, 4)
    return dict(
        ln1_g=jnp.ones((dim,), jnp.float32), ln1_b=jnp.zeros((dim,), jnp.float32),
        qkv_w=_xavier(ks[0], (dim, 3 * dim), dim, 3 * dim),
        qkv_b=jnp.zeros((3 * dim,), jnp.float32),
        proj_w=_xavier(ks[1], (dim, dim), dim, dim),
        proj_b=jnp.zeros((dim,), jnp.float32),
        ln2_g=jnp.ones((dim,), jnp.float32), ln2_b=jnp.zeros((dim,), jnp.float32),
        fc1_w=_xavier(ks[2], (dim, hid), dim, hid),
        fc1_b=jnp.zeros((hid,), jnp.float32),
        fc2_w=_xavier(ks[3], (hid, dim), hid, dim),
        fc2_b=jnp.zeros((dim,), jnp.float32),
    )


def init_params(key):
    ks = jax.random.split(key, 8 + N_LAYER_ENC + N_LAYER_DEC)
    it = iter(ks)
    params = {}
    params['patch_w'] = _xavier(next(it), (PATCH_DIM, E_ENC), PATCH_DIM, E_ENC)
    params['patch_b'] = jnp.zeros((E_ENC,), jnp.float32)
    params['cls_token'] = 0.02 * jax.random.normal(next(it), (1, 1, E_ENC), jnp.float32)
    params['mask_token'] = 0.02 * jax.random.normal(next(it), (1, 1, E_DEC), jnp.float32)
    params['pos_embed'] = jnp.asarray(
        get_2d_sincos_pos_embed(E_ENC, GRID, cls_token=True), jnp.float32)[None]
    params['dec_pos_embed'] = jnp.asarray(
        get_2d_sincos_pos_embed(E_DEC, GRID, cls_token=True), jnp.float32)[None]
    params['enc_blocks'] = [init_block(next(it), E_ENC, MLP_RATIO) for _ in range(N_LAYER_ENC)]
    params['dec_blocks'] = [init_block(next(it), E_DEC, MLP_RATIO) for _ in range(N_LAYER_DEC)]
    params['norm_enc_g'] = jnp.ones((E_ENC,), jnp.float32)
    params['norm_enc_b'] = jnp.zeros((E_ENC,), jnp.float32)
    params['norm_dec_g'] = jnp.ones((E_DEC,), jnp.float32)
    params['norm_dec_b'] = jnp.zeros((E_DEC,), jnp.float32)
    params['dec_embed_w'] = _xavier(next(it), (E_ENC, E_DEC), E_ENC, E_DEC)
    params['dec_embed_b'] = jnp.zeros((E_DEC,), jnp.float32)
    params['head_w'] = _xavier(next(it), (E_DEC, PATCH_DIM), E_DEC, PATCH_DIM)
    params['head_b'] = jnp.zeros((PATCH_DIM,), jnp.float32)
    return params


# ----------------------------------------------------------------------------
# Data prep (tiny XLA reshapes / one-hots) + fused forward
# ----------------------------------------------------------------------------
def extract_patches_conv_order(x):
    # Conv2d(k=p, s=p) == gather patches in (c, ph, pw) order, then matmul.
    Bx = x.shape[0]
    x = x.reshape(Bx, C, GRID, P, GRID, P)
    x = jnp.transpose(x, (0, 2, 4, 1, 3, 5))             # (B, h, w, c, p, p)
    return x.reshape(Bx, NUM_PATCHES, PATCH_DIM)


def patchify(x):
    # reference: einsum 'nchpwq->nhwpqc' -> (B, L, p*p*c)
    Bx = x.shape[0]
    x = x.reshape(Bx, C, GRID, P, GRID, P)
    x = jnp.transpose(x, (0, 2, 4, 3, 5, 1))              # (B, h, w, p, q, c)
    return x.reshape(Bx, NUM_PATCHES, P * P * C)


@jax.jit
def mae_compute_loss(params, x, key):
    Bx = x.shape[0]
    te_tot = Bx * T_ENC_PAD
    td_tot = Bx * T_DEC_PAD
    lp_tot = Bx * NUM_PATCHES

    patches = extract_patches_conv_order(x).reshape(lp_tot, PATCH_DIM)   # (B*L, C*p*p)
    target = patchify(x)                                                 # (B, L, p*p*C)

    # ---- random masking bookkeeping (argsort / RNG have no Pallas equivalent) ----
    # TODO(synk): torch.rand + argsort RNG stream cannot be bit-reproduced; same
    # semantics implemented with jax.random.
    noise = jax.random.uniform(key, (Bx, NUM_PATCHES))
    ids_shuffle = jnp.argsort(noise, axis=1)
    ids_restore = jnp.argsort(ids_shuffle, axis=1)
    ids_keep = ids_shuffle[:, :LEN_KEEP]
    mask = (ids_restore >= LEN_KEEP).astype(jnp.float32)                 # (B, L), 1 = dropped

    # Encoder keep-gather as a block-diagonal one-hot operand (row 0/8 reserved for cls).
    glob_keep = ids_keep + jnp.arange(Bx)[:, None] * NUM_PATCHES
    keep_oh = jax.nn.one_hot(glob_keep, lp_tot, dtype=jnp.float32)       # (B, K, B*L)
    keep3 = jnp.zeros((Bx, T_ENC_PAD, lp_tot), jnp.float32)
    keep3 = keep3.at[:, 1:1 + LEN_KEEP, :].set(keep_oh)
    keep_mat = keep3.reshape(te_tot, lp_tot)                             # (B*T_enc, B*L)

    # Decoder un-shuffle as a block-diagonal one-hot operand (col = encoder token row).
    sel = jnp.where(ids_restore < LEN_KEEP, 1 + ids_restore, -1)         # -1 -> mask token
    glob_sel = jnp.where(sel >= 0, sel + jnp.arange(Bx)[:, None] * T_ENC_PAD, -1)
    restore_body = jax.nn.one_hot(glob_sel, te_tot, dtype=jnp.float32)   # (B, L, B*T_enc)
    restore3 = jnp.zeros((Bx, T_DEC_PAD, te_tot), jnp.float32)
    restore3 = restore3.at[:, 0, :].set(
        jax.nn.one_hot(jnp.arange(Bx) * T_ENC_PAD, te_tot, dtype=jnp.float32))  # cls rows
    restore3 = restore3.at[:, 1:1 + NUM_PATCHES, :].set(restore_body)
    restore_mat = restore3.reshape(td_tot, te_tot)                       # (B*T_dec, B*T_enc)

    maskcol3 = jnp.zeros((Bx, T_DEC_PAD, 1), jnp.float32)
    maskcol3 = maskcol3.at[:, 1:1 + NUM_PATCHES, 0].set(mask)
    maskcol = maskcol3.reshape(td_tot, 1)

    target_pad = jnp.zeros((Bx, T_DEC_PAD, PATCH_DIM), jnp.float32)
    target_pad = target_pad.at[:, 1:1 + NUM_PATCHES, :].set(target)
    target_pad = target_pad.reshape(td_tot, PATCH_DIM)

    slabs, layout = _pack_weights(params, Bx)

    inputs = [patches, target_pad, keep_mat, restore_mat, maskcol] \
             + [slabs[s] for s in _SLAB_ORDER]
    full_spec = lambda a: pl.BlockSpec(a.shape, lambda i: (0, 0))

    loss_vec = pl.pallas_call(
        _make_kernel(layout, Bx),
        out_shape=jax.ShapeDtypeStruct((1, 128), jnp.float32),
        grid=(1,),
        in_specs=[full_spec(a) for a in inputs],
        out_specs=pl.BlockSpec((1, 128), lambda i: (0, 0)),
        compiler_params=pltpu.CompilerParams(
            dimension_semantics=("arbitrary",)),
        cost_estimate=pl.CostEstimate(flops=4_200_000, transcendentals=20_000,
                                      bytes_accessed=500_000),
    )(*inputs)

    return dict(loss=loss_vec[0, 0])


# ----------------------------------------------------------------------------
if __name__ == "__main__":
    root = jax.random.PRNGKey(0)
    k_param, k_data, k_mask = jax.random.split(root, 3)

    params = init_params(k_param)
    x = jax.random.normal(k_data, (B, C, H, W), jnp.float32)   # NCHW like PyTorch

    out = mae_compute_loss(params, x, k_mask)
    loss = jax.block_until_ready(out['loss'])
    assert jnp.isfinite(loss), "loss is not finite"
    print("KERNEL_OK")
</pallas_src>

<mosaic_0001>
module attributes {stable_mosaic.version = 11 : i64} {
  func.func @kernel(%arg0: i32, %arg1: memref<32x64xf32, #tpu.memory_space<vmem>>, %arg2: memref<48x64xf32, #tpu.memory_space<vmem>>, %arg3: memref<16x32xf32, #tpu.memory_space<vmem>>, %arg4: memref<48x16xf32, #tpu.memory_space<vmem>>, %arg5: memref<48x1xf32, #tpu.memory_space<vmem>>, %arg6: memref<760x64xf32, #tpu.memory_space<vmem>>, %arg7: memref<144x192xf32, #tpu.memory_space<vmem>>, %arg8: memref<144x128xf32, #tpu.memory_space<vmem>>, %arg9: memref<40x96xf32, #tpu.memory_space<vmem>>, %arg10: memref<288x32xf32, #tpu.memory_space<vmem>>, %arg11: memref<1x128xf32, #tpu.memory_space<vmem>>) attributes {dimension_semantics = [#tpu.dimension_semantics<arbitrary>], iteration_bounds = array<i64: 1>, scalar_prefetch = 0 : i64, scratch_operands = 0 : i64, tpu.core_type = #tpu.core_type<tc>, window_params = [{pipeline_mode = #tpu.pipeline_mode<synchronous>, transform_indices = @transform_0, window_bounds = array<i64: 32, 64>}, {pipeline_mode = #tpu.pipeline_mode<synchronous>, transform_indices = @transform_1, window_bounds = array<i64: 48, 64>}, {pipeline_mode = #tpu.pipeline_mode<synchronous>, transform_indices = @transform_2, window_bounds = array<i64: 16, 32>}, {pipeline_mode = #tpu.pipeline_mode<synchronous>, transform_indices = @transform_3, window_bounds = array<i64: 48, 16>}, {pipeline_mode = #tpu.pipeline_mode<synchronous>, transform_indices = @transform_4, window_bounds = array<i64: 48, 1>}, {pipeline_mode = #tpu.pipeline_mode<synchronous>, transform_indices = @transform_5, window_bounds = array<i64: 760, 64>}, {pipeline_mode = #tpu.pipeline_mode<synchronous>, transform_indices = @transform_6, window_bounds = array<i64: 144, 192>}, {pipeline_mode = #tpu.pipeline_mode<synchronous>, transform_indices = @transform_7, window_bounds = array<i64: 144, 128>}, {pipeline_mode = #tpu.pipeline_mode<synchronous>, transform_indices = @transform_8, window_bounds = array<i64: 40, 96>}, {pipeline_mode = #tpu.pipeline_mode<synchronous>, transform_indices = @transform_9, window_bounds = array<i64: 288, 32>}, {pipeline_mode = #tpu.pipeline_mode<synchronous>, transform_indices = @transform_10, window_bounds = array<i64: 1, 128>}]} {
    %c120 = arith.constant 120 : index
    %c0 = arith.constant 0 : index
    %0 = vector.load %arg6[%c120, %c0] : memref<760x64xf32, #tpu.memory_space<vmem>>, vector<16x64xf32>
    %1 = vector.extract_strided_slice %0 {offsets = [0, 0], sizes = [16, 16], strides = [1, 1]} : vector<16x64xf32> to vector<16x16xf32>
    %c136 = arith.constant 136 : index
    %c0_0 = arith.constant 0 : index
    %2 = vector.load %arg6[%c136, %c0_0] : memref<760x64xf32, #tpu.memory_space<vmem>>, vector<48x64xf32>
    %3 = vector.extract_strided_slice %2 {offsets = [0, 0], sizes = [48, 48], strides = [1, 1]} : vector<48x64xf32> to vector<48x48xf32>
    %c0_1 = arith.constant 0 : index
    %c0_2 = arith.constant 0 : index
    %4 = vector.load %arg1[%c0_1, %c0_2] : memref<32x64xf32, #tpu.memory_space<vmem>>, vector<32x64xf32>
    %c0_3 = arith.constant 0 : index
    %c0_4 = arith.constant 0 : index
    %5 = vector.load %arg6[%c0_3, %c0_4] : memref<760x64xf32, #tpu.memory_space<vmem>>, vector<64x64xf32>
    %cst = arith.constant dense<0.000000e+00> : vector<32x64xf32>
    %6 = tpu.matmul %4, %5, %cst {dimension_numbers = #tpu.dot_dimension_numbers<[1], [0], [0], [1], [0, 0, 1, 1], [], []>} : vector<32x64xf32>, vector<64x64xf32>, vector<32x64xf32> -> vector<32x64xf32>
    %c64 = arith.constant 64 : index
    %c0_5 = arith.constant 0 : index
    %7 = vector.load %arg6[%c64, %c0_5] : memref<760x64xf32, #tpu.memory_space<vmem>>, vector<1x64xf32>
    %8 = vector.broadcast %7 : vector<1x64xf32> to vector<32x64xf32>
    %9 = arith.addf %6, %8 : vector<32x64xf32>
    %c72 = arith.constant 72 : index
    %c0_6 = arith.constant 0 : index
    %10 = vector.load %arg6[%c72, %c0_6] : memref<760x64xf32, #tpu.memory_space<vmem>>, vector<32x64xf32>
    %11 = arith.addf %9, %10 : vector<32x64xf32>
    %c0_7 = arith.constant 0 : index
    %c0_8 = arith.constant 0 : index
    %12 = vector.load %arg3[%c0_7, %c0_8] : memref<16x32xf32, #tpu.memory_space<vmem>>, vector<16x32xf32>
    %cst_9 = arith.constant dense<0.000000e+00> : vector<16x64xf32>
    %13 = tpu.matmul %12, %11, %cst_9 {dimension_numbers = #tpu.dot_dimension_numbers<[1], [0], [0], [1], [0, 0, 1, 1], [], []>} : vector<16x32xf32>, vector<32x64xf32>, vector<16x64xf32> -> vector<16x64xf32>
    %c104 = arith.constant 104 : index
    %c0_10 = arith.constant 0 : index
    %14 = vector.load %arg6[%c104, %c0_10] : memref<760x64xf32, #tpu.memory_space<vmem>>, vector<16x64xf32>
    %15 = arith.addf %13, %14 : vector<16x64xf32>
    %c184 = arith.constant 184 : index
    %c0_11 = arith.constant 0 : index
    %16 = vector.load %arg6[%c184, %c0_11] : memref<760x64xf32, #tpu.memory_space<vmem>>, vector<1x64xf32>
    %c192 = arith.constant 192 : index
    %c0_12 = arith.constant 0 : index
    %17 = vector.load %arg6[%c192, %c0_12] : memref<760x64xf32, #tpu.memory_space<vmem>>, vector<1x64xf32>
    %cst_13 = arith.constant dense<0.000000e+00> : vector<16xf32>
    %18 = vector.multi_reduction <add>, %15, %cst_13 [1] : vector<16x64xf32> to vector<16xf32>
    %19 = vector.shape_cast %18 : vector<16xf32> to vector<16x1xf32>
    %cst_14 = arith.constant 6.400000e+01 : f32
    %20 = vector.broadcast %cst_14 : f32 to vector<16x1xf32>
    %21 = arith.divf %19, %20 : vector<16x1xf32>
    %22 = vector.broadcast %21 : vector<16x1xf32> to vector<16x64xf32>
    %23 = arith.subf %15, %22 : vector<16x64xf32>
    %24 = arith.mulf %23, %23 : vector<16x64xf32>
    %cst_15 = arith.constant dense<0.000000e+00> : vector<16xf32>
    %25 = vector.multi_reduction <add>, %24, %cst_15 [1] : vector<16x64xf32> to vector<16xf32>
    %26 = vector.shape_cast %25 : vector<16xf32> to vector<16x1xf32>
    %cst_16 = arith.constant 6.400000e+01 : f32
    %27 = vector.broadcast %cst_16 : f32 to vector<16x1xf32>
    %28 = arith.divf %26, %27 : vector<16x1xf32>
    %29 = vector.broadcast %21 : vector<16x1xf32> to vector<16x64xf32>
    %30 = arith.subf %15, %29 : vector<16x64xf32>
    %cst_17 = arith.constant 9.99999974E-6 : f32
    %31 = vector.broadcast %cst_17 : f32 to vector<16x1xf32>
    %32 = arith.addf %28, %31 : vector<16x1xf32>
    %33 = math.rsqrt %32 : vector<16x1xf32>
    %34 = vector.broadcast %33 : vector<16x1xf32> to vector<16x64xf32>
    %35 = arith.mulf %30, %34 : vector<16x64xf32>
    %36 = vector.broadcast %16 : vector<1x64xf32> to vector<16x64xf32>
    %37 = arith.mulf %35, %36 : vector<16x64xf32>
    %38 = vector.broadcast %17 : vector<1x64xf32> to vector<16x64xf32>
    %39 = arith.addf %37, %38 : vector<16x64xf32>
    %c0_18 = arith.constant 0 : index
    %c0_19 = arith.constant 0 : index
    %40 = vector.load %arg7[%c0_18, %c0_19] : memref<144x192xf32, #tpu.memory_space<vmem>>, vector<64x192xf32>
    %cst_20 = arith.constant dense<0.000000e+00> : vector<16x192xf32>
    %41 = tpu.matmul %39, %40, %cst_20 {dimension_numbers = #tpu.dot_dimension_numbers<[1], [0], [0], [1], [0, 0, 1, 1], [], []>} : vector<16x64xf32>, vector<64x192xf32>, vector<16x192xf32> -> vector<16x192xf32>
    %c64_21 = arith.constant 64 : index
    %c0_22 = arith.constant 0 : index
    %42 = vector.load %arg7[%c64_21, %c0_22] : memref<144x192xf32, #tpu.memory_space<vmem>>, vector<1x192xf32>
    %43 = vector.broadcast %42 : vector<1x192xf32> to vector<16x192xf32>
    %44 = arith.addf %41, %43 : vector<16x192xf32>
    %45 = vector.extract_strided_slice %44 {offsets = [0, 0], sizes = [16, 16], strides = [1, 1]} : vector<16x192xf32> to vector<16x16xf32>
    %cst_23 = arith.constant 2.500000e-01 : f32
    %46 = vector.broadcast %cst_23 : f32 to vector<16x16xf32>
    %47 = arith.mulf %45, %46 : vector<16x16xf32>
    %48 = vector.extract_strided_slice %44 {offsets = [0, 64], sizes = [16, 16], strides = [1, 1]} : vector<16x192xf32> to vector<16x16xf32>
    %49 = vector.extract_strided_slice %44 {offsets = [0, 128], sizes = [16, 16], strides = [1, 1]} : vector<16x192xf32> to vector<16x16xf32>
    %cst_24 = arith.constant dense<0.000000e+00> : vector<16x16xf32>
    %50 = tpu.matmul %47, %48, %cst_24 {dimension_numbers = #tpu.dot_dimension_numbers<[1], [1], [0], [0], [0, 0, 1, 0], [], []>} : vector<16x16xf32>, vector<16x16xf32>, vector<16x16xf32> -> vector<16x16xf32>
    %51 = arith.addf %50, %1 : vector<16x16xf32>
    %cst_25 = arith.constant dense<0xFF800000> : vector<16xf32>
    %52 = vector.multi_reduction <maximumf>, %51, %cst_25 [1] : vector<16x16xf32> to vector<16xf32>
    %53 = vector.shape_cast %52 : vector<16xf32> to vector<16x1xf32>
    %54 = vector.broadcast %53 : vector<16x1xf32> to vector<16x16xf32>
    %55 = arith.subf %51, %54 : vector<16x16xf32>
    %56 = math.exp %55 : vector<16x16xf32>
    %cst_26 = arith.constant dense<0.000000e+00> : vector<16xf32>
    %57 = vector.multi_reduction <add>, %56, %cst_26 [1] : vector<16x16xf32> to vector<16xf32>
    %58 = vector.shape_cast %57 : vector<16xf32> to vector<16x1xf32>
    %59 = tpu.reciprocal %58 {approx = true} : vector<16x1xf32> -> vector<16x1xf32>
    %60 = vector.broadcast %59 : vector<16x1xf32> to vector<16x16xf32>
    %61 = arith.mulf %56, %60 : vector<16x16xf32>
    %cst_27 = arith.constant dense<0.000000e+00> : vector<16x16xf32>
    %62 = tpu.matmul %61, %49, %cst_27 {dimension_numbers = #tpu.dot_dimension_numbers<[1], [0], [0], [1], [0, 0, 1, 1], [], []>} : vector<16x16xf32>, vector<16x16xf32>, vector<16x16xf32> -> vector<16x16xf32>
    %63 = vector.extract_strided_slice %44 {offsets = [0, 16], sizes = [16, 16], strides = [1, 1]} : vector<16x192xf32> to vector<16x16xf32>
    %cst_28 = arith.constant 2.500000e-01 : f32
    %64 = vector.broadcast %cst_28 : f32 to vector<16x16xf32>
    %65 = arith.mulf %63, %64 : vector<16x16xf32>
    %66 = vector.extract_strided_slice %44 {offsets = [0, 80], sizes = [16, 16], strides = [1, 1]} : vector<16x192xf32> to vector<16x16xf32>
    %67 = vector.extract_strided_slice %44 {offsets = [0, 144], sizes = [16, 16], strides = [1, 1]} : vector<16x192xf32> to vector<16x16xf32>
    %cst_29 = arith.constant dense<0.000000e+00> : vector<16x16xf32>
    %68 = tpu.matmul %65, %66, %cst_29 {dimension_numbers = #tpu.dot_dimension_numbers<[1], [1], [0], [0], [0, 0, 1, 0], [], []>} : vector<16x16xf32>, vector<16x16xf32>, vector<16x16xf32> -> vector<16x16xf32>
    %69 = arith.addf %68, %1 : vector<16x16xf32>
    %cst_30 = arith.constant dense<0xFF800000> : vector<16xf32>
    %70 = vector.multi_reduction <maximumf>, %69, %cst_30 [1] : vector<16x16xf32> to vector<16xf32>
    %71 = vector.shape_cast %70 : vector<16xf32> to vector<16x1xf32>
    %72 = vector.broadcast %71 : vector<16x1xf32> to vector<16x16xf32>
    %73 = arith.subf %69, %72 : vector<16x16xf32>
    %74 = math.exp %73 : vector<16x16xf32>
    %cst_31 = arith.constant dense<0.000000e+00> : vector<16xf32>
    %75 = vector.multi_reduction <add>, %74, %cst_31 [1] : vector<16x16xf32> to vector<16xf32>
    %76 = vector.shape_cast %75 : vector<16xf32> to vector<16x1xf32>
    %77 = tpu.reciprocal %76 {approx = true} : vector<16x1xf32> -> vector<16x1xf32>
    %78 = vector.broadcast %77 : vector<16x1xf32> to vector<16x16xf32>
    %79 = arith.mulf %74, %78 : vector<16x16xf32>
    %cst_32 = arith.constant dense<0.000000e+00> : vector<16x16xf32>
    %80 = tpu.matmul %79, %67, %cst_32 {dimension_numbers = #tpu.dot_dimension_numbers<[1], [0], [0], [1], [0, 0, 1, 1], [], []>} : vector<16x16xf32>, vector<16x16xf32>, vector<16x16xf32> -> vector<16x16xf32>
    %81 = vector.extract_strided_slice %44 {offsets = [0, 32], sizes = [16, 16], strides = [1, 1]} : vector<16x192xf32> to vector<16x16xf32>
    %cst_33 = arith.constant 2.500000e-01 : f32
    %82 = vector.broadcast %cst_33 : f32 to vector<16x16xf32>
    %83 = arith.mulf %81, %82 : vector<16x16xf32>
    %84 = vector.extract_strided_slice %44 {offsets = [0, 96], sizes = [16, 16], strides = [1, 1]} : vector<16x192xf32> to vector<16x16xf32>
    %85 = vector.extract_strided_slice %44 {offsets = [0, 160], sizes = [16, 16], strides = [1, 1]} : vector<16x192xf32> to vector<16x16xf32>
    %cst_34 = arith.constant dense<0.000000e+00> : vector<16x16xf32>
    %86 = tpu.matmul %83, %84, %cst_34 {dimension_numbers = #tpu.dot_dimension_numbers<[1], [1], [0], [0], [0, 0, 1, 0], [], []>} : vector<16x16xf32>, vector<16x16xf32>, vector<16x16xf32> -> vector<16x16xf32>
    %87 = arith.addf %86, %1 : vector<16x16xf32>
    %cst_35 = arith.constant dense<0xFF800000> : vector<16xf32>
    %88 = vector.multi_reduction <maximumf>, %87, %cst_35 [1] : vector<16x16xf32> to vector<16xf32>
    %89 = vector.shape_cast %88 : vector<16xf32> to vector<16x1xf32>
    %90 = vector.broadcast %89 : vector<16x1xf32> to vector<16x16xf32>
    %91 = arith.subf %87, %90 : vector<16x16xf32>
    %92 = math.exp %91 : vector<16x16xf32>
    %cst_36 = arith.constant dense<0.000000e+00> : vector<16xf32>
    %93 = vector.multi_reduction <add>, %92, %cst_36 [1] : vector<16x16xf32> to vector<16xf32>
    %94 = vector.shape_cast %93 : vector<16xf32> to vector<16x1xf32>
    %95 = tpu.reciprocal %94 {approx = true} : vector<16x1xf32> -> vector<16x1xf32>
    %96 = vector.broadcast %95 : vector<16x1xf32> to vector<16x16xf32>
    %97 = arith.mulf %92, %96 : vector<16x16xf32>
    %cst_37 = arith.constant dense<0.000000e+00> : vector<16x16xf32>
    %98 = tpu.matmul %97, %85, %cst_37 {dimension_numbers = #tpu.dot_dimension_numbers<[1], [0], [0], [1], [0, 0, 1, 1], [], []>} : vector<16x16xf32>, vector<16x16xf32>, vector<16x16xf32> -> vector<16x16xf32>
    %99 = vector.extract_strided_slice %44 {offsets = [0, 48], sizes = [16, 16], strides = [1, 1]} : vector<16x192xf32> to vector<16x16xf32>
    %cst_38 = arith.constant 2.500000e-01 : f32
    %100 = vector.broadcast %cst_38 : f32 to vector<16x16xf32>
    %101 = arith.mulf %99, %100 : vector<16x16xf32>
    %102 = vector.extract_strided_slice %44 {offsets = [0, 112], sizes = [16, 16], strides = [1, 1]} : vector<16x192xf32> to vector<16x16xf32>
    %103 = vector.extract_strided_slice %44 {offsets = [0, 176], sizes = [16, 16], strides = [1, 1]} : vector<16x192xf32> to vector<16x16xf32>
    %cst_39 = arith.constant dense<0.000000e+00> : vector<16x16xf32>
    %104 = tpu.matmul %101, %102, %cst_39 {dimension_numbers = #tpu.dot_dimension_numbers<[1], [1], [0], [0], [0, 0, 1, 0], [], []>} : vector<16x16xf32>, vector<16x16xf32>, vector<16x16xf32> -> vector<16x16xf32>
    %105 = arith.addf %104, %1 : vector<16x16xf32>
    %cst_40 = arith.constant dense<0xFF800000> : vector<16xf32>
    %106 = vector.multi_reduction <maximumf>, %105, %cst_40 [1] : vector<16x16xf32> to vector<16xf32>
    %107 = vector.shape_cast %106 : vector<16xf32> to vector<16x1xf32>
    %108 = vector.broadcast %107 : vector<16x1xf32> to vector<16x16xf32>
    %109 = arith.subf %105, %108 : vector<16x16xf32>
    %110 = math.exp %109 : vector<16x16xf32>
    %cst_41 = arith.constant dense<0.000000e+00> : vector<16xf32>
    %111 = vector.multi_reduction <add>, %110, %cst_41 [1] : vector<16x16xf32> to vector<16xf32>
    %112 = vector.shape_cast %111 : vector<16xf32> to vector<16x1xf32>
    %113 = tpu.reciprocal %112 {approx = true} : vector<16x1xf32> -> vector<16x1xf32>
    %114 = vector.broadcast %113 : vector<16x1xf32> to vector<16x16xf32>
    %115 = arith.mulf %110, %114 : vector<16x16xf32>
    %cst_42 = arith.constant dense<0.000000e+00> : vector<16x16xf32>
    %116 = tpu.matmul %115, %103, %cst_42 {dimension_numbers = #tpu.dot_dimension_numbers<[1], [0], [0], [1], [0, 0, 1, 1], [], []>} : vector<16x16xf32>, vector<16x16xf32>, vector<16x16xf32> -> vector<16x16xf32>
    %117 = tpu.concatenate %62, %80, %98, %116 in 1 : vector<16x16xf32>, vector<16x16xf32>, vector<16x16xf32>, vector<16x16xf32> -> vector<16x64xf32>
    %c200 = arith.constant 200 : index
    %c0_43 = arith.constant 0 : index
    %118 = vector.load %arg6[%c200, %c0_43] : memref<760x64xf32, #tpu.memory_space<vmem>>, vector<64x64xf32>
    %cst_44 = arith.constant dense<0.000000e+00> : vector<16x64xf32>
    %119 = tpu.matmul %117, %118, %cst_44 {dimension_numbers = #tpu.dot_dimension_numbers<[1], [0], [0], [1], [0, 0, 1, 1], [], []>} : vector<16x64xf32>, vector<64x64xf32>, vector<16x64xf32> -> vector<16x64xf32>
    %c264 = arith.constant 264 : index
    %c0_45 = arith.constant 0 : index
    %120 = vector.load %arg6[%c264, %c0_45] : memref<760x64xf32, #tpu.memory_space<vmem>>, vector<1x64xf32>
    %121 = vector.broadcast %120 : vector<1x64xf32> to vector<16x64xf32>
    %122 = arith.addf %119, %121 : vector<16x64xf32>
    %123 = arith.addf %15, %122 : vector<16x64xf32>
    %c272 = arith.constant 272 : index
    %c0_46 = arith.constant 0 : index
    %124 = vector.load %arg6[%c272, %c0_46] : memref<760x64xf32, #tpu.memory_space<vmem>>, vector<1x64xf32>
    %c280 = arith.constant 280 : index
    %c0_47 = arith.constant 0 : index
    %125 = vector.load %arg6[%c280, %c0_47] : memref<760x64xf32, #tpu.memory_space<vmem>>, vector<1x64xf32>
    %cst_48 = arith.constant dense<0.000000e+00> : vector<16xf32>
    %126 = vector.multi_reduction <add>, %123, %cst_48 [1] : vector<16x64xf32> to vector<16xf32>
    %127 = vector.shape_cast %126 : vector<16xf32> to vector<16x1xf32>
    %cst_49 = arith.constant 6.400000e+01 : f32
    %128 = vector.broadcast %cst_49 : f32 to vector<16x1xf32>
    %129 = arith.divf %127, %128 : vector<16x1xf32>
    %130 = vector.broadcast %129 : vector<16x1xf32> to vector<16x64xf32>
    %131 = arith.subf %123, %130 : vector<16x64xf32>
    %132 = arith.mulf %131, %131 : vector<16x64xf32>
    %cst_50 = arith.constant dense<0.000000e+00> : vector<16xf32>
    %133 = vector.multi_reduction <add>, %132, %cst_50 [1] : vector<16x64xf32> to vector<16xf32>
    %134 = vector.shape_cast %133 : vector<16xf32> to vector<16x1xf32>
    %cst_51 = arith.constant 6.400000e+01 : f32
    %135 = vector.broadcast %cst_51 : f32 to vector<16x1xf32>
    %136 = arith.divf %134, %135 : vector<16x1xf32>
    %137 = vector.broadcast %129 : vector<16x1xf32> to vector<16x64xf32>
    %138 = arith.subf %123, %137 : vector<16x64xf32>
    %cst_52 = arith.constant 9.99999974E-6 : f32
    %139 = vector.broadcast %cst_52 : f32 to vector<16x1xf32>
    %140 = arith.addf %136, %139 : vector<16x1xf32>
    %141 = math.rsqrt %140 : vector<16x1xf32>
    %142 = vector.broadcast %141 : vector<16x1xf32> to vector<16x64xf32>
    %143 = arith.mulf %138, %142 : vector<16x64xf32>
    %144 = vector.broadcast %124 : vector<1x64xf32> to vector<16x64xf32>
    %145 = arith.mulf %143, %144 : vector<16x64xf32>
    %146 = vector.broadcast %125 : vector<1x64xf32> to vector<16x64xf32>
    %147 = arith.addf %145, %146 : vector<16x64xf32>
    %c0_53 = arith.constant 0 : index
    %c0_54 = arith.constant 0 : index
    %148 = vector.load %arg8[%c0_53, %c0_54] : memref<144x128xf32, #tpu.memory_space<vmem>>, vector<64x128xf32>
    %cst_55 = arith.constant dense<0.000000e+00> : vector<16x128xf32>
    %149 = tpu.matmul %147, %148, %cst_55 {dimension_numbers = #tpu.dot_dimension_numbers<[1], [0], [0], [1], [0, 0, 1, 1], [], []>} : vector<16x64xf32>, vector<64x128xf32>, vector<16x128xf32> -> vector<16x128xf32>
    %c64_56 = arith.constant 64 : index
    %c0_57 = arith.constant 0 : index
    %150 = vector.load %arg8[%c64_56, %c0_57] : memref<144x128xf32, #tpu.memory_space<vmem>>, vector<1x128xf32>
    %151 = vector.broadcast %150 : vector<1x128xf32> to vector<16x128xf32>
    %152 = arith.addf %149, %151 : vector<16x128xf32>
    %153 = arith.mulf %152, %152 : vector<16x128xf32>
    %154 = arith.mulf %152, %153 : vector<16x128xf32>
    %cst_58 = arith.constant 4.471500e-02 : f32
    %155 = vector.broadcast %cst_58 : f32 to vector<16x128xf32>
    %156 = arith.mulf %155, %154 : vector<16x128xf32>
    %157 = arith.addf %152, %156 : vector<16x128xf32>
    %cst_59 = arith.constant 0.797884583 : f32
    %158 = vector.broadcast %cst_59 : f32 to vector<16x128xf32>
    %159 = arith.mulf %158, %157 : vector<16x128xf32>
    %160 = math.tanh %159 : vector<16x128xf32>
    %cst_60 = arith.constant 1.000000e+00 : f32
    %161 = vector.broadcast %cst_60 : f32 to vector<16x128xf32>
    %162 = arith.addf %161, %160 : vector<16x128xf32>
    %cst_61 = arith.constant 5.000000e-01 : f32
    %163 = vector.broadcast %cst_61 : f32 to vector<16x128xf32>
    %164 = arith.mulf %163, %162 : vector<16x128xf32>
    %165 = arith.mulf %152, %164 : vector<16x128xf32>
    %c288 = arith.constant 288 : index
    %c0_62 = arith.constant 0 : index
    %166 = vector.load %arg6[%c288, %c0_62] : memref<760x64xf32, #tpu.memory_space<vmem>>, vector<128x64xf32>
    %cst_63 = arith.constant dense<0.000000e+00> : vector<16x64xf32>
    %167 = tpu.matmul %165, %166, %cst_63 {dimension_numbers = #tpu.dot_dimension_numbers<[1], [0], [0], [1], [0, 0, 1, 1], [], []>} : vector<16x128xf32>, vector<128x64xf32>, vector<16x64xf32> -> vector<16x64xf32>
    %c416 = arith.constant 416 : index
    %c0_64 = arith.constant 0 : index
    %168 = vector.load %arg6[%c416, %c0_64] : memref<760x64xf32, #tpu.memory_space<vmem>>, vector<1x64xf32>
    %169 = vector.broadcast %168 : vector<1x64xf32> to vector<16x64xf32>
    %170 = arith.addf %167, %169 : vector<16x64xf32>
    %171 = arith.addf %123, %170 : vector<16x64xf32>
    %c424 = arith.constant 424 : index
    %c0_65 = arith.constant 0 : index
    %172 = vector.load %arg6[%c424, %c0_65] : memref<760x64xf32, #tpu.memory_space<vmem>>, vector<1x64xf32>
    %c432 = arith.constant 432 : index
    %c0_66 = arith.constant 0 : index
    %173 = vector.load %arg6[%c432, %c0_66] : memref<760x64xf32, #tpu.memory_space<vmem>>, vector<1x64xf32>
    %cst_67 = arith.constant dense<0.000000e+00> : vector<16xf32>
    %174 = vector.multi_reduction <add>, %171, %cst_67 [1] : vector<16x64xf32> to vector<16xf32>
    %175 = vector.shape_cast %174 : vector<16xf32> to vector<16x1xf32>
    %cst_68 = arith.constant 6.400000e+01 : f32
    %176 = vector.broadcast %cst_68 : f32 to vector<16x1xf32>
    %177 = arith.divf %175, %176 : vector<16x1xf32>
    %178 = vector.broadcast %177 : vector<16x1xf32> to vector<16x64xf32>
    %179 = arith.subf %171, %178 : vector<16x64xf32>
    %180 = arith.mulf %179, %179 : vector<16x64xf32>
    %cst_69 = arith.constant dense<0.000000e+00> : vector<16xf32>
    %181 = vector.multi_reduction <add>, %180, %cst_69 [1] : vector<16x64xf32> to vector<16xf32>
    %182 = vector.shape_cast %181 : vector<16xf32> to vector<16x1xf32>
    %cst_70 = arith.constant 6.400000e+01 : f32
    %183 = vector.broadcast %cst_70 : f32 to vector<16x1xf32>
    %184 = arith.divf %182, %183 : vector<16x1xf32>
    %185 = vector.broadcast %177 : vector<16x1xf32> to vector<16x64xf32>
    %186 = arith.subf %171, %185 : vector<16x64xf32>
    %cst_71 = arith.constant 9.99999974E-6 : f32
    %187 = vector.broadcast %cst_71 : f32 to vector<16x1xf32>
    %188 = arith.addf %184, %187 : vector<16x1xf32>
    %189 = math.rsqrt %188 : vector<16x1xf32>
    %190 = vector.broadcast %189 : vector<16x1xf32> to vector<16x64xf32>
    %191 = arith.mulf %186, %190 : vector<16x64xf32>
    %192 = vector.broadcast %172 : vector<1x64xf32> to vector<16x64xf32>
    %193 = arith.mulf %191, %192 : vector<16x64xf32>
    %194 = vector.broadcast %173 : vector<1x64xf32> to vector<16x64xf32>
    %195 = arith.addf %193, %194 : vector<16x64xf32>
    %c72_72 = arith.constant 72 : index
    %c0_73 = arith.constant 0 : index
    %196 = vector.load %arg7[%c72_72, %c0_73] : memref<144x192xf32, #tpu.memory_space<vmem>>, vector<64x192xf32>
    %cst_74 = arith.constant dense<0.000000e+00> : vector<16x192xf32>
    %197 = tpu.matmul %195, %196, %cst_74 {dimension_numbers = #tpu.dot_dimension_numbers<[1], [0], [0], [1], [0, 0, 1, 1], [], []>} : vector<16x64xf32>, vector<64x192xf32>, vector<16x192xf32> -> vector<16x192xf32>
    %c136_75 = arith.constant 136 : index
    %c0_76 = arith.constant 0 : index
    %198 = vector.load %arg7[%c136_75, %c0_76] : memref<144x192xf32, #tpu.memory_space<vmem>>, vector<1x192xf32>
    %199 = vector.broadcast %198 : vector<1x192xf32> to vector<16x192xf32>
    %200 = arith.addf %197, %199 : vector<16x192xf32>
    %201 = vector.extract_strided_slice %200 {offsets = [0, 0], sizes = [16, 16], strides = [1, 1]} : vector<16x192xf32> to vector<16x16xf32>
    %cst_77 = arith.constant 2.500000e-01 : f32
    %202 = vector.broadcast %cst_77 : f32 to vector<16x16xf32>
    %203 = arith.mulf %201, %202 : vector<16x16xf32>
    %204 = vector.extract_strided_slice %200 {offsets = [0, 64], sizes = [16, 16], strides = [1, 1]} : vector<16x192xf32> to vector<16x16xf32>
    %205 = vector.extract_strided_slice %200 {offsets = [0, 128], sizes = [16, 16], strides = [1, 1]} : vector<16x192xf32> to vector<16x16xf32>
    %cst_78 = arith.constant dense<0.000000e+00> : vector<16x16xf32>
    %206 = tpu.matmul %203, %204, %cst_78 {dimension_numbers = #tpu.dot_dimension_numbers<[1], [1], [0], [0], [0, 0, 1, 0], [], []>} : vector<16x16xf32>, vector<16x16xf32>, vector<16x16xf32> -> vector<16x16xf32>
    %207 = arith.addf %206, %1 : vector<16x16xf32>
    %cst_79 = arith.constant dense<0xFF800000> : vector<16xf32>
    %208 = vector.multi_reduction <maximumf>, %207, %cst_79 [1] : vector<16x16xf32> to vector<16xf32>
    %209 = vector.shape_cast %208 : vector<16xf32> to vector<16x1xf32>
    %210 = vector.broadcast %209 : vector<16x1xf32> to vector<16x16xf32>
    %211 = arith.subf %207, %210 : vector<16x16xf32>
    %212 = math.exp %211 : vector<16x16xf32>
    %cst_80 = arith.constant dense<0.000000e+00> : vector<16xf32>
    %213 = vector.multi_reduction <add>, %212, %cst_80 [1] : vector<16x16xf32> to vector<16xf32>
    %214 = vector.shape_cast %213 : vector<16xf32> to vector<16x1xf32>
    %215 = tpu.reciprocal %214 {approx = true} : vector<16x1xf32> -> vector<16x1xf32>
    %216 = vector.broadcast %215 : vector<16x1xf32> to vector<16x16xf32>
    %217 = arith.mulf %212, %216 : vector<16x16xf32>
    %cst_81 = arith.constant dense<0.000000e+00> : vector<16x16xf32>
    %218 = tpu.matmul %217, %205, %cst_81 {dimension_numbers = #tpu.dot_dimension_numbers<[1], [0], [0], [1], [0, 0, 1, 1], [], []>} : vector<16x16xf32>, vector<16x16xf32>, vector<16x16xf32> -> vector<16x16xf32>
    %219 = vector.extract_strided_slice %200 {offsets = [0, 16], sizes = [16, 16], strides = [1, 1]} : vector<16x192xf32> to vector<16x16xf32>
    %cst_82 = arith.constant 2.500000e-01 : f32
    %220 = vector.broadcast %cst_82 : f32 to vector<16x16xf32>
    %221 = arith.mulf %219, %220 : vector<16x16xf32>
    %222 = vector.extract_strided_slice %200 {offsets = [0, 80], sizes = [16, 16], strides = [1, 1]} : vector<16x192xf32> to vector<16x16xf32>
    %223 = vector.extract_strided_slice %200 {offsets = [0, 144], sizes = [16, 16], strides = [1, 1]} : vector<16x192xf32> to vector<16x16xf32>
    %cst_83 = arith.constant dense<0.000000e+00> : vector<16x16xf32>
    %224 = tpu.matmul %221, %222, %cst_83 {dimension_numbers = #tpu.dot_dimension_numbers<[1], [1], [0], [0], [0, 0, 1, 0], [], []>} : vector<16x16xf32>, vector<16x16xf32>, vector<16x16xf32> -> vector<16x16xf32>
    %225 = arith.addf %224, %1 : vector<16x16xf32>
    %cst_84 = arith.constant dense<0xFF800000> : vector<16xf32>
    %226 = vector.multi_reduction <maximumf>, %225, %cst_84 [1] : vector<16x16xf32> to vector<16xf32>
    %227 = vector.shape_cast %226 : vector<16xf32> to vector<16x1xf32>
    %228 = vector.broadcast %227 : vector<16x1xf32> to vector<16x16xf32>
    %229 = arith.subf %225, %228 : vector<16x16xf32>
    %230 = math.exp %229 : vector<16x16xf32>
    %cst_85 = arith.constant dense<0.000000e+00> : vector<16xf32>
    %231 = vector.multi_reduction <add>, %230, %cst_85 [1] : vector<16x16xf32> to vector<16xf32>
    %232 = vector.shape_cast %231 : vector<16xf32> to vector<16x1xf32>
    %233 = tpu.reciprocal %232 {approx = true} : vector<16x1xf32> -> vector<16x1xf32>
    %234 = vector.broadcast %233 : vector<16x1xf32> to vector<16x16xf32>
    %235 = arith.mulf %230, %234 : vector<16x16xf32>
    %cst_86 = arith.constant dense<0.000000e+00> : vector<16x16xf32>
    %236 = tpu.matmul %235, %223, %cst_86 {dimension_numbers = #tpu.dot_dimension_numbers<[1], [0], [0], [1], [0, 0, 1, 1], [], []>} : vector<16x16xf32>, vector<16x16xf32>, vector<16x16xf32> -> vector<16x16xf32>
    %237 = vector.extract_strided_slice %200 {offsets = [0, 32], sizes = [16, 16], strides = [1, 1]} : vector<16x192xf32> to vector<16x16xf32>
    %cst_87 = arith.constant 2.500000e-01 : f32
    %238 = vector.broadcast %cst_87 : f32 to vector<16x16xf32>
    %239 = arith.mulf %237, %238 : vector<16x16xf32>
    %240 = vector.extract_strided_slice %200 {offsets = [0, 96], sizes = [16, 16], strides = [1, 1]} : vector<16x192xf32> to vector<16x16xf32>
    %241 = vector.extract_strided_slice %200 {offsets = [0, 160], sizes = [16, 16], strides = [1, 1]} : vector<16x192xf32> to vector<16x16xf32>
    %cst_88 = arith.constant dense<0.000000e+00> : vector<16x16xf32>
    %242 = tpu.matmul %239, %240, %cst_88 {dimension_numbers = #tpu.dot_dimension_numbers<[1], [1], [0], [0], [0, 0, 1, 0], [], []>} : vector<16x16xf32>, vector<16x16xf32>, vector<16x16xf32> -> vector<16x16xf32>
    %243 = arith.addf %242, %1 : vector<16x16xf32>
    %cst_89 = arith.constant dense<0xFF800000> : vector<16xf32>
    %244 = vector.multi_reduction <maximumf>, %243, %cst_89 [1] : vector<16x16xf32> to vector<16xf32>
    %245 = vector.shape_cast %244 : vector<16xf32> to vector<16x1xf32>
    %246 = vector.broadcast %245 : vector<16x1xf32> to vector<16x16xf32>
    %247 = arith.subf %243, %246 : vector<16x16xf32>
    %248 = math.exp %247 : vector<16x16xf32>
    %cst_90 = arith.constant dense<0.000000e+00> : vector<16xf32>
    %249 = vector.multi_reduction <add>, %248, %cst_90 [1] : vector<16x16xf32> to vector<16xf32>
    %250 = vector.shape_cast %249 : vector<16xf32> to vector<16x1xf32>
    %251 = tpu.reciprocal %250 {approx = true} : vector<16x1xf32> -> vector<16x1xf32>
    %252 = vector.broadcast %251 : vector<16x1xf32> to vector<16x16xf32>
    %253 = arith.mulf %248, %252 : vector<16x16xf32>
    %cst_91 = arith.constant dense<0.000000e+00> : vector<16x16xf32>
    %254 = tpu.matmul %253, %241, %cst_91 {dimension_numbers = #tpu.dot_dimension_numbers<[1], [0], [0], [1], [0, 0, 1, 1], [], []>} : vector<16x16xf32>, vector<16x16xf32>, vector<16x16xf32> -> vector<16x16xf32>
    %255 = vector.extract_strided_slice %200 {offsets = [0, 48], sizes = [16, 16], strides = [1, 1]} : vector<16x192xf32> to vector<16x16xf32>
    %cst_92 = arith.constant 2.500000e-01 : f32
    %256 = vector.broadcast %cst_92 : f32 to vector<16x16xf32>
    %257 = arith.mulf %255, %256 : vector<16x16xf32>
    %258 = vector.extract_strided_slice %200 {offsets = [0, 112], sizes = [16, 16], strides = [1, 1]} : vector<16x192xf32> to vector<16x16xf32>
    %259 = vector.extract_strided_slice %200 {offsets = [0, 176], sizes = [16, 16], strides = [1, 1]} : vector<16x192xf32> to vector<16x16xf32>
    %cst_93 = arith.constant dense<0.000000e+00> : vector<16x16xf32>
    %260 = tpu.matmul %257, %258, %cst_93 {dimension_numbers = #tpu.dot_dimension_numbers<[1], [1], [0], [0], [0, 0, 1, 0], [], []>} : vector<16x16xf32>, vector<16x16xf32>, vector<16x16xf32> -> vector<16x16xf32>
    %261 = arith.addf %260, %1 : vector<16x16xf32>
    %cst_94 = arith.constant dense<0xFF800000> : vector<16xf32>
    %262 = vector.multi_reduction <maximumf>, %261, %cst_94 [1] : vector<16x16xf32> to vector<16xf32>
    %263 = vector.shape_cast %262 : vector<16xf32> to vector<16x1xf32>
    %264 = vector.broadcast %263 : vector<16x1xf32> to vector<16x16xf32>
    %265 = arith.subf %261, %264 : vector<16x16xf32>
    %266 = math.exp %265 : vector<16x16xf32>
    %cst_95 = arith.constant dense<0.000000e+00> : vector<16xf32>
    %267 = vector.multi_reduction <add>, %266, %cst_95 [1] : vector<16x16xf32> to vector<16xf32>
    %268 = vector.shape_cast %267 : vector<16xf32> to vector<16x1xf32>
    %269 = tpu.reciprocal %268 {approx = true} : vector<16x1xf32> -> vector<16x1xf32>
    %270 = vector.broadcast %269 : vector<16x1xf32> to vector<16x16xf32>
    %271 = arith.mulf %266, %270 : vector<16x16xf32>
    %cst_96 = arith.constant dense<0.000000e+00> : vector<16x16xf32>
    %272 = tpu.matmul %271, %259, %cst_96 {dimension_numbers = #tpu.dot_dimension_numbers<[1], [0], [0], [1], [0, 0, 1, 1], [], []>} : vector<16x16xf32>, vector<16x16xf32>, vector<16x16xf32> -> vector<16x16xf32>
    %273 = tpu.concatenate %218, %236, %254, %272 in 1 : vector<16x16xf32>, vector<16x16xf32>, vector<16x16xf32>, vector<16x16xf32> -> vector<16x64xf32>
    %c440 = arith.constant 440 : index
    %c0_97 = arith.constant 0 : index
    %274 = vector.load %arg6[%c440, %c0_97] : memref<760x64xf32, #tpu.memory_space<vmem>>, vector<64x64xf32>
    %cst_98 = arith.constant dense<0.000000e+00> : vector<16x64xf32>
    %275 = tpu.matmul %273, %274, %cst_98 {dimension_numbers = #tpu.dot_dimension_numbers<[1], [0], [0], [1], [0, 0, 1, 1], [], []>} : vector<16x64xf32>, vector<64x64xf32>, vector<16x64xf32> -> vector<16x64xf32>
    %c504 = arith.constant 504 : index
    %c0_99 = arith.constant 0 : index
    %276 = vector.load %arg6[%c504, %c0_99] : memref<760x64xf32, #tpu.memory_space<vmem>>, vector<1x64xf32>
    %277 = vector.broadcast %276 : vector<1x64xf32> to vector<16x64xf32>
    %278 = arith.addf %275, %277 : vector<16x64xf32>
    %279 = arith.addf %171, %278 : vector<16x64xf32>
    %c512 = arith.constant 512 : index
    %c0_100 = arith.constant 0 : index
    %280 = vector.load %arg6[%c512, %c0_100] : memref<760x64xf32, #tpu.memory_space<vmem>>, vector<1x64xf32>
    %c520 = arith.constant 520 : index
    %c0_101 = arith.constant 0 : index
    %281 = vector.load %arg6[%c520, %c0_101] : memref<760x64xf32, #tpu.memory_space<vmem>>, vector<1x64xf32>
    %cst_102 = arith.constant dense<0.000000e+00> : vector<16xf32>
    %282 = vector.multi_reduction <add>, %279, %cst_102 [1] : vector<16x64xf32> to vector<16xf32>
    %283 = vector.shape_cast %282 : vector<16xf32> to vector<16x1xf32>
    %cst_103 = arith.constant 6.400000e+01 : f32
    %284 = vector.broadcast %cst_103 : f32 to vector<16x1xf32>
    %285 = arith.divf %283, %284 : vector<16x1xf32>
    %286 = vector.broadcast %285 : vector<16x1xf32> to vector<16x64xf32>
    %287 = arith.subf %279, %286 : vector<16x64xf32>
    %288 = arith.mulf %287, %287 : vector<16x64xf32>
    %cst_104 = arith.constant dense<0.000000e+00> : vector<16xf32>
    %289 = vector.multi_reduction <add>, %288, %cst_104 [1] : vector<16x64xf32> to vector<16xf32>
    %290 = vector.shape_cast %289 : vector<16xf32> to vector<16x1xf32>
    %cst_105 = arith.constant 6.400000e+01 : f32
    %291 = vector.broadcast %cst_105 : f32 to vector<16x1xf32>
    %292 = arith.divf %290, %291 : vector<16x1xf32>
    %293 = vector.broadcast %285 : vector<16x1xf32> to vector<16x64xf32>
    %294 = arith.subf %279, %293 : vector<16x64xf32>
    %cst_106 = arith.constant 9.99999974E-6 : f32
    %295 = vector.broadcast %cst_106 : f32 to vector<16x1xf32>
    %296 = arith.addf %292, %295 : vector<16x1xf32>
    %297 = math.rsqrt %296 : vector<16x1xf32>
    %298 = vector.broadcast %297 : vector<16x1xf32> to vector<16x64xf32>
    %299 = arith.mulf %294, %298 : vector<16x64xf32>
    %300 = vector.broadcast %280 : vector<1x64xf32> to vector<16x64xf32>
    %301 = arith.mulf %299, %300 : vector<16x64xf32>
    %302 = vector.broadcast %281 : vector<1x64xf32> to vector<16x64xf32>
    %303 = arith.addf %301, %302 : vector<16x64xf32>
    %c72_107 = arith.constant 72 : index
    %c0_108 = arith.constant 0 : index
    %304 = vector.load %arg8[%c72_107, %c0_108] : memref<144x128xf32, #tpu.memory_space<vmem>>, vector<64x128xf32>
    %cst_109 = arith.constant dense<0.000000e+00> : vector<16x128xf32>
    %305 = tpu.matmul %303, %304, %cst_109 {dimension_numbers = #tpu.dot_dimension_numbers<[1], [0], [0], [1], [0, 0, 1, 1], [], []>} : vector<16x64xf32>, vector<64x128xf32>, vector<16x128xf32> -> vector<16x128xf32>
    %c136_110 = arith.constant 136 : index
    %c0_111 = arith.constant 0 : index
    %306 = vector.load %arg8[%c136_110, %c0_111] : memref<144x128xf32, #tpu.memory_space<vmem>>, vector<1x128xf32>
    %307 = vector.broadcast %306 : vector<1x128xf32> to vector<16x128xf32>
    %308 = arith.addf %305, %307 : vector<16x128xf32>
    %309 = arith.mulf %308, %308 : vector<16x128xf32>
    %310 = arith.mulf %308, %309 : vector<16x128xf32>
    %cst_112 = arith.constant 4.471500e-02 : f32
    %311 = vector.broadcast %cst_112 : f32 to vector<16x128xf32>
    %312 = arith.mulf %311, %310 : vector<16x128xf32>
    %313 = arith.addf %308, %312 : vector<16x128xf32>
    %cst_113 = arith.constant 0.797884583 : f32
    %314 = vector.broadcast %cst_113 : f32 to vector<16x128xf32>
    %315 = arith.mulf %314, %313 : vector<16x128xf32>
    %316 = math.tanh %315 : vector<16x128xf32>
    %cst_114 = arith.constant 1.000000e+00 : f32
    %317 = vector.broadcast %cst_114 : f32 to vector<16x128xf32>
    %318 = arith.addf %317, %316 : vector<16x128xf32>
    %cst_115 = arith.constant 5.000000e-01 : f32
    %319 = vector.broadcast %cst_115 : f32 to vector<16x128xf32>
    %320 = arith.mulf %319, %318 : vector<16x128xf32>
    %321 = arith.mulf %308, %320 : vector<16x128xf32>
    %c528 = arith.constant 528 : index
    %c0_116 = arith.constant 0 : index
    %322 = vector.load %arg6[%c528, %c0_116] : memref<760x64xf32, #tpu.memory_space<vmem>>, vector<128x64xf32>
    %cst_117 = arith.constant dense<0.000000e+00> : vector<16x64xf32>
    %323 = tpu.matmul %321, %322, %cst_117 {dimension_numbers = #tpu.dot_dimension_numbers<[1], [0], [0], [1], [0, 0, 1, 1], [], []>} : vector<16x128xf32>, vector<128x64xf32>, vector<16x64xf32> -> vector<16x64xf32>
    %c656 = arith.constant 656 : index
    %c0_118 = arith.constant 0 : index
    %324 = vector.load %arg6[%c656, %c0_118] : memref<760x64xf32, #tpu.memory_space<vmem>>, vector<1x64xf32>
    %325 = vector.broadcast %324 : vector<1x64xf32> to vector<16x64xf32>
    %326 = arith.addf %323, %325 : vector<16x64xf32>
    %327 = arith.addf %279, %326 : vector<16x64xf32>
    %c664 = arith.constant 664 : index
    %c0_119 = arith.constant 0 : index
    %328 = vector.load %arg6[%c664, %c0_119] : memref<760x64xf32, #tpu.memory_space<vmem>>, vector<1x64xf32>
    %c672 = arith.constant 672 : index
    %c0_120 = arith.constant 0 : index
    %329 = vector.load %arg6[%c672, %c0_120] : memref<760x64xf32, #tpu.memory_space<vmem>>, vector<1x64xf32>
    %cst_121 = arith.constant dense<0.000000e+00> : vector<16xf32>
    %330 = vector.multi_reduction <add>, %327, %cst_121 [1] : vector<16x64xf32> to vector<16xf32>
    %331 = vector.shape_cast %330 : vector<16xf32> to vector<16x1xf32>
    %cst_122 = arith.constant 6.400000e+01 : f32
    %332 = vector.broadcast %cst_122 : f32 to vector<16x1xf32>
    %333 = arith.divf %331, %332 : vector<16x1xf32>
    %334 = vector.broadcast %333 : vector<16x1xf32> to vector<16x64xf32>
    %335 = arith.subf %327, %334 : vector<16x64xf32>
    %336 = arith.mulf %335, %335 : vector<16x64xf32>
    %cst_123 = arith.constant dense<0.000000e+00> : vector<16xf32>
    %337 = vector.multi_reduction <add>, %336, %cst_123 [1] : vector<16x64xf32> to vector<16xf32>
    %338 = vector.shape_cast %337 : vector<16xf32> to vector<16x1xf32>
    %cst_124 = arith.constant 6.400000e+01 : f32
    %339 = vector.broadcast %cst_124 : f32 to vector<16x1xf32>
    %340 = arith.divf %338, %339 : vector<16x1xf32>
    %341 = vector.broadcast %333 : vector<16x1xf32> to vector<16x64xf32>
    %342 = arith.subf %327, %341 : vector<16x64xf32>
    %cst_125 = arith.constant 9.99999974E-6 : f32
    %343 = vector.broadcast %cst_125 : f32 to vector<16x1xf32>
    %344 = arith.addf %340, %343 : vector<16x1xf32>
    %345 = math.rsqrt %344 : vector<16x1xf32>
    %346 = vector.broadcast %345 : vector<16x1xf32> to vector<16x64xf32>
    %347 = arith.mulf %342, %346 : vector<16x64xf32>
    %348 = vector.broadcast %328 : vector<1x64xf32> to vector<16x64xf32>
    %349 = arith.mulf %347, %348 : vector<16x64xf32>
    %350 = vector.broadcast %329 : vector<1x64xf32> to vector<16x64xf32>
    %351 = arith.addf %349, %350 : vector<16x64xf32>
    %c0_126 = arith.constant 0 : index
    %c0_127 = arith.constant 0 : index
    %352 = vector.load %arg10[%c0_126, %c0_127] : memref<288x32xf32, #tpu.memory_space<vmem>>, vector<64x32xf32>
    %cst_128 = arith.constant dense<0.000000e+00> : vector<16x32xf32>
    %353 = tpu.matmul %351, %352, %cst_128 {dimension_numbers = #tpu.dot_dimension_numbers<[1], [0], [0], [1], [0, 0, 1, 1], [], []>} : vector<16x64xf32>, vector<64x32xf32>, vector<16x32xf32> -> vector<16x32xf32>
    %c64_129 = arith.constant 64 : index
    %c0_130 = arith.constant 0 : index
    %354 = vector.load %arg10[%c64_129, %c0_130] : memref<288x32xf32, #tpu.memory_space<vmem>>, vector<1x32xf32>
    %355 = vector.broadcast %354 : vector<1x32xf32> to vector<16x32xf32>
    %356 = arith.addf %353, %355 : vector<16x32xf32>
    %c0_131 = arith.constant 0 : index
    %c0_132 = arith.constant 0 : index
    %357 = vector.load %arg5[%c0_131, %c0_132] : memref<48x1xf32, #tpu.memory_space<vmem>>, vector<48x1xf32>
    %c0_133 = arith.constant 0 : index
    %c0_134 = arith.constant 0 : index
    %358 = vector.load %arg4[%c0_133, %c0_134] : memref<48x16xf32, #tpu.memory_space<vmem>>, vector<48x16xf32>
    %cst_135 = arith.constant dense<0.000000e+00> : vector<48x32xf32>
    %359 = tpu.matmul %358, %356, %cst_135 {dimension_numbers = #tpu.dot_dimension_numbers<[1], [0], [0], [1], [0, 0, 1, 1], [], []>} : vector<48x16xf32>, vector<16x32xf32>, vector<48x32xf32> -> vector<48x32xf32>
    %c72_136 = arith.constant 72 : index
    %c0_137 = arith.constant 0 : index
    %360 = vector.load %arg10[%c72_136, %c0_137] : memref<288x32xf32, #tpu.memory_space<vmem>>, vector<1x32xf32>
    %361 = vector.broadcast %357 : vector<48x1xf32> to vector<48x32xf32>
    %362 = vector.broadcast %360 : vector<1x32xf32> to vector<48x32xf32>
    %363 = arith.mulf %361, %362 : vector<48x32xf32>
    %364 = arith.addf %359, %363 : vector<48x32xf32>
    %c80 = arith.constant 80 : index
    %c0_138 = arith.constant 0 : index
    %365 = vector.load %arg10[%c80, %c0_138] : memref<288x32xf32, #tpu.memory_space<vmem>>, vector<48x32xf32>
    %366 = arith.addf %364, %365 : vector<48x32xf32>
    %c128 = arith.constant 128 : index
    %c0_139 = arith.constant 0 : index
    %367 = vector.load %arg10[%c128, %c0_139] : memref<288x32xf32, #tpu.memory_space<vmem>>, vector<1x32xf32>
    %c136_140 = arith.constant 136 : index
    %c0_141 = arith.constant 0 : index
    %368 = vector.load %arg10[%c136_140, %c0_141] : memref<288x32xf32, #tpu.memory_space<vmem>>, vector<1x32xf32>
    %cst_142 = arith.constant dense<0.000000e+00> : vector<48xf32>
    %369 = vector.multi_reduction <add>, %366, %cst_142 [1] : vector<48x32xf32> to vector<48xf32>
    %370 = vector.shape_cast %369 : vector<48xf32> to vector<48x1xf32>
    %cst_143 = arith.constant 3.200000e+01 : f32
    %371 = vector.broadcast %cst_143 : f32 to vector<48x1xf32>
    %372 = arith.divf %370, %371 : vector<48x1xf32>
    %373 = vector.broadcast %372 : vector<48x1xf32> to vector<48x32xf32>
    %374 = arith.subf %366, %373 : vector<48x32xf32>
    %375 = arith.mulf %374, %374 : vector<48x32xf32>
    %cst_144 = arith.constant dense<0.000000e+00> : vector<48xf32>
    %376 = vector.multi_reduction <add>, %375, %cst_144 [1] : vector<48x32xf32> to vector<48xf32>
    %377 = vector.shape_cast %376 : vector<48xf32> to vector<48x1xf32>
    %cst_145 = arith.constant 3.200000e+01 : f32
    %378 = vector.broadcast %cst_145 : f32 to vector<48x1xf32>
    %379 = arith.divf %377, %378 : vector<48x1xf32>
    %380 = vector.broadcast %372 : vector<48x1xf32> to vector<48x32xf32>
    %381 = arith.subf %366, %380 : vector<48x32xf32>
    %cst_146 = arith.constant 9.99999974E-6 : f32
    %382 = vector.broadcast %cst_146 : f32 to vector<48x1xf32>
    %383 = arith.addf %379, %382 : vector<48x1xf32>
    %384 = math.rsqrt %383 : vector<48x1xf32>
    %385 = vector.broadcast %384 : vector<48x1xf32> to vector<48x32xf32>
    %386 = arith.mulf %381, %385 : vector<48x32xf32>
    %387 = vector.broadcast %367 : vector<1x32xf32> to vector<48x32xf32>
    %388 = arith.mulf %386, %387 : vector<48x32xf32>
    %389 = vector.broadcast %368 : vector<1x32xf32> to vector<48x32xf32>
    %390 = arith.addf %388, %389 : vector<48x32xf32>
    %c0_147 = arith.constant 0 : index
    %c0_148 = arith.constant 0 : index
    %391 = vector.load %arg9[%c0_147, %c0_148] : memref<40x96xf32, #tpu.memory_space<vmem>>, vector<32x96xf32>
    %cst_149 = arith.constant dense<0.000000e+00> : vector<48x96xf32>
    %392 = tpu.matmul %390, %391, %cst_149 {dimension_numbers = #tpu.dot_dimension_numbers<[1], [0], [0], [1], [0, 0, 1, 1], [], []>} : vector<48x32xf32>, vector<32x96xf32>, vector<48x96xf32> -> vector<48x96xf32>
    %c32 = arith.constant 32 : index
    %c0_150 = arith.constant 0 : index
    %393 = vector.load %arg9[%c32, %c0_150] : memref<40x96xf32, #tpu.memory_space<vmem>>, vector<1x96xf32>
    %394 = vector.broadcast %393 : vector<1x96xf32> to vector<48x96xf32>
    %395 = arith.addf %392, %394 : vector<48x96xf32>
    %396 = vector.extract_strided_slice %395 {offsets = [0, 0], sizes = [48, 8], strides = [1, 1]} : vector<48x96xf32> to vector<48x8xf32>
    %cst_151 = arith.constant 0.353553385 : f32
    %397 = vector.broadcast %cst_151 : f32 to vector<48x8xf32>
    %398 = arith.mulf %396, %397 : vector<48x8xf32>
    %399 = vector.extract_strided_slice %395 {offsets = [0, 32], sizes = [48, 8], strides = [1, 1]} : vector<48x96xf32> to vector<48x8xf32>
    %400 = vector.extract_strided_slice %395 {offsets = [0, 64], sizes = [48, 8], strides = [1, 1]} : vector<48x96xf32> to vector<48x8xf32>
    %cst_152 = arith.constant dense<0.000000e+00> : vector<48x48xf32>
    %401 = tpu.matmul %398, %399, %cst_152 {dimension_numbers = #tpu.dot_dimension_numbers<[1], [1], [0], [0], [0, 0, 1, 0], [], []>} : vector<48x8xf32>, vector<48x8xf32>, vector<48x48xf32> -> vector<48x48xf32>
    %402 = arith.addf %401, %3 : vector<48x48xf32>
    %cst_153 = arith.constant dense<0xFF800000> : vector<48xf32>
    %403 = vector.multi_reduction <maximumf>, %402, %cst_153 [1] : vector<48x48xf32> to vector<48xf32>
    %404 = vector.shape_cast %403 : vector<48xf32> to vector<48x1xf32>
    %405 = vector.broadcast %404 : vector<48x1xf32> to vector<48x48xf32>
    %406 = arith.subf %402, %405 : vector<48x48xf32>
    %407 = math.exp %406 : vector<48x48xf32>
    %cst_154 = arith.constant dense<0.000000e+00> : vector<48xf32>
    %408 = vector.multi_reduction <add>, %407, %cst_154 [1] : vector<48x48xf32> to vector<48xf32>
    %409 = vector.shape_cast %408 : vector<48xf32> to vector<48x1xf32>
    %410 = tpu.reciprocal %409 {approx = true} : vector<48x1xf32> -> vector<48x1xf32>
    %411 = vector.broadcast %410 : vector<48x1xf32> to vector<48x48xf32>
    %412 = arith.mulf %407, %411 : vector<48x48xf32>
    %cst_155 = arith.constant dense<0.000000e+00> : vector<48x8xf32>
    %413 = tpu.matmul %412, %400, %cst_155 {dimension_numbers = #tpu.dot_dimension_numbers<[1], [0], [0], [1], [0, 0, 1, 1], [], []>} : vector<48x48xf32>, vector<48x8xf32>, vector<48x8xf32> -> vector<48x8xf32>
    %414 = vector.extract_strided_slice %395 {offsets = [0, 8], sizes = [48, 8], strides = [1, 1]} : vector<48x96xf32> to vector<48x8xf32>
    %cst_156 = arith.constant 0.353553385 : f32
    %415 = vector.broadcast %cst_156 : f32 to vector<48x8xf32>
    %416 = arith.mulf %414, %415 : vector<48x8xf32>
    %417 = vector.extract_strided_slice %395 {offsets = [0, 40], sizes = [48, 8], strides = [1, 1]} : vector<48x96xf32> to vector<48x8xf32>
    %418 = vector.extract_strided_slice %395 {offsets = [0, 72], sizes = [48, 8], strides = [1, 1]} : vector<48x96xf32> to vector<48x8xf32>
    %cst_157 = arith.constant dense<0.000000e+00> : vector<48x48xf32>
    %419 = tpu.matmul %416, %417, %cst_157 {dimension_numbers = #tpu.dot_dimension_numbers<[1], [1], [0], [0], [0, 0, 1, 0], [], []>} : vector<48x8xf32>, vector<48x8xf32>, vector<48x48xf32> -> vector<48x48xf32>
    %420 = arith.addf %419, %3 : vector<48x48xf32>
    %cst_158 = arith.constant dense<0xFF800000> : vector<48xf32>
    %421 = vector.multi_reduction <maximumf>, %420, %cst_158 [1] : vector<48x48xf32> to vector<48xf32>
    %422 = vector.shape_cast %421 : vector<48xf32> to vector<48x1xf32>
    %423 = vector.broadcast %422 : vector<48x1xf32> to vector<48x48xf32>
    %424 = arith.subf %420, %423 : vector<48x48xf32>
    %425 = math.exp %424 : vector<48x48xf32>
    %cst_159 = arith.constant dense<0.000000e+00> : vector<48xf32>
    %426 = vector.multi_reduction <add>, %425, %cst_159 [1] : vector<48x48xf32> to vector<48xf32>
    %427 = vector.shape_cast %426 : vector<48xf32> to vector<48x1xf32>
    %428 = tpu.reciprocal %427 {approx = true} : vector<48x1xf32> -> vector<48x1xf32>
    %429 = vector.broadcast %428 : vector<48x1xf32> to vector<48x48xf32>
    %430 = arith.mulf %425, %429 : vector<48x48xf32>
    %cst_160 = arith.constant dense<0.000000e+00> : vector<48x8xf32>
    %431 = tpu.matmul %430, %418, %cst_160 {dimension_numbers = #tpu.dot_dimension_numbers<[1], [0], [0], [1], [0, 0, 1, 1], [], []>} : vector<48x48xf32>, vector<48x8xf32>, vector<48x8xf32> -> vector<48x8xf32>
    %432 = vector.extract_strided_slice %395 {offsets = [0, 16], sizes = [48, 8], strides = [1, 1]} : vector<48x96xf32> to vector<48x8xf32>
    %cst_161 = arith.constant 0.353553385 : f32
    %433 = vector.broadcast %cst_161 : f32 to vector<48x8xf32>
    %434 = arith.mulf %432, %433 : vector<48x8xf32>
    %435 = vector.extract_strided_slice %395 {offsets = [0, 48], sizes = [48, 8], strides = [1, 1]} : vector<48x96xf32> to vector<48x8xf32>
    %436 = vector.extract_strided_slice %395 {offsets = [0, 80], sizes = [48, 8], strides = [1, 1]} : vector<48x96xf32> to vector<48x8xf32>
    %cst_162 = arith.constant dense<0.000000e+00> : vector<48x48xf32>
    %437 = tpu.matmul %434, %435, %cst_162 {dimension_numbers = #tpu.dot_dimension_numbers<[1], [1], [0], [0], [0, 0, 1, 0], [], []>} : vector<48x8xf32>, vector<48x8xf32>, vector<48x48xf32> -> vector<48x48xf32>
    %438 = arith.addf %437, %3 : vector<48x48xf32>
    %cst_163 = arith.constant dense<0xFF800000> : vector<48xf32>
    %439 = vector.multi_reduction <maximumf>, %438, %cst_163 [1] : vector<48x48xf32> to vector<48xf32>
    %440 = vector.shape_cast %439 : vector<48xf32> to vector<48x1xf32>
    %441 = vector.broadcast %440 : vector<48x1xf32> to vector<48x48xf32>
    %442 = arith.subf %438, %441 : vector<48x48xf32>
    %443 = math.exp %442 : vector<48x48xf32>
    %cst_164 = arith.constant dense<0.000000e+00> : vector<48xf32>
    %444 = vector.multi_reduction <add>, %443, %cst_164 [1] : vector<48x48xf32> to vector<48xf32>
    %445 = vector.shape_cast %444 : vector<48xf32> to vector<48x1xf32>
    %446 = tpu.reciprocal %445 {approx = true} : vector<48x1xf32> -> vector<48x1xf32>
    %447 = vector.broadcast %446 : vector<48x1xf32> to vector<48x48xf32>
    %448 = arith.mulf %443, %447 : vector<48x48xf32>
    %cst_165 = arith.constant dense<0.000000e+00> : vector<48x8xf32>
    %449 = tpu.matmul %448, %436, %cst_165 {dimension_numbers = #tpu.dot_dimension_numbers<[1], [0], [0], [1], [0, 0, 1, 1], [], []>} : vector<48x48xf32>, vector<48x8xf32>, vector<48x8xf32> -> vector<48x8xf32>
    %450 = vector.extract_strided_slice %395 {offsets = [0, 24], sizes = [48, 8], strides = [1, 1]} : vector<48x96xf32> to vector<48x8xf32>
    %cst_166 = arith.constant 0.353553385 : f32
    %451 = vector.broadcast %cst_166 : f32 to vector<48x8xf32>
    %452 = arith.mulf %450, %451 : vector<48x8xf32>
    %453 = vector.extract_strided_slice %395 {offsets = [0, 56], sizes = [48, 8], strides = [1, 1]} : vector<48x96xf32> to vector<48x8xf32>
    %454 = vector.extract_strided_slice %395 {offsets = [0, 88], sizes = [48, 8], strides = [1, 1]} : vector<48x96xf32> to vector<48x8xf32>
    %cst_167 = arith.constant dense<0.000000e+00> : vector<48x48xf32>
    %455 = tpu.matmul %452, %453, %cst_167 {dimension_numbers = #tpu.dot_dimension_numbers<[1], [1], [0], [0], [0, 0, 1, 0], [], []>} : vector<48x8xf32>, vector<48x8xf32>, vector<48x48xf32> -> vector<48x48xf32>
    %456 = arith.addf %455, %3 : vector<48x48xf32>
    %cst_168 = arith.constant dense<0xFF800000> : vector<48xf32>
    %457 = vector.multi_reduction <maximumf>, %456, %cst_168 [1] : vector<48x48xf32> to vector<48xf32>
    %458 = vector.shape_cast %457 : vector<48xf32> to vector<48x1xf32>
    %459 = vector.broadcast %458 : vector<48x1xf32> to vector<48x48xf32>
    %460 = arith.subf %456, %459 : vector<48x48xf32>
    %461 = math.exp %460 : vector<48x48xf32>
    %cst_169 = arith.constant dense<0.000000e+00> : vector<48xf32>
    %462 = vector.multi_reduction <add>, %461, %cst_169 [1] : vector<48x48xf32> to vector<48xf32>
    %463 = vector.shape_cast %462 : vector<48xf32> to vector<48x1xf32>
    %464 = tpu.reciprocal %463 {approx = true} : vector<48x1xf32> -> vector<48x1xf32>
    %465 = vector.broadcast %464 : vector<48x1xf32> to vector<48x48xf32>
    %466 = arith.mulf %461, %465 : vector<48x48xf32>
    %cst_170 = arith.constant dense<0.000000e+00> : vector<48x8xf32>
    %467 = tpu.matmul %466, %454, %cst_170 {dimension_numbers = #tpu.dot_dimension_numbers<[1], [0], [0], [1], [0, 0, 1, 1], [], []>} : vector<48x48xf32>, vector<48x8xf32>, vector<48x8xf32> -> vector<48x8xf32>
    %468 = tpu.concatenate %413, %431, %449, %467 in 1 : vector<48x8xf32>, vector<48x8xf32>, vector<48x8xf32>, vector<48x8xf32> -> vector<48x32xf32>
    %c144 = arith.constant 144 : index
    %c0_171 = arith.constant 0 : index
    %469 = vector.load %arg10[%c144, %c0_171] : memref<288x32xf32, #tpu.memory_space<vmem>>, vector<32x32xf32>
    %cst_172 = arith.constant dense<0.000000e+00> : vector<48x32xf32>
    %470 = tpu.matmul %468, %469, %cst_172 {dimension_numbers = #tpu.dot_dimension_numbers<[1], [0], [0], [1], [0, 0, 1, 1], [], []>} : vector<48x32xf32>, vector<32x32xf32>, vector<48x32xf32> -> vector<48x32xf32>
    %c176 = arith.constant 176 : index
    %c0_173 = arith.constant 0 : index
    %471 = vector.load %arg10[%c176, %c0_173] : memref<288x32xf32, #tpu.memory_space<vmem>>, vector<1x32xf32>
    %472 = vector.broadcast %471 : vector<1x32xf32> to vector<48x32xf32>
    %473 = arith.addf %470, %472 : vector<48x32xf32>
    %474 = arith.addf %366, %473 : vector<48x32xf32>
    %c184_174 = arith.constant 184 : index
    %c0_175 = arith.constant 0 : index
    %475 = vector.load %arg10[%c184_174, %c0_175] : memref<288x32xf32, #tpu.memory_space<vmem>>, vector<1x32xf32>
    %c192_176 = arith.constant 192 : index
    %c0_177 = arith.constant 0 : index
    %476 = vector.load %arg10[%c192_176, %c0_177] : memref<288x32xf32, #tpu.memory_space<vmem>>, vector<1x32xf32>
    %cst_178 = arith.constant dense<0.000000e+00> : vector<48xf32>
    %477 = vector.multi_reduction <add>, %474, %cst_178 [1] : vector<48x32xf32> to vector<48xf32>
    %478 = vector.shape_cast %477 : vector<48xf32> to vector<48x1xf32>
    %cst_179 = arith.constant 3.200000e+01 : f32
    %479 = vector.broadcast %cst_179 : f32 to vector<48x1xf32>
    %480 = arith.divf %478, %479 : vector<48x1xf32>
    %481 = vector.broadcast %480 : vector<48x1xf32> to vector<48x32xf32>
    %482 = arith.subf %474, %481 : vector<48x32xf32>
    %483 = arith.mulf %482, %482 : vector<48x32xf32>
    %cst_180 = arith.constant dense<0.000000e+00> : vector<48xf32>
    %484 = vector.multi_reduction <add>, %483, %cst_180 [1] : vector<48x32xf32> to vector<48xf32>
    %485 = vector.shape_cast %484 : vector<48xf32> to vector<48x1xf32>
    %cst_181 = arith.constant 3.200000e+01 : f32
    %486 = vector.broadcast %cst_181 : f32 to vector<48x1xf32>
    %487 = arith.divf %485, %486 : vector<48x1xf32>
    %488 = vector.broadcast %480 : vector<48x1xf32> to vector<48x32xf32>
    %489 = arith.subf %474, %488 : vector<48x32xf32>
    %cst_182 = arith.constant 9.99999974E-6 : f32
    %490 = vector.broadcast %cst_182 : f32 to vector<48x1xf32>
    %491 = arith.addf %487, %490 : vector<48x1xf32>
    %492 = math.rsqrt %491 : vector<48x1xf32>
    %493 = vector.broadcast %492 : vector<48x1xf32> to vector<48x32xf32>
    %494 = arith.mulf %489, %493 : vector<48x32xf32>
    %495 = vector.broadcast %475 : vector<1x32xf32> to vector<48x32xf32>
    %496 = arith.mulf %494, %495 : vector<48x32xf32>
    %497 = vector.broadcast %476 : vector<1x32xf32> to vector<48x32xf32>
    %498 = arith.addf %496, %497 : vector<48x32xf32>
    %c680 = arith.constant 680 : index
    %c0_183 = arith.constant 0 : index
    %499 = vector.load %arg6[%c680, %c0_183] : memref<760x64xf32, #tpu.memory_space<vmem>>, vector<32x64xf32>
    %cst_184 = arith.constant dense<0.000000e+00> : vector<48x64xf32>
    %500 = tpu.matmul %498, %499, %cst_184 {dimension_numbers = #tpu.dot_dimension_numbers<[1], [0], [0], [1], [0, 0, 1, 1], [], []>} : vector<48x32xf32>, vector<32x64xf32>, vector<48x64xf32> -> vector<48x64xf32>
    %c712 = arith.constant 712 : index
    %c0_185 = arith.constant 0 : index
    %501 = vector.load %arg6[%c712, %c0_185] : memref<760x64xf32, #tpu.memory_space<vmem>>, vector<1x64xf32>
    %502 = vector.broadcast %501 : vector<1x64xf32> to vector<48x64xf32>
    %503 = arith.addf %500, %502 : vector<48x64xf32>
    %504 = arith.mulf %503, %503 : vector<48x64xf32>
    %505 = arith.mulf %503, %504 : vector<48x64xf32>
    %cst_186 = arith.constant 4.471500e-02 : f32
    %506 = vector.broadcast %cst_186 : f32 to vector<48x64xf32>
    %507 = arith.mulf %506, %505 : vector<48x64xf32>
    %508 = arith.addf %503, %507 : vector<48x64xf32>
    %cst_187 = arith.constant 0.797884583 : f32
    %509 = vector.broadcast %cst_187 : f32 to vector<48x64xf32>
    %510 = arith.mulf %509, %508 : vector<48x64xf32>
    %511 = math.tanh %510 : vector<48x64xf32>
    %cst_188 = arith.constant 1.000000e+00 : f32
    %512 = vector.broadcast %cst_188 : f32 to vector<48x64xf32>
    %513 = arith.addf %512, %511 : vector<48x64xf32>
    %cst_189 = arith.constant 5.000000e-01 : f32
    %514 = vector.broadcast %cst_189 : f32 to vector<48x64xf32>
    %515 = arith.mulf %514, %513 : vector<48x64xf32>
    %516 = arith.mulf %503, %515 : vector<48x64xf32>
    %c200_190 = arith.constant 200 : index
    %c0_191 = arith.constant 0 : index
    %517 = vector.load %arg10[%c200_190, %c0_191] : memref<288x32xf32, #tpu.memory_space<vmem>>, vector<64x32xf32>
    %cst_192 = arith.constant dense<0.000000e+00> : vector<48x32xf32>
    %518 = tpu.matmul %516, %517, %cst_192 {dimension_numbers = #tpu.dot_dimension_numbers<[1], [0], [0], [1], [0, 0, 1, 1], [], []>} : vector<48x64xf32>, vector<64x32xf32>, vector<48x32xf32> -> vector<48x32xf32>
    %c264_193 = arith.constant 264 : index
    %c0_194 = arith.constant 0 : index
    %519 = vector.load %arg10[%c264_193, %c0_194] : memref<288x32xf32, #tpu.memory_space<vmem>>, vector<1x32xf32>
    %520 = vector.broadcast %519 : vector<1x32xf32> to vector<48x32xf32>
    %521 = arith.addf %518, %520 : vector<48x32xf32>
    %522 = arith.addf %474, %521 : vector<48x32xf32>
    %c272_195 = arith.constant 272 : index
    %c0_196 = arith.constant 0 : index
    %523 = vector.load %arg10[%c272_195, %c0_196] : memref<288x32xf32, #tpu.memory_space<vmem>>, vector<1x32xf32>
    %c280_197 = arith.constant 280 : index
    %c0_198 = arith.constant 0 : index
    %524 = vector.load %arg10[%c280_197, %c0_198] : memref<288x32xf32, #tpu.memory_space<vmem>>, vector<1x32xf32>
    %cst_199 = arith.constant dense<0.000000e+00> : vector<48xf32>
    %525 = vector.multi_reduction <add>, %522, %cst_199 [1] : vector<48x32xf32> to vector<48xf32>
    %526 = vector.shape_cast %525 : vector<48xf32> to vector<48x1xf32>
    %cst_200 = arith.constant 3.200000e+01 : f32
    %527 = vector.broadcast %cst_200 : f32 to vector<48x1xf32>
    %528 = arith.divf %526, %527 : vector<48x1xf32>
    %529 = vector.broadcast %528 : vector<48x1xf32> to vector<48x32xf32>
    %530 = arith.subf %522, %529 : vector<48x32xf32>
    %531 = arith.mulf %530, %530 : vector<48x32xf32>
    %cst_201 = arith.constant dense<0.000000e+00> : vector<48xf32>
    %532 = vector.multi_reduction <add>, %531, %cst_201 [1] : vector<48x32xf32> to vector<48xf32>
    %533 = vector.shape_cast %532 : vector<48xf32> to vector<48x1xf32>
    %cst_202 = arith.constant 3.200000e+01 : f32
    %534 = vector.broadcast %cst_202 : f32 to vector<48x1xf32>
    %535 = arith.divf %533, %534 : vector<48x1xf32>
    %536 = vector.broadcast %528 : vector<48x1xf32> to vector<48x32xf32>
    %537 = arith.subf %522, %536 : vector<48x32xf32>
    %cst_203 = arith.constant 9.99999974E-6 : f32
    %538 = vector.broadcast %cst_203 : f32 to vector<48x1xf32>
    %539 = arith.addf %535, %538 : vector<48x1xf32>
    %540 = math.rsqrt %539 : vector<48x1xf32>
    %541 = vector.broadcast %540 : vector<48x1xf32> to vector<48x32xf32>
    %542 = arith.mulf %537, %541 : vector<48x32xf32>
    %543 = vector.broadcast %523 : vector<1x32xf32> to vector<48x32xf32>
    %544 = arith.mulf %542, %543 : vector<48x32xf32>
    %545 = vector.broadcast %524 : vector<1x32xf32> to vector<48x32xf32>
    %546 = arith.addf %544, %545 : vector<48x32xf32>
    %c720 = arith.constant 720 : index
    %c0_204 = arith.constant 0 : index
    %547 = vector.load %arg6[%c720, %c0_204] : memref<760x64xf32, #tpu.memory_space<vmem>>, vector<32x64xf32>
    %cst_205 = arith.constant dense<0.000000e+00> : vector<48x64xf32>
    %548 = tpu.matmul %546, %547, %cst_205 {dimension_numbers = #tpu.dot_dimension_numbers<[1], [0], [0], [1], [0, 0, 1, 1], [], []>} : vector<48x32xf32>, vector<32x64xf32>, vector<48x64xf32> -> vector<48x64xf32>
    %c752 = arith.constant 752 : index
    %c0_206 = arith.constant 0 : index
    %549 = vector.load %arg6[%c752, %c0_206] : memref<760x64xf32, #tpu.memory_space<vmem>>, vector<1x64xf32>
    %550 = vector.broadcast %549 : vector<1x64xf32> to vector<48x64xf32>
    %551 = arith.addf %548, %550 : vector<48x64xf32>
    %c0_207 = arith.constant 0 : index
    %c0_208 = arith.constant 0 : index
    %552 = vector.load %arg2[%c0_207, %c0_208] : memref<48x64xf32, #tpu.memory_space<vmem>>, vector<48x64xf32>
    %553 = arith.subf %551, %552 : vector<48x64xf32>
    %554 = arith.mulf %553, %553 : vector<48x64xf32>
    %cst_209 = arith.constant dense<0.000000e+00> : vector<48xf32>
    %555 = vector.multi_reduction <add>, %554, %cst_209 [1] : vector<48x64xf32> to vector<48xf32>
    %556 = vector.shape_cast %555 : vector<48xf32> to vector<48x1xf32>
    %cst_210 = arith.constant 6.400000e+01 : f32
    %557 = vector.broadcast %cst_210 : f32 to vector<48x1xf32>
    %558 = arith.divf %556, %557 : vector<48x1xf32>
    %559 = arith.mulf %558, %357 : vector<48x1xf32>
    %560 = vector.shape_cast %559 : vector<48x1xf32> to vector<1x48x1xf32>
    %cst_211 = arith.constant dense<0.000000e+00> : vector<1xf32>
    %561 = vector.multi_reduction <add>, %560, %cst_211 [1, 2] : vector<1x48x1xf32> to vector<1xf32>
    %562 = vector.shape_cast %561 : vector<1xf32> to vector<1x1x1xf32>
    %563 = vector.extract %562[0, 0, 0] : f32 from vector<1x1x1xf32>
    %564 = vector.shape_cast %357 : vector<48x1xf32> to vector<1x48x1xf32>
    %cst_212 = arith.constant dense<0.000000e+00> : vector<1xf32>
    %565 = vector.multi_reduction <add>, %564, %cst_212 [1, 2] : vector<1x48x1xf32> to vector<1xf32>
    %566 = vector.shape_cast %565 : vector<1xf32> to vector<1x1x1xf32>
    %567 = vector.extract %566[0, 0, 0] : f32 from vector<1x1x1xf32>
    %568 = arith.divf %563, %567 : f32
    %569 = tpu.iota {dimensions = array<i32: 1>} : vector<1x128xi32>
    %c0_i32 = arith.constant 0 : i32
    %570 = vector.broadcast %c0_i32 : i32 to vector<1x128xi32>
    %571 = arith.cmpi eq, %569, %570 : vector<1x128xi32>
    %cst_213 = arith.constant 0.000000e+00 : f32
    %572 = vector.broadcast %568 : f32 to vector<1x128xf32>
    %573 = vector.broadcast %cst_213 : f32 to vector<1x128xf32>
    %574 = arith.select %571, %572, %573 : vector<1x128xi1>, vector<1x128xf32>
    %c0_214 = arith.constant 0 : index
    %c0_215 = arith.constant 0 : index
    %575 = vector.load %arg11[%c0_214, %c0_215] : memref<1x128xf32, #tpu.memory_space<vmem>>, vector<1x128xf32>
    tpu.vector_store %arg11[%c0_214, %c0_215], %574 {strides = array<i32>} : memref<1x128xf32, #tpu.memory_space<vmem>>, vector<1x128xf32>,
    return
  }
  func.func @transform_0(%arg0: i32) -> (i32, i32) {
    %c0_i32 = arith.constant 0 : i32
    %c0_i32_0 = arith.constant 0 : i32
    %c0_i32_1 = arith.constant 0 : i32
    return %c0_i32, %c0_i32_0 : i32, i32
  }
  func.func @transform_1(%arg0: i32) -> (i32, i32) {
    %c0_i32 = arith.constant 0 : i32
    %c0_i32_0 = arith.constant 0 : i32
    %c0_i32_1 = arith.constant 0 : i32
    return %c0_i32, %c0_i32_0 : i32, i32
  }
  func.func @transform_2(%arg0: i32) -> (i32, i32) {
    %c0_i32 = arith.constant 0 : i32
    %c0_i32_0 = arith.constant 0 : i32
    %c0_i32_1 = arith.constant 0 : i32
    return %c0_i32, %c0_i32_0 : i32, i32
  }
  func.func @transform_3(%arg0: i32) -> (i32, i32) {
    %c0_i32 = arith.constant 0 : i32
    %c0_i32_0 = arith.constant 0 : i32
    %c0_i32_1 = arith.constant 0 : i32
    return %c0_i32, %c0_i32_0 : i32, i32
  }
  func.func @transform_4(%arg0: i32) -> (i32, i32) {
    %c0_i32 = arith.constant 0 : i32
    %c0_i32_0 = arith.constant 0 : i32
    %c0_i32_1 = arith.constant 0 : i32
    return %c0_i32, %c0_i32_0 : i32, i32
  }
  func.func @transform_5(%arg0: i32) -> (i32, i32) {
    %c0_i32 = arith.constant 0 : i32
    %c0_i32_0 = arith.constant 0 : i32
    %c0_i32_1 = arith.constant 0 : i32
    return %c0_i32, %c0_i32_0 : i32, i32
  }
  func.func @transform_6(%arg0: i32) -> (i32, i32) {
    %c0_i32 = arith.constant 0 : i32
    %c0_i32_0 = arith.constant 0 : i32
    %c0_i32_1 = arith.constant 0 : i32
    return %c0_i32, %c0_i32_0 : i32, i32
  }
  func.func @transform_7(%arg0: i32) -> (i32, i32) {
    %c0_i32 = arith.constant 0 : i32
    %c0_i32_0 = arith.constant 0 : i32
    %c0_i32_1 = arith.constant 0 : i32
    return %c0_i32, %c0_i32_0 : i32, i32
  }
  func.func @transform_8(%arg0: i32) -> (i32, i32) {
    %c0_i32 = arith.constant 0 : i32
    %c0_i32_0 = arith.constant 0 : i32
    %c0_i32_1 = arith.constant 0 : i32
    return %c0_i32, %c0_i32_0 : i32, i32
  }
  func.func @transform_9(%arg0: i32) -> (i32, i32) {
    %c0_i32 = arith.constant 0 : i32
    %c0_i32_0 = arith.constant 0 : i32
    %c0_i32_1 = arith.constant 0 : i32
    return %c0_i32, %c0_i32_0 : i32, i32
  }
  func.func @transform_10(%arg0: i32) -> (i32, i32) {
    %c0_i32 = arith.constant 0 : i32
    %c0_i32_0 = arith.constant 0 : i32
    %c0_i32_1 = arith.constant 0 : i32
    return %c0_i32, %c0_i32_0 : i32, i32
  }
}

</mosaic_0001>

<bundles_post_ra>
// kernel: mae_compute_loss.1
= control target key start
LH: loop header
LB: loop body
LE: loop exit
PB: predicated region body
PF: predicated region fallthrough
CT: control target
= control target key end

     0   :  { %vm61_vm0 = vcmask 523264   ;;  %s9512_s0 = inlined_call_operand.vmem [shape: f32[32,64], index: 0, kind: input, shape index: {}]   ;;  %s9513_s1 = inlined_call_operand.vmem [shape: f32[48,64], index: 1, kind: input, shape index: {}]   ;;  %s9514_s2 = inlined_call_operand.vmem [shape: f32[16,32], index: 2, kind: input, shape index: {}]   ;;  %s9515_s3 = inlined_call_operand.vmem [shape: f32[48,16], index: 3, kind: input, shape index: {}]   ;;  %s9516_s4 = inlined_call_operand.vmem [shape: f32[48,1], index: 4, kind: input, shape index: {}]   ;;  %s9517_s5 = inlined_call_operand.vmem [shape: f32[760,64], index: 5, kind: input, shape index: {}]   ;;  %s9518_s6 = inlined_call_operand.vmem [shape: f32[144,192], index: 6, kind: input, shape index: {}]   ;;  %s9519_s7 = inlined_call_operand.vmem [shape: f32[144,128], index: 7, kind: input, shape index: {}]   ;;  %s9520_s8 = inlined_call_operand.vmem [shape: f32[40,96], index: 8, kind: input, shape index: {}]   ;;  %s9521_s9 = inlined_call_operand.vmem [shape: f32[288,32], index: 9, kind: input, shape index: {}]   ;;  %s9522_s10 = inlined_call_operand.hbm [shape: f32[1,128], index: 10, kind: output, shape index: {}]  }
   0x1   :  { %v48_v0 = vld [vmem:[%s9517_s5] sm:$0xff]  ;;  %v49_v1 = vld [vmem:[%s9517_s5 + $0x8] sm:$0xff]  ;;  %v50_v2 = vld [vmem:[%s9517_s5 + $0x10] sm:$0xff] }
   0x2   :  { %v6890_v3 = vpack.c.bf16 %v49_v1, %v48_v0  ;;  %v51_v4 = vld [vmem:[%s9517_s5 + $0x18] sm:$0xff]  ;;  %v52_v6 = vld [vmem:[%s9517_s5 + $0x20] sm:$0xff]  ;;  %v53_v7 = vld [vmem:[%s9517_s5 + $0x28] sm:$0xff] }
   0x3   :  { %v6894_v5 = vpack.c.bf16 %v51_v4, %v50_v2  ;;  %v44_v8 = vld [vmem:[%s9512_s0] sm:$0xff] }
   0x4   :  { %6891 = vmatprep.subr.bf16.mxu0 %v6890_v3  ;;  %6322 = vmatprep.mubr.msk.f32.mxu0 %vm61_vm0, %v44_v8 }
   0x5   :  { %6893 = vmatpush3.bf16.msra.mxu0 %v6890_v3 }
   0x6   :  { %15 = vsyncpa [#allocation3], 0  ;;  %6895 = vmatprep.subr.bf16.mxu0 %v6894_v5  ;;  %v6898_v9 = vpack.c.bf16 %v53_v7, %v52_v6  ;;  %v54_v10 = vld [vmem:[%s9517_s5 + $0x30] sm:$0xff]  ;;  %v55_v11 = vld [vmem:[%s9517_s5 + $0x38] sm:$0xff]  ;;  %vm171_vm1 = vcmask 261120   ;;  %vm414_vm2 = vcmask 130048  }
   0x7   :  { %v6902_v12 = vpack.c.bf16 %v55_v11, %v54_v10  ;;  %v45_v13 = vld [vmem:[%s9512_s0 + $0x8] sm:$0xff]  ;;  %v46_v14 = vld [vmem:[%s9512_s0 + $0x10] sm:$0xff]  ;;  %v47_v15 = vld [vmem:[%s9512_s0 + $0x18] sm:$0xff]  ;;  %s7829_s28 = smov 48   ;;  %s7830_s29 = smov 64   ;;  %vm1233_vm4 = vcmask 392192  }
   0x8   :  { %v167_v16 = vld [vmem:[%s9514_s2] sm:$0xff]  ;;  %v160_v19 = vld [vmem:[%s9517_s5 + $0x50] sm:$0xff]  ;;  %v159_v22 = vld [vmem:[%s9517_s5 + $0x48] sm:$0xff]  ;;  %s7831_s30 = smov 112   ;;  %s7832_s14 = smov 32   ;;  %vm3467_vm5 = vcmask 64512  }
   0x9   :  { %6897 = vmatpush3.bf16.msra.mxu0 %v6894_v5  ;;  %6336 = vmatprep.mubr.msk.f32.mxu1 %vm171_vm1, %v167_v16  ;;  %v5772_v17 = vld [vmem:[%s9517_s5 + $0x40] ss:$0 sm:$0xff]  ;;  %v161_v30 = vld [vmem:[%s9517_s5 + $0x58] sm:$0xff]  ;;  %v168_v36 = vld [vmem:[%s9514_s2 + $0x8] sm:$0xff]  ;;  %s7833_s15 = smov 96   ;;  %s7834_s16 = smov 16  }
   0xa   :  { %6899 = vmatprep.subr.bf16.mxu0 %v6898_v9  ;;  %v162_v27 = vld [vmem:[%s9517_s5 + $0x60] sm:$0xff]  ;;  %v169_v37 = vld [vmem:[%s9517_s5 + $0x68] sm:$0xff]  ;;  %v170_v39 = vld [vmem:[%s9517_s5 + $0x70] sm:$0xff]  ;;  %s7835_s17 = smov 80   ;;  %s7838_s25 = smov 120   ;;  %vm4894_vm7 = vcmask 195584  }
   0xb   :  { %v295_v55 = vld [vmem:[%s9518_s6 + $0x8] sm:$0xff]  ;;  %v297_v56 = vld [vmem:[%s9518_s6 + $0x18] sm:$0xff]  ;;  %v294_v58 = vld [vmem:[%s9518_s6] sm:$0xff]  ;;  %s7839_s26 = smov 56   ;;  %vm5707_vm8 = vcmask 7168  }
   0xc   :  { %v6914_v57 = vpack.c.bf16 %v297_v56, %v295_v55  ;;  %v296_v59 = vld [vmem:[%s9518_s6 + $0x10] sm:$0xff]  ;;  %v299_v61 = vld [vmem:[%s9518_s6 + $0x28] sm:$0xff]  ;;  %v301_v62 = vld [vmem:[%s9518_s6 + $0x38] sm:$0xff] }
   0xd   :  { %6901 = vmatpush3.bf16.msra.mxu0 %v6898_v9  ;;  %v6916_v60 = vpack.c.bf16 %v296_v59, %v294_v58  ;;  %v6918_v63 = vpack.c.bf16 %v301_v62, %v299_v61  ;;  %v298_v0 = vld [vmem:[%s9518_s6 + $0x20] sm:$0xff]  ;;  %v300_v1 = vld [vmem:[%s9518_s6 + $0x30] sm:$0xff]  ;;  %v303_v3 = vld [vmem:[%s9518_s6 + $0x48] sm:$0xff] }
   0xe   :  { %6903 = vmatprep.subr.bf16.mxu0 %v6902_v12  ;;  %v6920_v2 = vpack.c.bf16 %v300_v1, %v298_v0  ;;  %v305_v4 = vld [vmem:[%s9518_s6 + $0x58] sm:$0xff]  ;;  %v302_v6 = vld [vmem:[%s9518_s6 + $0x40] sm:$0xff]  ;;  %v304_v7 = vld [vmem:[%s9518_s6 + $0x50] sm:$0xff] }
   0xf   :  { %v6922_v5 = vpack.c.bf16 %v305_v4, %v303_v3  ;;  %v6924_v8 = vpack.c.bf16 %v304_v7, %v302_v6  ;;  %v307_v9 = vld [vmem:[%s9518_s6 + $0x68] sm:$0xff]  ;;  %v309_v10 = vld [vmem:[%s9518_s6 + $0x78] sm:$0xff]  ;;  %vm8072_vm3 = vmpackc.low %vm414_vm2, %vm414_vm2 }
  0x10   :  { %v6926_v11 = vpack.c.bf16 %v309_v10, %v307_v9  ;;  %v8091_v1 = vld [vmem:[%s9517_s5 + $0x80] sm:$0xff]  ;;  %vm8862_vm6 = vmpackc.low %vm3467_vm5, %vm3467_vm5 }
  0x11   :  { %6905 = vmatpush3.bf16.msra.mxu0 %v6902_v12  ;;  %v306_v12 = vld [vmem:[%s9518_s6 + $0x60] sm:$0xff] }
  0x14   :  { %6323 = vmatmul.mubr.msk.f32.vlgmr.msra.gmra.mrb[0].mxu0 %vm61_vm0, %v45_v13  ;;  %v308_v13 = vld [vmem:[%s9518_s6 + $0x70] sm:$0xff] }
  0x15   :  { %6325 = vmatprep.mubr.msk.f32.mxu0 %vm61_vm0, %v46_v14  ;;  %v6928_v14 = vpack.c.bf16 %v308_v13, %v306_v12 }
  0x18   :  { %6326 = vmatmul.mubr.msk.f32.gmra.mrb[2].mxu0 %vm61_vm0, %v47_v15  ;;  %v7828_v15 = vmov 0.0  }
  0xe7   :  { %v6324_v18 = vpop.f32.mrb[0].mxu0 }
  0xe8   :  { %v146_v20 = vadd.f32 %v6324_v18, %v5772_v17  ;;  %v140_v21 = vpop.f32.mrb[1].mxu0 }
  0xe9   :  { %v141_v23 = vadd.f32 %v5772_v17, %v140_v21 }
  0xea   :  { %v164_v24 = vadd.f32 %v160_v19, %v146_v20 }
  0xeb   :  { %v163_v25 = vadd.f32 %v159_v22, %v141_v23  ;;  %v6327_v26 = vpop.f32.mrb[2].mxu0  ;;  %v5779_v23 = vld [vmem:[%s9517_s5 + $0xb8] ss:$0 sm:$0xff] }
  0xec   :  { %v156_v28 = vadd.f32 %v6327_v26, %v5772_v17  ;;  %v150_v29 = vpop.f32.mrb[3].mxu0 }
  0xed   :  { %v151_v31 = vadd.f32 %v5772_v17, %v150_v29  ;;  %v6906_v32 = vpack.c.bf16 %v164_v24, %v163_v25  ;;  %v5780_v25 = vld [vmem:[%s9517_s5 + $0xc0] ss:$0 sm:$0xff] }
  0xee   :  { %v166_v33 = vadd.f32 %v162_v27, %v156_v28 }
  0xef   :  { %v165_v34 = vadd.f32 %v161_v30, %v151_v31  ;;  %6907 = vmatprep.subr.bf16.mxu1 %v6906_v32 }
  0xf0   :  { %6909 = vmatpush3.bf16.msra.mxu1 %v6906_v32  ;;  %v313_v32 = vlaneseq }
  0xf1   :  { %v6910_v35 = vpack.c.bf16 %v166_v33, %v165_v34 }
  0xf2   :  { %v8041_v33 = vshrl.u32 %v313_v32, 7 }
  0xf3   :  { %6911 = vmatprep.subr.bf16.mxu1 %v6910_v35 }
  0xf4   :  { %6913 = vmatpush3.bf16.msra.mxu1 %v6910_v35  ;;  %v315_v34 = vsub.s32 0, %v8041_v33  ;;  %v5781_v35 = vld [vmem:[%s9518_s6 + $0x80] ss:$8 sm:$0x3] }
  0xf5   :  { %6915 = vmatprep.subr.bf16.mxu1 %v6914_v57 }
  0xf7   :  { %6337 = vmatmul.mubr.msk.f32.vlgmr.msra.gmra.mrb[0].mxu1 %vm171_vm1, %v168_v36  ;;  %v316_v36 = vrot.slane %v5781_v35, %v315_v34 }
  0xf8   :  { %6917 = vmatpush1.bf16.msra.mxu1 %v6916_v60  ;;  %393 = vmatprep.mubr.f32.mxu1 %v7828_v15 }
  0xf9   :  { %6919 = vmatprep.subr.bf16.mxu1 %v6918_v63 }
  0xfc   :  { %6921 = vmatpush1.bf16.msra.mxu1 %v6920_v2  ;;  %v8096_v2 = vld [vmem:[%s9517_s5 + $0x78] sm:$0xff] }
  0xfd   :  { %6923 = vmatprep.subr.bf16.mxu1 %v6922_v5 }
 0x100   :  { %6925 = vmatpush1.bf16.msra.mxu1 %v6924_v8 }
 0x101   :  { %6927 = vmatprep.subr.bf16.mxu1 %v6926_v11 }
 0x104   :  { %6929 = vmatpush1.bf16.msra.mxu1 %v6928_v14 }
 0x1ca   :  { %v6338_v38 = vpop.f32.mrb[0].mxu1 }
 0x1cb   :  { %v244_v40 = vpop.f32.mrb[1].mxu1  ;;  %v7972_v42 = vadd.f32 %v6338_v38, %v170_v39 }
 0x1cc   :  { %v7970_v41 = vadd.f32 %v244_v40, %v169_v37  ;;  %v319_v37 = vsub.s32 1, %v8041_v33 }
 0x1cd   :  { %v258_v44 = vsel %vm61_vm0, %v7972_v42, 0.0 }
 0x1ce   :  { %v255_v43 = vsel %vm61_vm0, %v7970_v41, 0.0 }
 0x1cf   :  { %256 = vadd.xlane.f32.xlu0 %v255_v43  ;;  %v320_v43 = vrot.slane %v5781_v35, %v319_v37 }
 0x1d3   :  { %259 = vadd.xlane.f32.xlu0 %v258_v44 }
 0x25c   :  { %v257_v45 = vpop.xlane.xlu0 %256 }
 0x25d   :  { %v262_v46 = vmul.f32 0.015625, %v257_v45 }
 0x25f   :  { %v264_v47 = vsub.f32 %v7970_v41, %v262_v46 }
 0x260   :  { %v260_v48 = vpop.xlane.xlu0 %259 }
 0x261   :  { %v263_v49 = vmul.f32 0.015625, %v260_v48  ;;  %v266_v50 = vmul.f32 %v264_v47, %v264_v47 }
 0x263   :  { %v265_v51 = vsub.f32 %v7972_v42, %v263_v49  ;;  %v268_v52 = vsel %vm61_vm0, %v266_v50, 0.0 }
 0x264   :  { %269 = vadd.xlane.f32.xlu1 %v268_v52 }
 0x265   :  { %v267_v53 = vmul.f32 %v265_v51, %v265_v51 }
 0x267   :  { %v271_v54 = vsel %vm61_vm0, %v267_v53, 0.0 }
 0x268   :  { %272 = vadd.xlane.f32.xlu1 %v271_v54 }
 0x2f1   :  { %v270_v16 = vpop.xlane.xlu1 %269 }
 0x2f2   :  { %v274_v17 = vmul.f32 0.015625, %v270_v16 }
 0x2f4   :  { %v276_v18 = vadd.f32 1e-05, %v274_v17 }
 0x2f5   :  { %v273_v19 = vpop.xlane.xlu1 %272 }
 0x2f6   :  { %7558 = vrsqrt.f32 %v276_v18  ;;  %v275_v20 = vmul.f32 0.015625, %v273_v19 }
 0x2f8   :  { %v277_v21 = vadd.f32 1e-05, %v275_v20 }
 0x2fa   :  { %7560 = vrsqrt.f32 %v277_v21 }
 0x300   :  { %v7559_v22 = vpop.eup %7558 }
 0x301   :  { %v280_v24 = vmul.f32 %v7559_v22, %v264_v47 }
 0x303   :  { %v286_v26 = vmul.f32 %v5779_v23, %v280_v24 }
 0x304   :  { %v7561_v27 = vpop.eup %7560 }
 0x305   :  { %v292_v28 = vadd.f32 %v5780_v25, %v286_v26  ;;  %v281_v29 = vmul.f32 %v7561_v27, %v265_v51 }
 0x307   :  { %5782 = vmatmul.mubr.msk.f32.vlgmr.msra.gmra.mrb[2].mxu1 %vm61_vm0, %v292_v28  ;;  %v287_v30 = vmul.f32 %v5779_v23, %v281_v29 }
 0x308   :  { %399 = vmatprep.mubr.f32.mxu1 %v7828_v15 }
 0x309   :  { %v293_v31 = vadd.f32 %v5780_v25, %v287_v30 }
 0x30b   :  { %5783 = vmatmul.mubr.msk.f32.gmra.mrb[4].mxu1 %vm61_vm0, %v293_v31 }
 0x3da   :  { %v395_v38 = vpop.f32.mrb[2].mxu1 }
 0x3db   :  { %v396_v39 = vadd.f32 %v395_v38, %v316_v36  ;;  %v397_v40 = vpop.f32.mrb[3].mxu1 }
 0x3dc   :  { %v398_v48 = vadd.f32 %v397_v40, %v320_v43 }
 0x3dd   :  { %v8052_v44 = vmul.f32 0.25, %v396_v39 }
 0x3de   :  { %v401_v45 = vpop.f32.mrb[4].mxu1 }
 0x3df   :  { %v402_v46 = vadd.f32 %v401_v45, %v316_v36  ;;  %v403_v47 = vpop.f32.mrb[5].mxu1  ;;  %6343 = vmatprep.mubr.msk.f32.mxu0 %vm414_vm2, %v8052_v44 }
 0x3e0   :  { %v404_v49 = vadd.f32 %v403_v47, %v320_v43 }
 0x3e1   :  { %v8056_v50 = vpack.i.bf16 %v402_v46, %v396_v39  ;;  %v8066_v53 = vmul.f32 0.25, %v402_v46 }
 0x3e2   :  { %v6936_v51 = vpack.c.bf16 %v404_v49, %v398_v48  ;;  %v8058_v52 = vpack.i.bf16 %v404_v49, %v398_v48 }
 0x3e3   :  { %7372 = vrot.lane.b32.xlu1 %v8056_v50, %s7829_s28  ;;  %7367 = vrot.lane.b32.xlu0 %v8056_v50, %s7830_s29 }
 0x3e7   :  { %603 = vrot.lane.b32.xlu1 %v8052_v44, %s7831_s30 }
 0x3eb   :  { %605 = vrot.lane.b32.xlu1 %v8066_v53, %s7831_s30 }
 0x455   :  { %v7373_v54 = vpop.permute.xlu1 %7372  ;;  %v7368_v55 = vpop.permute.xlu0 %7367 }
 0x456   :  { %v7375_v56 = vunpack.i.h.bf16 %v7373_v54  ;;  %v7374_v57 = vunpack.i.l.bf16 %v7373_v54  ;;  %v7370_v58 = vunpack.i.h.bf16 %v7368_v55  ;;  %v7369_v59 = vunpack.i.l.bf16 %v7368_v55 }
 0x458   :  { %v6940_v61 = vpack.c.bf16 %v7375_v56, %v7374_v57  ;;  %v6930_v62 = vpack.c.bf16 %v7370_v58, %v7369_v59 }
 0x459   :  { %v604_v63 = vpop.permute.xlu1 %603 }
 0x45a   :  { %6932 = vmatprep.subr.msk.bf16.mxu0 %vm8072_vm3, %v6930_v62  ;;  %6942 = vmatprep.subr.msk.bf16.mxu1 %vm8072_vm3, %v6940_v61 }
 0x45b   :  { %6357 = vmatprep.mubr.msk.f32.mxu1 %vm414_vm2, %v604_v63  ;;  %6935 = vmatpush3.bf16.xpose.msk.msra.mxu0 %vm8072_vm3, %v6930_v62 }
 0x45c   :  { %6945 = vmatpush3.bf16.xpose.msk.msra.mxu1 %vm8072_vm3, %v6940_v61  ;;  %6937 = vmatprep.subr.bf16.mxu0 %v6936_v51 }
 0x45d   :  { %v606_v0 = vpop.permute.xlu1 %605 }
 0x462   :  { %6344 = vmatmul.mubr.msk.f32.vlgmr.msra.gmra.mrb[4].mxu0 %vm414_vm2, %v8066_v53 }
 0x463   :  { %6358 = vmatmul.mubr.msk.f32.vlgmr.msra.gmra.mrb[6].mxu1 %vm414_vm2, %v606_v0  ;;  %6939 = vmatpush3.bf16.msra.mxu0 %v6936_v51 }
 0x535   :  { %v6345_v3 = vpop.f32.mrb[4].mxu0 }
 0x536   :  { %v497_v4 = vadd.f32 %v6345_v3, %v8091_v1  ;;  %v6359_v5 = vpop.f32.mrb[6].mxu1  ;;  %v491_v6 = vpop.f32.mrb[5].mxu0 }
 0x537   :  { %v492_v7 = vadd.f32 %v491_v6, %v8096_v2  ;;  %v685_v8 = vpop.f32.mrb[7].mxu1  ;;  %v691_v12 = vadd.f32 %v6359_v5, %v8091_v1 }
 0x538   :  { %v503_v9 = vsel %vm414_vm2, %v497_v4, -inf  ;;  %v686_v10 = vadd.f32 %v685_v8, %v8096_v2 }
 0x539   :  { %504 = vmax.xlane.f32.xlu1 %v503_v9  ;;  %v500_v11 = vsel %vm414_vm2, %v492_v7, -inf  ;;  %v697_v14 = vsel %vm414_vm2, %v691_v12, -inf }
 0x53a   :  { %501 = vmax.xlane.f32.xlu0 %v500_v11  ;;  %v694_v13 = vsel %vm414_vm2, %v686_v10, -inf }
 0x53e   :  { %695 = vmax.xlane.f32.xlu0 %v694_v13 }
 0x542   :  { %698 = vmax.xlane.f32.xlu0 %v697_v14 }
 0x5c6   :  { %v505_v16 = vpop.xlane.xlu1 %504 }
 0x5c7   :  { %v507_v17 = vsub.f32 %v497_v4, %v505_v16  ;;  %v502_v18 = vpop.xlane.xlu0 %501 }
 0x5c8   :  { %v506_v19 = vsub.f32 %v492_v7, %v502_v18 }
 0x5c9   :  { %v510_v20 = vmul.f32 1.442695, %v507_v17 }
 0x5ca   :  { %v508_v21 = vmul.f32 1.442695, %v506_v19 }
 0x5cb   :  { %7562 = vpow2.f32 %v510_v20  ;;  %v696_v22 = vpop.xlane.xlu0 %695 }
 0x5cc   :  { %7564 = vpow2.f32 %v508_v21  ;;  %v700_v23 = vsub.f32 %v686_v10, %v696_v22 }
 0x5ce   :  { %v702_v24 = vmul.f32 1.442695, %v700_v23 }
 0x5cf   :  { %v699_v25 = vpop.xlane.xlu0 %698 }
 0x5d0   :  { %7566 = vpow2.f32 %v702_v24  ;;  %v701_v26 = vsub.f32 %v691_v12, %v699_v25 }
 0x5d2   :  { %v704_v27 = vmul.f32 1.442695, %v701_v26 }
 0x5d4   :  { %7568 = vpow2.f32 %v704_v27 }
 0x5d5   :  { %v7563_v28 = vpop.eup %7562 }
 0x5d6   :  { %v7565_v29 = vpop.eup %7564  ;;  %v515_v30 = vsel %vm414_vm2, %v7563_v28, 0.0 }
 0x5d7   :  { %516 = vadd.xlane.f32.xlu1 %v515_v30  ;;  %v512_v31 = vsel %vm414_vm2, %v7565_v29, 0.0 }
 0x5d8   :  { %513 = vadd.xlane.f32.xlu0 %v512_v31 }
 0x5da   :  { %v7567_v35 = vpop.eup %7566 }
 0x5db   :  { %v706_v36 = vsel %vm414_vm2, %v7567_v35, 0.0 }
 0x5dc   :  { %707 = vadd.xlane.f32.xlu0 %v706_v36 }
 0x5de   :  { %v7569_v38 = vpop.eup %7568 }
 0x5df   :  { %v709_v39 = vsel %vm414_vm2, %v7569_v38, 0.0 }
 0x5e0   :  { %710 = vadd.xlane.f32.xlu1 %v709_v39 }
 0x5f1   :  { %7382 = vrot.lane.b32.xlu1 %v8056_v50, %s7832_s14 }
 0x5f2   :  { %7377 = vrot.lane.b32.xlu0 %v8058_v52, %s7831_s30 }
 0x5f5   :  { %805 = vrot.lane.b32.xlu1 %v8052_v44, %s7833_s15 }
 0x5f9   :  { %807 = vrot.lane.b32.xlu1 %v8066_v53, %s7833_s15 }
 0x664   :  { %v517_v40 = vpop.xlane.xlu1 %516 }
 0x665   :  { %7570 = vrcp.f32 %v517_v40  ;;  %v514_v43 = vpop.xlane.xlu0 %513 }
 0x666   :  { %7572 = vrcp.f32 %v514_v43 }
 0x669   :  { %v708_v45 = vpop.xlane.xlu0 %707 }
 0x66a   :  { %7574 = vrcp.f32 %v708_v45 }
 0x66d   :  { %v7378_v46 = vpop.permute.xlu0 %7377  ;;  %v711_v47 = vpop.xlane.xlu1 %710 }
 0x66e   :  { %v7380_v48 = vunpack.i.h.bf16 %v7378_v46  ;;  %v7379_v49 = vunpack.i.l.bf16 %v7378_v46  ;;  %7576 = vrcp.f32 %v711_v47 }
 0x66f   :  { %v7571_v51 = vpop.eup %7570 }
 0x670   :  { %v7573_v54 = vpop.eup %7572  ;;  %v6946_v55 = vpack.c.bf16 %v7380_v48, %v7379_v49  ;;  %v521_v61 = vmul.f32 %v7571_v51, %v7563_v28 }
 0x671   :  { %v7383_v56 = vpop.permute.xlu1 %7382  ;;  %v520_v57 = vmul.f32 %v7573_v54, %v7565_v29 }
 0x672   :  { %v7385_v58 = vunpack.i.h.bf16 %v7383_v56  ;;  %v7384_v59 = vunpack.i.l.bf16 %v7383_v56  ;;  %6947 = vmatprep.subr.bf16.mxu0 %v6946_v55 }
 0x673   :  { %6350 = vmatprep.mubr.msk.f32.mxu0 %vm414_vm2, %v520_v57 }
 0x674   :  { %v7575_v62 = vpop.eup %7574  ;;  %v6950_v63 = vpack.c.bf16 %v7385_v58, %v7384_v59  ;;  %6351 = vmatmul.mubr.msk.f32.vlgmr.msra.gmra.mrb[6].mxu0 %vm414_vm2, %v521_v61 }
 0x675   :  { %6949 = vmatpush3.bf16.msra.mxu0 %v6946_v55  ;;  %v714_v0 = vmul.f32 %v7575_v62, %v7567_v35  ;;  %v806_v5 = vpop.permute.xlu1 %805 }
 0x676   :  { %6952 = vmatprep.subr.msk.bf16.mxu0 %vm8072_vm3, %v6950_v63 }
 0x677   :  { %6364 = vmatprep.mubr.msk.f32.mxu0 %vm414_vm2, %v714_v0 }
 0x678   :  { %v7577_v3 = vpop.eup %7576 }
 0x679   :  { %v715_v4 = vmul.f32 %v7577_v3, %v7569_v38  ;;  %v808_v6 = vpop.permute.xlu1 %807 }
 0x67b   :  { %6365 = vmatmul.mubr.msk.f32.vlgmr.msra.gmra.mrb[8].mxu0 %vm414_vm2, %v715_v4 }
 0x67c   :  { %6371 = vmatprep.mubr.msk.f32.mxu0 %vm414_vm2, %v806_v5 }
 0x67e   :  { %6955 = vmatpush3.bf16.xpose.msk.msra.mxu0 %vm8072_vm3, %v6950_v63 }
 0x685   :  { %6372 = vmatmul.mubr.msk.f32.vlgmr.msra.gmra.mrb[10].mxu0 %vm414_vm2, %v808_v6 }
 0x747   :  { %v8128_v7 = vpop.f32.mrb[6].mxu0 }
 0x748   :  { %v8130_v8 = vpop.f32.mrb[7].mxu0 }
 0x74e   :  { %v8132_v9 = vpop.f32.mrb[8].mxu0 }
 0x74f   :  { %v8134_v10 = vpop.f32.mrb[9].mxu0 }
 0x758   :  { %v6373_v11 = vpop.f32.mrb[10].mxu0 }
 0x759   :  { %v893_v12 = vadd.f32 %v6373_v11, %v8091_v1  ;;  %v887_v13 = vpop.f32.mrb[11].mxu0 }
 0x75a   :  { %v888_v14 = vadd.f32 %v887_v13, %v8096_v2 }
 0x75b   :  { %v899_v16 = vsel %vm414_vm2, %v893_v12, -inf }
 0x75c   :  { %900 = vmax.xlane.f32.xlu1 %v899_v16  ;;  %v896_v17 = vsel %vm414_vm2, %v888_v14, -inf }
 0x75d   :  { %897 = vmax.xlane.f32.xlu0 %v896_v17 }
 0x76d   :  { %7392 = vrot.lane.b32.xlu1 %v8056_v50, %s7834_s16 }
 0x771   :  { %1005 = vrot.lane.b32.xlu1 %v8052_v44, %s7835_s17 }
 0x775   :  { %1007 = vrot.lane.b32.xlu1 %v8066_v53, %s7835_s17 }
 0x7e9   :  { %v901_v18 = vpop.xlane.xlu1 %900 }
 0x7ea   :  { %v903_v19 = vsub.f32 %v893_v12, %v901_v18  ;;  %v898_v20 = vpop.xlane.xlu0 %897 }
 0x7eb   :  { %v902_v21 = vsub.f32 %v888_v14, %v898_v20 }
 0x7ec   :  { %v906_v22 = vmul.f32 1.442695, %v903_v19 }
 0x7ed   :  { %v904_v23 = vmul.f32 1.442695, %v902_v21  ;;  %v7393_v27 = vpop.permute.xlu1 %7392  ;;  %v1237_v21 = vld [vmem:[%s9517_s5 + $0xd0] sm:$0xff] }
 0x7ee   :  { %7578 = vpow2.f32 %v906_v22  ;;  %v7395_v29 = vunpack.i.h.bf16 %v7393_v27  ;;  %v7394_v30 = vunpack.i.l.bf16 %v7393_v27  ;;  %v1238_v22 = vld [vmem:[%s9517_s5 + $0xd8] sm:$0xff]  ;;  %v1243_v27 = vld [vmem:[%s9517_s5 + $0x100] sm:$0xff] }
 0x7ef   :  { %7580 = vpow2.f32 %v904_v23 }
 0x7f0   :  { %v6960_v38 = vpack.c.bf16 %v7395_v29, %v7394_v30 }
 0x7f1   :  { %v1006_v46 = vpop.permute.xlu1 %1005 }
 0x7f5   :  { %v1008_v47 = vpop.permute.xlu1 %1007 }
 0x7f8   :  { %v7579_v24 = vpop.eup %7578 }
 0x7f9   :  { %v911_v25 = vsel %vm414_vm2, %v7579_v24, 0.0  ;;  %v7581_v26 = vpop.eup %7580 }
 0x7fa   :  { %912 = vadd.xlane.f32.xlu0 %v911_v25  ;;  %v908_v50 = vsel %vm414_vm2, %v7581_v26, 0.0 }
 0x7fe   :  { %909 = vadd.xlane.f32.xlu0 %v908_v50  ;;  %v1241_v50 = vld [vmem:[%s9517_s5 + $0xf0] sm:$0xff] }
 0x814   :  { %7387 = vrot.lane.b32.xlu0 %v8058_v52, %s7833_s15 }
 0x887   :  { %v913_v44 = vpop.xlane.xlu0 %912 }
 0x888   :  { %7582 = vrcp.f32 %v913_v44 }
 0x88b   :  { %v910_v53 = vpop.xlane.xlu0 %909 }
 0x88c   :  { %7584 = vrcp.f32 %v910_v53  ;;  %v1242_v53 = vld [vmem:[%s9517_s5 + $0xf8] sm:$0xff] }
 0x88f   :  { %v7388_v28 = vpop.permute.xlu0 %7387 }
 0x890   :  { %v7390_v31 = vunpack.i.h.bf16 %v7388_v28  ;;  %v7389_v35 = vunpack.i.l.bf16 %v7388_v28  ;;  %v6982_v28 = vpack.c.bf16 %v1243_v27, %v1242_v53  ;;  %v5812_v27 = vld [vmem:[%s9517_s5 + $0x118] ss:$0 sm:$0xff] }
 0x892   :  { %v6956_v36 = vpack.c.bf16 %v7390_v31, %v7389_v35  ;;  %v7583_v39 = vpop.eup %7582 }
 0x893   :  { %v917_v45 = vmul.f32 %v7583_v39, %v7579_v24  ;;  %v1239_v24 = vld [vmem:[%s9517_s5 + $0xe0] sm:$0xff] }
 0x894   :  { %6957 = vmatprep.subr.bf16.mxu1 %v6956_v36  ;;  %v6974_v25 = vpack.c.bf16 %v1239_v24, %v1238_v22 }
 0x895   :  { %6959 = vmatpush3.bf16.msra.mxu1 %v6956_v36 }
 0x896   :  { %v7585_v40 = vpop.eup %7584  ;;  %6962 = vmatprep.subr.msk.bf16.mxu1 %vm8072_vm3, %v6960_v38 }
 0x897   :  { %v916_v43 = vmul.f32 %v7585_v40, %v7581_v26  ;;  %v1240_v26 = vld [vmem:[%s9517_s5 + $0xe8] sm:$0xff] }
 0x898   :  { %v6978_v44 = vpack.c.bf16 %v1241_v50, %v1240_v26 }
 0x899   :  { %6378 = vmatprep.mubr.msk.f32.mxu1 %vm414_vm2, %v916_v43 }
 0x89a   :  { %6379 = vmatmul.mubr.msk.f32.vlgmr.msra.gmra.mrb[8].mxu1 %vm414_vm2, %v917_v45 }
 0x89b   :  { %6385 = vmatprep.mubr.msk.f32.mxu1 %vm414_vm2, %v1006_v46 }
 0x89e   :  { %6965 = vmatpush3.bf16.xpose.msk.msra.mxu1 %vm8072_vm3, %v6960_v38 }
 0x8a5   :  { %6386 = vmatmul.mubr.msk.f32.vlgmr.msra.gmra.mrb[10].mxu1 %vm414_vm2, %v1008_v47 }
 0x96d   :  { %v6380_v48 = vpop.f32.mrb[8].mxu1 }
 0x96e   :  { %v996_v49 = vpop.f32.mrb[9].mxu1 }
 0x978   :  { %v6387_v51 = vpop.f32.mrb[10].mxu1 }
 0x979   :  { %v1093_v54 = vadd.f32 %v6387_v51, %v8091_v1  ;;  %v1087_v55 = vpop.f32.mrb[11].mxu1 }
 0x97a   :  { %v1088_v56 = vadd.f32 %v1087_v55, %v8096_v2 }
 0x97b   :  { %v1099_v57 = vsel %vm414_vm2, %v1093_v54, -inf }
 0x97c   :  { %1100 = vmax.xlane.f32.xlu1 %v1099_v57  ;;  %v1096_v58 = vsel %vm414_vm2, %v1088_v56, -inf }
 0x97d   :  { %1097 = vmax.xlane.f32.xlu0 %v1096_v58 }
 0x98d   :  { %1207 = vrot.lane.b32.xlu1 %v8134_v10, %s7834_s16 }
 0x991   :  { %1209 = vrot.lane.b32.xlu1 %v8132_v9, %s7834_s16 }
 0x995   :  { %1215 = vrot.lane.b32.xlu1 %v996_v49, %s7832_s14 }
 0xa09   :  { %v1101_v59 = vpop.xlane.xlu1 %1100 }
 0xa0a   :  { %v1103_v61 = vsub.f32 %v1093_v54, %v1101_v59  ;;  %v1098_v62 = vpop.xlane.xlu0 %1097 }
 0xa0b   :  { %v1102_v63 = vsub.f32 %v1088_v56, %v1098_v62 }
 0xa0c   :  { %v1106_v0 = vmul.f32 1.442695, %v1103_v61 }
 0xa0d   :  { %v1104_v3 = vmul.f32 1.442695, %v1102_v63  ;;  %v1208_v31 = vpop.permute.xlu1 %1207 }
 0xa0e   :  { %7586 = vpow2.f32 %v1106_v0  ;;  %v1229_v39 = vsel %vm414_vm2, %v8130_v8, %v1208_v31  ;;  %v5808_v8 = vld [vmem:[%s9517_s5 + $0x108] ss:$0 sm:$0xff] }
 0xa0f   :  { %7588 = vpow2.f32 %v1104_v3 }
 0xa11   :  { %v1210_v35 = vpop.permute.xlu1 %1209 }
 0xa12   :  { %v1230_v43 = vsel %vm414_vm2, %v8128_v7, %v1210_v35 }
 0xa15   :  { %v1216_v38 = vpop.permute.xlu1 %1215 }
 0xa16   :  { %v1231_v45 = vsel %vm171_vm1, %v1229_v39, %v1216_v38  ;;  %v1484_v38 = vld [vmem:[%s9517_s5 + $0x120] sm:$0xff]  ;;  %v1485_v39 = vld [vmem:[%s9517_s5 + $0x128] sm:$0xff] }
 0xa18   :  { %v7587_v4 = vpop.eup %7586 }
 0xa19   :  { %v1111_v5 = vsel %vm414_vm2, %v7587_v4, 0.0  ;;  %v7589_v6 = vpop.eup %7588 }
 0xa1a   :  { %1112 = vadd.xlane.f32.xlu0 %v1111_v5  ;;  %v1108_v10 = vsel %vm414_vm2, %v7589_v6, 0.0 }
 0xa1e   :  { %1109 = vadd.xlane.f32.xlu0 %v1108_v10  ;;  %v1372_v10 = vld [vmem:[%s9519_s7] sm:$0xff] }
 0xa34   :  { %7397 = vrot.lane.b32.xlu0 %v8058_v52, %s7835_s17  ;;  %v1236_v52 = vld [vmem:[%s9517_s5 + $0xc8] sm:$0xff] }
 0xa35   :  { %v6970_v23 = vpack.c.bf16 %v1237_v21, %v1236_v52 }
 0xa38   :  { %1217 = vrot.lane.b32.xlu0 %v6380_v48, %s7832_s14 }
 0xaa7   :  { %v1113_v9 = vpop.xlane.xlu0 %1112 }
 0xaa8   :  { %7590 = vrcp.f32 %v1113_v9  ;;  %v1373_v9 = vld [vmem:[%s9519_s7 + $0x8] sm:$0xff] }
 0xaab   :  { %v1110_v11 = vpop.xlane.xlu0 %1109 }
 0xaac   :  { %7592 = vrcp.f32 %v1110_v11  ;;  %v6986_v11 = vpack.c.bf16 %v1373_v9, %v1372_v10 }
 0xaae   :  { %6987 = vmatprep.subr.bf16.mxu1 %v6986_v11 }
 0xaaf   :  { %v7398_v12 = vpop.permute.xlu0 %7397  ;;  %6989 = vmatpush3.bf16.msra.mxu1 %v6986_v11 }
 0xab0   :  { %v7400_v13 = vunpack.i.h.bf16 %v7398_v12  ;;  %v7399_v14 = vunpack.i.l.bf16 %v7398_v12  ;;  %v1374_v12 = vld [vmem:[%s9519_s7 + $0x10] sm:$0xff] }
 0xab2   :  { %v6966_v16 = vpack.c.bf16 %v7400_v13, %v7399_v14  ;;  %v7591_v17 = vpop.eup %7590  ;;  %v1375_v13 = vld [vmem:[%s9519_s7 + $0x18] sm:$0xff]  ;;  %v1376_v14 = vld [vmem:[%s9519_s7 + $0x20] sm:$0xff] }
 0xab3   :  { %v1117_v20 = vmul.f32 %v7591_v17, %v7587_v4  ;;  %v1218_v36 = vpop.permute.xlu0 %1217  ;;  %v1377_v17 = vld [vmem:[%s9519_s7 + $0x28] sm:$0xff] }
 0xab4   :  { %6967 = vmatprep.subr.bf16.mxu0 %v6966_v16  ;;  %v1232_v47 = vsel %vm171_vm1, %v1230_v43, %v1218_v36  ;;  %v1486_v43 = vld [vmem:[%s9517_s5 + $0x130] sm:$0xff] }
 0xab5   :  { %6969 = vmatpush3.bf16.msra.mxu0 %v6966_v16  ;;  %v6990_v16 = vpack.c.bf16 %v1375_v13, %v1374_v12 }
 0xab6   :  { %v7593_v18 = vpop.eup %7592  ;;  %6971 = vmatprep.subr.bf16.mxu0 %v6970_v23 }
 0xab7   :  { %v1116_v19 = vmul.f32 %v7593_v18, %v7589_v6  ;;  %6991 = vmatprep.subr.bf16.mxu1 %v6990_v16  ;;  %v6994_v18 = vpack.c.bf16 %v1377_v17, %v1376_v14 }
 0xab8   :  { %6993 = vmatpush3.bf16.msra.mxu1 %v6990_v16 }
 0xab9   :  { %6392 = vmatprep.mubr.msk.f32.mxu0 %vm414_vm2, %v1116_v19  ;;  %v1378_v19 = vld [vmem:[%s9519_s7 + $0x30] sm:$0xff]  ;;  %6995 = vmatprep.subr.bf16.mxu1 %v6994_v18 }
 0xaba   :  { %6393 = vmatmul.mubr.msk.f32.vlgmr.msra.gmra.mrb[12].mxu0 %vm414_vm2, %v1117_v20  ;;  %v1379_v20 = vld [vmem:[%s9519_s7 + $0x38] sm:$0xff] }
 0xabb   :  { %6973 = vmatpush3.bf16.msra.mxu0 %v6970_v23  ;;  %v6998_v52 = vpack.c.bf16 %v1379_v20, %v1378_v19 }
 0xabc   :  { %6975 = vmatprep.subr.bf16.mxu0 %v6974_v25  ;;  %6997 = vmatpush3.bf16.msra.mxu1 %v6994_v18 }
 0xabd   :  { %6999 = vmatprep.subr.bf16.mxu1 %v6998_v52 }
 0xabf   :  { %6977 = vmatpush3.bf16.msra.mxu0 %v6974_v25 }
 0xac0   :  { %6979 = vmatprep.subr.bf16.mxu0 %v6978_v44  ;;  %7001 = vmatpush3.bf16.msra.mxu1 %v6998_v52 }
 0xac3   :  { %6981 = vmatpush3.bf16.msra.mxu0 %v6978_v44  ;;  %v5811_v44 = vld [vmem:[%s9517_s5 + $0x110] ss:$0 sm:$0xff] }
 0xac4   :  { %6983 = vmatprep.subr.bf16.mxu0 %v6982_v28 }
 0xac7   :  { %6985 = vmatpush3.bf16.msra.mxu0 %v6982_v28 }
 0xb8d   :  { %v6394_v29 = vpop.f32.mrb[12].mxu0 }
 0xb8e   :  { %1225 = vrot.lane.b32.xlu0 %v6394_v29, %s7829_s28  ;;  %v1196_v30 = vpop.f32.mrb[13].mxu0 }
 0xb8f   :  { %1223 = vrot.lane.b32.xlu1 %v1196_v30, %s7829_s28 }
 0xc00   :  { %v1226_v40 = vpop.permute.xlu0 %1225 }
 0xc01   :  { %v1224_v46 = vpop.permute.xlu1 %1223  ;;  %v1235_v49 = vsel %vm1233_vm4, %v1232_v47, %v1226_v40  ;;  %v7002_v40 = vpack.c.bf16 %v1485_v39, %v1484_v38  ;;  %v1488_v47 = vld [vmem:[%s9517_s5 + $0x140] sm:$0xff] }
 0xc02   :  { %v1234_v48 = vsel %vm1233_vm4, %v1231_v45, %v1224_v46  ;;  %v1487_v45 = vld [vmem:[%s9517_s5 + $0x138] sm:$0xff] }
 0xc03   :  { %6411 = vmatprep.mubr.msk.f32.mxu0 %vm61_vm0, %v1234_v48  ;;  %7003 = vmatprep.subr.bf16.mxu0 %v7002_v40  ;;  %v7006_v46 = vpack.c.bf16 %v1487_v45, %v1486_v43  ;;  %v1489_v48 = vld [vmem:[%s9517_s5 + $0x148] sm:$0xff] }
 0xc04   :  { %6412 = vmatmul.mubr.msk.f32.vlgmr.msra.gmra.mrb[14].mxu0 %vm61_vm0, %v1235_v49  ;;  %v7010_v49 = vpack.c.bf16 %v1489_v48, %v1488_v47 }
 0xc05   :  { %7005 = vmatpush3.bf16.msra.mxu0 %v7002_v40 }
 0xc06   :  { %7007 = vmatprep.subr.bf16.mxu0 %v7006_v46 }
 0xc09   :  { %7009 = vmatpush3.bf16.msra.mxu0 %v7006_v46 }
 0xc0a   :  { %7011 = vmatprep.subr.bf16.mxu0 %v7010_v49 }
 0xc0d   :  { %7013 = vmatpush3.bf16.msra.mxu0 %v7010_v49 }
 0xcd7   :  { %v6413_v51 = vpop.f32.mrb[14].mxu0 }
 0xcd8   :  { %v1327_v54 = vadd.f32 %v6413_v51, %v5808_v8  ;;  %v1321_v7 = vpop.f32.mrb[15].mxu0  ;;  %v1491_v51 = vld [vmem:[%s9517_s5 + $0x158] sm:$0xff] }
 0xcd9   :  { %v1322_v55 = vadd.f32 %v5808_v8, %v1321_v7  ;;  %v1490_v8 = vld [vmem:[%s9517_s5 + $0x150] sm:$0xff]  ;;  %v1492_v7 = vld [vmem:[%s9517_s5 + $0x160] sm:$0xff] }
 0xcda   :  { %v8214_v56 = vadd.f32 %v1327_v54, %v7972_v42  ;;  %v7014_v54 = vpack.c.bf16 %v1491_v51, %v1490_v8  ;;  %v1623_v51 = vld [vmem:[%s9518_s6 + $0x98] sm:$0xff] }
 0xcdb   :  { %v8217_v57 = vadd.f32 %v1322_v55, %v7970_v41  ;;  %v1493_v55 = vld [vmem:[%s9517_s5 + $0x168] sm:$0xff] }
 0xcdc   :  { %v1337_v58 = vsel %vm61_vm0, %v8214_v56, 0.0  ;;  %7015 = vmatprep.subr.bf16.mxu0 %v7014_v54 }
 0xcdd   :  { %1338 = vadd.xlane.f32.xlu0 %v1337_v58  ;;  %v1334_v59 = vsel %vm61_vm0, %v8217_v57, 0.0  ;;  %7017 = vmatpush3.bf16.msra.mxu0 %v7014_v54  ;;  %v1494_v58 = vld [vmem:[%s9517_s5 + $0x170] sm:$0xff]  ;;  %v1625_v54 = vld [vmem:[%s9518_s6 + $0xa8] sm:$0xff] }
 0xcde   :  { %1335 = vadd.xlane.f32.xlu1 %v1334_v59  ;;  %v7018_v59 = vpack.c.bf16 %v1493_v55, %v1492_v7  ;;  %v7034_v7 = vpack.c.bf16 %v1625_v54, %v1623_v51  ;;  %v1622_v55 = vld [vmem:[%s9518_s6 + $0x90] sm:$0xff] }
 0xce0   :  { %7019 = vmatprep.subr.bf16.mxu0 %v7018_v59  ;;  %7035 = vmatprep.subr.bf16.mxu1 %v7034_v7 }
 0xce1   :  { %7021 = vmatpush3.bf16.msra.mxu0 %v7018_v59 }
 0xd6a   :  { %v1339_v61 = vpop.xlane.xlu0 %1338 }
 0xd6b   :  { %v1341_v62 = vmul.f32 0.015625, %v1339_v61  ;;  %v1336_v63 = vpop.xlane.xlu1 %1335  ;;  %v1495_v61 = vld [vmem:[%s9517_s5 + $0x178] sm:$0xff] }
 0xd6c   :  { %v1340_v0 = vmul.f32 0.015625, %v1336_v63  ;;  %v1496_v63 = vld [vmem:[%s9517_s5 + $0x180] sm:$0xff] }
 0xd6d   :  { %v1343_v3 = vsub.f32 %v8214_v56, %v1341_v62  ;;  %v7022_v62 = vpack.c.bf16 %v1495_v61, %v1494_v58  ;;  %v1624_v58 = vld [vmem:[%s9518_s6 + $0xa0] sm:$0xff]  ;;  %v1627_v61 = vld [vmem:[%s9518_s6 + $0xb8] sm:$0xff] }
 0xd6e   :  { %v1342_v42 = vsub.f32 %v8217_v57, %v1340_v0  ;;  %v1497_v0 = vld [vmem:[%s9517_s5 + $0x188] sm:$0xff]  ;;  %v7036_v59 = vpack.c.bf16 %v1624_v58, %v1622_v55 }
 0xd6f   :  { %v1345_v5 = vmul.f32 %v1343_v3, %v1343_v3  ;;  %7023 = vmatprep.subr.bf16.mxu0 %v7022_v62 }
 0xd70   :  { %v1344_v4 = vmul.f32 %v1342_v42, %v1342_v42  ;;  %7025 = vmatpush3.bf16.msra.mxu0 %v7022_v62  ;;  %v1629_v62 = vld [vmem:[%s9518_s6 + $0xc8] sm:$0xff] }
 0xd71   :  { %v1349_v6 = vsel %vm61_vm0, %v1345_v5, 0.0  ;;  %v5813_v5 = vld [vmem:[%s9519_s7 + $0x40] ss:$0 sm:$0xff] }
 0xd72   :  { %v1346_v41 = vsel %vm61_vm0, %v1344_v4, 0.0  ;;  %v1499_v4 = vld [vmem:[%s9517_s5 + $0x198] sm:$0xff] }
 0xd73   :  { %1347 = vadd.xlane.f32.xlu0 %v1346_v41 }
 0xd77   :  { %1350 = vadd.xlane.f32.xlu0 %v1349_v6 }
 0xe00   :  { %v1348_v21 = vpop.xlane.xlu0 %1347 }
 0xe01   :  { %v1352_v22 = vmul.f32 0.015625, %v1348_v21 }
 0xe03   :  { %v1354_v23 = vadd.f32 1e-05, %v1352_v22 }
 0xe04   :  { %v1351_v24 = vpop.xlane.xlu0 %1350 }
 0xe05   :  { %7594 = vrsqrt.f32 %v1354_v23  ;;  %v1353_v25 = vmul.f32 0.015625, %v1351_v24 }
 0xe07   :  { %v1355_v26 = vadd.f32 1e-05, %v1353_v25 }
 0xe09   :  { %7596 = vrsqrt.f32 %v1355_v26 }
 0xe0f   :  { %v7595_v50 = vpop.eup %7594 }
 0xe10   :  { %v1358_v53 = vmul.f32 %v7595_v50, %v1342_v42  ;;  %v1498_v42 = vld [vmem:[%s9517_s5 + $0x190] sm:$0xff] }
 0xe11   :  { %v7030_v41 = vpack.c.bf16 %v1499_v4, %v1498_v42  ;;  %v1631_v4 = vld [vmem:[%s9518_s6 + $0xd8] sm:$0xff] }
 0xe12   :  { %v1364_v28 = vmul.f32 %v5811_v44, %v1358_v53 }
 0xe13   :  { %v7597_v29 = vpop.eup %7596 }
 0xe14   :  { %v1359_v30 = vmul.f32 %v7597_v29, %v1343_v3  ;;  %v1370_v31 = vadd.f32 %v5812_v27, %v1364_v28  ;;  %v7026_v3 = vpack.c.bf16 %v1497_v0, %v1496_v63  ;;  %v7038_v63 = vpack.c.bf16 %v1629_v62, %v1627_v61  ;;  %v1626_v0 = vld [vmem:[%s9518_s6 + $0xb0] sm:$0xff] }
 0xe16   :  { %v1365_v35 = vmul.f32 %v5811_v44, %v1359_v30  ;;  %6430 = vmatprep.mubr.msk.f32.mxu1 %vm61_vm0, %v1370_v31  ;;  %7027 = vmatprep.subr.bf16.mxu0 %v7026_v3 }
 0xe17   :  { %7029 = vmatpush3.bf16.msra.mxu0 %v7026_v3  ;;  %v1628_v3 = vld [vmem:[%s9518_s6 + $0xc0] sm:$0xff] }
 0xe18   :  { %v1371_v36 = vadd.f32 %v5812_v27, %v1365_v35  ;;  %7031 = vmatprep.subr.bf16.mxu0 %v7030_v41  ;;  %v5816_v27 = vld [vmem:[%s9517_s5 + $0x1a0] ss:$0 sm:$0xff]  ;;  %v7040_v42 = vpack.c.bf16 %v1628_v3, %v1626_v0 }
 0xe1a   :  { %6431 = vmatmul.mubr.msk.f32.vlgmr.msra.gmra.mrb[12].mxu1 %vm61_vm0, %v1371_v36 }
 0xe1b   :  { %1721 = vmatprep.mubr.f32.mxu1 %v7828_v15  ;;  %7033 = vmatpush3.bf16.msra.mxu0 %v7030_v41  ;;  %v1633_v41 = vld [vmem:[%s9518_s6 + $0xe8] sm:$0xff] }
 0xe1c   :  { %7037 = vmatpush1.bf16.msra.mxu1 %v7036_v59 }
 0xe1d   :  { %7039 = vmatprep.subr.bf16.mxu1 %v7038_v63 }
 0xe20   :  { %7041 = vmatpush1.bf16.msra.mxu1 %v7040_v42 }
 0xeed   :  { %v6432_v6 = vpop.f32.mrb[12].mxu1 }
 0xeee   :  { %v1463_v10 = vadd.f32 %v6432_v6, %v5813_v5  ;;  %v1457_v9 = vpop.f32.mrb[13].mxu1  ;;  %v1630_v6 = vld [vmem:[%s9518_s6 + $0xd0] sm:$0xff] }
 0xeef   :  { %v1458_v11 = vadd.f32 %v5813_v5, %v1457_v9  ;;  %v7042_v5 = vpack.c.bf16 %v1633_v41, %v1631_v4 }
 0xef0   :  { %v1467_v12 = vmul.f32 %v1463_v10, %v1463_v10 }
 0xef1   :  { %v1466_v13 = vmul.f32 %v1458_v11, %v1458_v11  ;;  %7043 = vmatprep.subr.bf16.mxu1 %v7042_v5 }
 0xef2   :  { %v1469_v14 = vmul.f32 %v1467_v12, %v1463_v10  ;;  %v1637_v12 = vld [vmem:[%s9518_s6 + $0x108] sm:$0xff] }
 0xef3   :  { %v1468_v16 = vmul.f32 %v1466_v13, %v1458_v11 }
 0xef4   :  { %v1471_v17 = vmul.f32 0.044715, %v1469_v14  ;;  %v1634_v14 = vld [vmem:[%s9518_s6 + $0xf0] sm:$0xff] }
 0xef5   :  { %v1470_v18 = vmul.f32 0.044715, %v1468_v16  ;;  %v1636_v16 = vld [vmem:[%s9518_s6 + $0x100] sm:$0xff] }
 0xef6   :  { %v1473_v19 = vadd.f32 %v1471_v17, %v1463_v10  ;;  %v7048_v17 = vpack.c.bf16 %v1636_v16, %v1634_v14 }
 0xef7   :  { %v1472_v20 = vadd.f32 %v1470_v18, %v1458_v11 }
 0xef8   :  { %v1475_v52 = vmul.f32 0.7978846, %v1473_v19 }
 0xef9   :  { %v1474_v21 = vmul.f32 0.7978846, %v1472_v20 }
 0xefa   :  { %7598 = vtanh.f32 %v1475_v52 }
 0xefb   :  { %7600 = vtanh.f32 %v1474_v21 }
 0xf04   :  { %v7599_v22 = vpop.eup %7598 }
 0xf05   :  { %v7601_v23 = vpop.eup %7600  ;;  %v1479_v24 = vadd.f32 1.0, %v7599_v22 }
 0xf06   :  { %v1478_v25 = vadd.f32 1.0, %v7601_v23 }
 0xf07   :  { %v1481_v26 = vmul.f32 0.5, %v1479_v24 }
 0xf08   :  { %v1480_v50 = vmul.f32 0.5, %v1478_v25  ;;  %v5817_v25 = vld [vmem:[%s9517_s5 + $0x1a8] ss:$0 sm:$0xff] }
 0xf09   :  { %v1483_v53 = vmul.f32 %v1481_v26, %v1463_v10  ;;  %v1632_v10 = vld [vmem:[%s9518_s6 + $0xe0] sm:$0xff] }
 0xf0a   :  { %v1482_v44 = vmul.f32 %v1480_v50, %v1458_v11  ;;  %v7044_v9 = vpack.c.bf16 %v1632_v10, %v1630_v6  ;;  %v1635_v11 = vld [vmem:[%s9518_s6 + $0xf8] sm:$0xff] }
 0xf0b   :  { %v7046_v13 = vpack.c.bf16 %v1637_v12, %v1635_v11 }
 0xf0c   :  { %6465 = vmatprep.mubr.f32.mxu0 %v1482_v44  ;;  %7045 = vmatpush1.bf16.msra.mxu1 %v7044_v9  ;;  %v5818_v44 = vld [vmem:[%s9517_s5 + $0x1b0] ss:$0 sm:$0xff] }
 0xf0d   :  { %6466 = vmatmul.mubr.f32.vlgmr.msra.gmra.mrb[16].mxu0 %v1483_v53  ;;  %7047 = vmatprep.subr.bf16.mxu1 %v7046_v13 }
 0xf10   :  { %7049 = vmatpush1.bf16.msra.mxu1 %v7048_v17 }
 0xfe0   :  { %v6467_v28 = vpop.f32.mrb[16].mxu0 }
 0xfe1   :  { %v1577_v29 = vadd.f32 %v6467_v28, %v5816_v27  ;;  %v1571_v30 = vpop.f32.mrb[17].mxu0 }
 0xfe2   :  { %v1572_v31 = vadd.f32 %v5816_v27, %v1571_v30  ;;  %v5819_v30 = vld [vmem:[%s9518_s6 + $0x110] ss:$8 sm:$0x3] }
 0xfe3   :  { %v8315_v35 = vadd.f32 %v1577_v29, %v8214_v56 }
 0xfe4   :  { %v8318_v36 = vadd.f32 %v1572_v31, %v8217_v57  ;;  %v1644_v31 = vrot.slane %v5819_v30, %v315_v34 }
 0xfe5   :  { %v1587_v38 = vsel %vm61_vm0, %v8315_v35, 0.0 }
 0xfe6   :  { %1588 = vadd.xlane.f32.xlu0 %v1587_v38  ;;  %v1584_v39 = vsel %vm61_vm0, %v8318_v36, 0.0 }
 0xfe7   :  { %1585 = vadd.xlane.f32.xlu1 %v1584_v39 }
0x1073   :  { %v1589_v40 = vpop.xlane.xlu0 %1588 }
0x1074   :  { %v1591_v43 = vmul.f32 0.015625, %v1589_v40  ;;  %v1586_v45 = vpop.xlane.xlu1 %1585 }
0x1075   :  { %v1590_v46 = vmul.f32 0.015625, %v1586_v45 }
0x1076   :  { %v1593_v47 = vsub.f32 %v8315_v35, %v1591_v43  ;;  %v1648_v43 = vrot.slane %v5819_v30, %v319_v37 }
0x1077   :  { %v1592_v56 = vsub.f32 %v8318_v36, %v1590_v46 }
0x1078   :  { %v1595_v48 = vmul.f32 %v1593_v47, %v1593_v47 }
0x1079   :  { %v1594_v49 = vmul.f32 %v1592_v56, %v1592_v56 }
0x107a   :  { %v1599_v57 = vsel %vm61_vm0, %v1595_v48, 0.0 }
0x107b   :  { %1600 = vadd.xlane.f32.xlu0 %v1599_v57  ;;  %v1596_v8 = vsel %vm61_vm0, %v1594_v49, 0.0 }
0x107c   :  { %1597 = vadd.xlane.f32.xlu1 %v1596_v8 }
0x1108   :  { %v1601_v18 = vpop.xlane.xlu0 %1600 }
0x1109   :  { %v1603_v19 = vmul.f32 0.015625, %v1601_v18  ;;  %v1598_v20 = vpop.xlane.xlu1 %1597 }
0x110a   :  { %v1602_v52 = vmul.f32 0.015625, %v1598_v20 }
0x110b   :  { %v1605_v21 = vadd.f32 1e-05, %v1603_v19 }
0x110c   :  { %v1604_v22 = vadd.f32 1e-05, %v1602_v52 }
0x110d   :  { %7602 = vrsqrt.f32 %v1605_v21 }
0x110e   :  { %7604 = vrsqrt.f32 %v1604_v22 }
0x1117   :  { %v7603_v23 = vpop.eup %7602 }
0x1118   :  { %v7605_v24 = vpop.eup %7604  ;;  %v1609_v50 = vmul.f32 %v7603_v23, %v1593_v47 }
0x1119   :  { %v1608_v26 = vmul.f32 %v7605_v24, %v1592_v56  ;;  %v8437_v24 = vld [vmem:[%s9517_s5 + $0x80] sm:$0xff] }
0x111a   :  { %v1615_v28 = vmul.f32 %v5817_v25, %v1609_v50  ;;  %v8443_v50 = vld [vmem:[%s9517_s5 + $0x78] sm:$0xff] }
0x111b   :  { %v1614_v53 = vmul.f32 %v5817_v25, %v1608_v26 }
0x111c   :  { %v1621_v29 = vadd.f32 %v5818_v44, %v1615_v28 }
0x111d   :  { %v1620_v27 = vadd.f32 %v5818_v44, %v1614_v53 }
0x111f   :  { %5820 = vmatmul.mubr.msk.f32.vlgmr.msra.gmra.mrb[14].mxu1 %vm61_vm0, %v1620_v27 }
0x1120   :  { %1727 = vmatprep.mubr.f32.mxu1 %v7828_v15 }
0x1123   :  { %5821 = vmatmul.mubr.msk.f32.gmra.mrb[16].mxu1 %vm61_vm0, %v1621_v29 }
0x11f2   :  { %v1723_v38 = vpop.f32.mrb[14].mxu1 }
0x11f3   :  { %v1724_v39 = vadd.f32 %v1723_v38, %v1644_v31  ;;  %v1725_v40 = vpop.f32.mrb[15].mxu1 }
0x11f4   :  { %v1726_v56 = vadd.f32 %v1725_v40, %v1648_v43 }
0x11f5   :  { %v8392_v45 = vmul.f32 0.25, %v1724_v39 }
0x11f6   :  { %v1729_v46 = vpop.f32.mrb[16].mxu1 }
0x11f7   :  { %v1730_v15 = vadd.f32 %v1729_v46, %v1644_v31  ;;  %v1731_v47 = vpop.f32.mrb[17].mxu1  ;;  %6472 = vmatprep.mubr.msk.f32.mxu1 %vm414_vm2, %v8392_v45 }
0x11f8   :  { %v1732_v48 = vadd.f32 %v1731_v47, %v1648_v43 }
0x11f9   :  { %v8396_v49 = vpack.i.bf16 %v1730_v15, %v1724_v39  ;;  %v8404_v33 = vmul.f32 0.25, %v1730_v15 }
0x11fa   :  { %v7056_v57 = vpack.c.bf16 %v1732_v48, %v1726_v56  ;;  %v8398_v34 = vpack.i.bf16 %v1732_v48, %v1726_v56 }
0x11fb   :  { %7402 = vrot.lane.b32.xlu1 %v8396_v49, %s7830_s29 }
0x11ff   :  { %7407 = vrot.lane.b32.xlu1 %v8396_v49, %s7829_s28 }
0x1203   :  { %1932 = vrot.lane.b32.xlu1 %v8404_v33, %s7831_s30 }
0x126d   :  { %v7403_v37 = vpop.permute.xlu1 %7402 }
0x126e   :  { %v7405_v8 = vunpack.i.h.bf16 %v7403_v37  ;;  %v7404_v51 = vunpack.i.l.bf16 %v7403_v37 }
0x1270   :  { %v7050_v54 = vpack.c.bf16 %v7405_v8, %v7404_v51 }
0x1271   :  { %v7408_v7 = vpop.permute.xlu1 %7407 }
0x1272   :  { %7052 = vmatprep.subr.msk.bf16.mxu1 %vm8072_vm3, %v7050_v54  ;;  %v7410_v55 = vunpack.i.h.bf16 %v7408_v7  ;;  %v7409_v58 = vunpack.i.l.bf16 %v7408_v7 }
0x1273   :  { %7055 = vmatpush3.bf16.xpose.msk.msra.mxu1 %vm8072_vm3, %v7050_v54 }
0x1274   :  { %7057 = vmatprep.subr.bf16.mxu1 %v7056_v57  ;;  %v7060_v59 = vpack.c.bf16 %v7410_v55, %v7409_v58 }
0x1275   :  { %v1933_v52 = vpop.permute.xlu1 %1932 }
0x127a   :  { %6473 = vmatmul.mubr.msk.f32.vlgmr.msra.gmra.mrb[18].mxu1 %vm414_vm2, %v8404_v33 }
0x127b   :  { %7059 = vmatpush3.bf16.msra.mxu1 %v7056_v57 }
0x127c   :  { %7062 = vmatprep.subr.msk.bf16.mxu1 %vm8072_vm3, %v7060_v59 }
0x134d   :  { %v6474_v61 = vpop.f32.mrb[18].mxu1 }
0x134e   :  { %v1818_v62 = vpop.f32.mrb[19].mxu1  ;;  %v1824_v0 = vadd.f32 %v6474_v61, %v8091_v1 }
0x134f   :  { %v1819_v63 = vadd.f32 %v1818_v62, %v8096_v2 }
0x1350   :  { %v1830_v42 = vsel %vm414_vm2, %v1824_v0, -inf }
0x1351   :  { %v1827_v3 = vsel %vm414_vm2, %v1819_v63, -inf }
0x1352   :  { %1828 = vmax.xlane.f32.xlu0 %v1827_v3 }
0x1356   :  { %1831 = vmax.xlane.f32.xlu0 %v1830_v42 }
0x13df   :  { %v1829_v4 = vpop.xlane.xlu0 %1828 }
0x13e0   :  { %v1833_v41 = vsub.f32 %v1819_v63, %v1829_v4 }
0x13e2   :  { %v1835_v5 = vmul.f32 1.442695, %v1833_v41 }
0x13e3   :  { %v1832_v6 = vpop.xlane.xlu0 %1831 }
0x13e4   :  { %7606 = vpow2.f32 %v1835_v5  ;;  %v1834_v10 = vsub.f32 %v1824_v0, %v1832_v6 }
0x13e6   :  { %v1837_v9 = vmul.f32 1.442695, %v1834_v10 }
0x13e8   :  { %7608 = vpow2.f32 %v1837_v9 }
0x13ee   :  { %v7607_v11 = vpop.eup %7606 }
0x13ef   :  { %v1839_v12 = vsel %vm414_vm2, %v7607_v11, 0.0 }
0x13f0   :  { %1840 = vadd.xlane.f32.xlu0 %v1839_v12 }
0x13f2   :  { %v7609_v2 = vpop.eup %7608 }
0x13f3   :  { %v1842_v1 = vsel %vm414_vm2, %v7609_v2, 0.0 }
0x13f4   :  { %1843 = vadd.xlane.f32.xlu0 %v1842_v1 }
0x140a   :  { %1930 = vrot.lane.b32.xlu0 %v8392_v45, %s7831_s30 }
0x147d   :  { %v1841_v13 = vpop.xlane.xlu0 %1840 }
0x147e   :  { %7610 = vrcp.f32 %v1841_v13 }
0x1481   :  { %v1844_v14 = vpop.xlane.xlu0 %1843 }
0x1482   :  { %7612 = vrcp.f32 %v1844_v14 }
0x1485   :  { %v1931_v20 = vpop.permute.xlu0 %1930 }
0x1488   :  { %v7611_v16 = vpop.eup %7610 }
0x1489   :  { %v1847_v17 = vmul.f32 %v7611_v16, %v7607_v11 }
0x148b   :  { %6479 = vmatprep.mubr.msk.f32.mxu1 %vm414_vm2, %v1847_v17 }
0x148c   :  { %v7613_v18 = vpop.eup %7612 }
0x148d   :  { %v1848_v19 = vmul.f32 %v7613_v18, %v7609_v2 }
0x148f   :  { %6480 = vmatmul.mubr.msk.f32.vlgmr.msra.gmra.mrb[20].mxu1 %vm414_vm2, %v1848_v19 }
0x1490   :  { %7065 = vmatpush3.bf16.xpose.msk.msra.mxu1 %vm8072_vm3, %v7060_v59  ;;  %6486 = vmatprep.mubr.msk.f32.mxu1 %vm414_vm2, %v1931_v20 }
0x1497   :  { %6487 = vmatmul.mubr.msk.f32.vlgmr.msra.gmra.mrb[22].mxu1 %vm414_vm2, %v1933_v52 }
0x1562   :  { %v8430_v21 = vpop.f32.mrb[20].mxu1 }
0x1563   :  { %v8432_v22 = vpop.f32.mrb[21].mxu1 }
0x156a   :  { %v6488_v23 = vpop.f32.mrb[22].mxu1 }
0x156b   :  { %v2018_v25 = vadd.f32 %v8437_v24, %v6488_v23  ;;  %v2012_v26 = vpop.f32.mrb[23].mxu1 }
0x156c   :  { %v2013_v44 = vadd.f32 %v8443_v50, %v2012_v26 }
0x156d   :  { %v2024_v53 = vsel %vm414_vm2, %v2018_v25, -inf }
0x156e   :  { %2025 = vmax.xlane.f32.xlu0 %v2024_v53  ;;  %v2021_v27 = vsel %vm414_vm2, %v2013_v44, -inf }
0x156f   :  { %2022 = vmax.xlane.f32.xlu1 %v2021_v27 }
0x1580   :  { %7412 = vrot.lane.b32.xlu1 %v8398_v34, %s7831_s30 }
0x1584   :  { %7417 = vrot.lane.b32.xlu0 %v8396_v49, %s7832_s14  ;;  %2132 = vrot.lane.b32.xlu1 %v8392_v45, %s7833_s15 }
0x15fb   :  { %v2026_v28 = vpop.xlane.xlu0 %2025 }
0x15fc   :  { %v2028_v29 = vsub.f32 %v2018_v25, %v2026_v28  ;;  %v2023_v30 = vpop.xlane.xlu1 %2022 }
0x15fd   :  { %v2027_v31 = vsub.f32 %v2013_v44, %v2023_v30 }
0x15fe   :  { %v2031_v38 = vmul.f32 1.442695, %v2028_v29 }
0x15ff   :  { %v2029_v39 = vmul.f32 1.442695, %v2027_v31  ;;  %v7418_v40 = vpop.permute.xlu0 %7417 }
0x1600   :  { %7614 = vpow2.f32 %v2031_v38  ;;  %v7413_v43 = vpop.permute.xlu1 %7412  ;;  %v7420_v46 = vunpack.i.h.bf16 %v7418_v40  ;;  %v7419_v15 = vunpack.i.l.bf16 %v7418_v40 }
0x1601   :  { %v7415_v47 = vunpack.i.h.bf16 %v7413_v43  ;;  %v7414_v56 = vunpack.i.l.bf16 %v7413_v43  ;;  %7616 = vpow2.f32 %v2029_v39 }
0x1602   :  { %v7070_v57 = vpack.c.bf16 %v7420_v46, %v7419_v15 }
0x1603   :  { %v7066_v48 = vpack.c.bf16 %v7415_v47, %v7414_v56 }
0x1604   :  { %v2133_v7 = vpop.permute.xlu1 %2132 }
0x1605   :  { %7067 = vmatprep.subr.bf16.mxu0 %v7066_v48 }
0x1606   :  { %7069 = vmatpush3.bf16.msra.mxu0 %v7066_v48 }
0x1607   :  { %7072 = vmatprep.subr.msk.bf16.mxu0 %vm8072_vm3, %v7070_v57 }
0x160a   :  { %v7615_v37 = vpop.eup %7614 }
0x160b   :  { %v2036_v8 = vsel %vm414_vm2, %v7615_v37, 0.0  ;;  %v7617_v51 = vpop.eup %7616 }
0x160c   :  { %2037 = vadd.xlane.f32.xlu1 %v2036_v8  ;;  %v2033_v54 = vsel %vm414_vm2, %v7617_v51, 0.0 }
0x1610   :  { %2034 = vadd.xlane.f32.xlu1 %v2033_v54 }
0x1621   :  { %2134 = vrot.lane.b32.xlu1 %v8404_v33, %s7833_s15 }
0x1699   :  { %v2038_v55 = vpop.xlane.xlu1 %2037 }
0x169a   :  { %7618 = vrcp.f32 %v2038_v55 }
0x169d   :  { %v2035_v58 = vpop.xlane.xlu1 %2034 }
0x169e   :  { %7620 = vrcp.f32 %v2035_v58 }
0x16a1   :  { %v2135_v0 = vpop.permute.xlu1 %2134 }
0x16a4   :  { %v7619_v59 = vpop.eup %7618 }
0x16a5   :  { %v2042_v63 = vmul.f32 %v7619_v59, %v7615_v37 }
0x16a8   :  { %v7621_v61 = vpop.eup %7620 }
0x16a9   :  { %v2041_v62 = vmul.f32 %v7621_v61, %v7617_v51 }
0x16ab   :  { %6493 = vmatprep.mubr.msk.f32.mxu0 %vm414_vm2, %v2041_v62 }
0x16ac   :  { %6494 = vmatmul.mubr.msk.f32.vlgmr.msra.gmra.mrb[18].mxu0 %vm414_vm2, %v2042_v63 }
0x16ad   :  { %7075 = vmatpush3.bf16.xpose.msk.msra.mxu0 %vm8072_vm3, %v7070_v57  ;;  %6500 = vmatprep.mubr.msk.f32.mxu0 %vm414_vm2, %v2133_v7 }
0x16b4   :  { %6501 = vmatmul.mubr.msk.f32.vlgmr.msra.gmra.mrb[20].mxu0 %vm414_vm2, %v2135_v0 }
0x177f   :  { %v8466_v3 = vpop.f32.mrb[18].mxu0 }
0x1780   :  { %v8468_v42 = vpop.f32.mrb[19].mxu0 }
0x1787   :  { %v6502_v4 = vpop.f32.mrb[20].mxu0 }
0x1788   :  { %v2220_v41 = vadd.f32 %v8437_v24, %v6502_v4  ;;  %v2214_v5 = vpop.f32.mrb[21].mxu0 }
0x1789   :  { %v2215_v6 = vadd.f32 %v8443_v50, %v2214_v5  ;;  %v2562_v5 = vld [vmem:[%s9517_s5 + $0x1b8] sm:$0xff] }
0x178a   :  { %v2226_v10 = vsel %vm414_vm2, %v2220_v41, -inf }
0x178b   :  { %2227 = vmax.xlane.f32.xlu0 %v2226_v10  ;;  %v2223_v9 = vsel %vm414_vm2, %v2215_v6, -inf }
0x178c   :  { %2224 = vmax.xlane.f32.xlu1 %v2223_v9  ;;  %v2565_v9 = vld [vmem:[%s9517_s5 + $0x1d0] sm:$0xff] }
0x179d   :  { %7422 = vrot.lane.b32.xlu1 %v8398_v34, %s7833_s15 }
0x17a1   :  { %2332 = vrot.lane.b32.xlu1 %v8392_v45, %s7835_s17 }
0x17a5   :  { %2334 = vrot.lane.b32.xlu1 %v8404_v33, %s7835_s17 }
0x1818   :  { %v2228_v11 = vpop.xlane.xlu0 %2227 }
0x1819   :  { %v2230_v12 = vsub.f32 %v2220_v41, %v2228_v11  ;;  %v2225_v2 = vpop.xlane.xlu1 %2224 }
0x181a   :  { %v2229_v1 = vsub.f32 %v2215_v6, %v2225_v2  ;;  %v2564_v6 = vld [vmem:[%s9517_s5 + $0x1c8] sm:$0xff]  ;;  %v2567_v2 = vld [vmem:[%s9517_s5 + $0x1e0] sm:$0xff] }
0x181b   :  { %v2233_v13 = vmul.f32 1.442695, %v2230_v12  ;;  %v7094_v11 = vpack.c.bf16 %v2565_v9, %v2564_v6  ;;  %v2566_v12 = vld [vmem:[%s9517_s5 + $0x1d8] sm:$0xff] }
0x181c   :  { %v2231_v14 = vmul.f32 1.442695, %v2229_v1  ;;  %v7098_v1 = vpack.c.bf16 %v2567_v2, %v2566_v12 }
0x181d   :  { %7622 = vpow2.f32 %v2233_v13  ;;  %v7423_v16 = vpop.permute.xlu1 %7422  ;;  %v2568_v13 = vld [vmem:[%s9517_s5 + $0x1e8] sm:$0xff] }
0x181e   :  { %v7425_v17 = vunpack.i.h.bf16 %v7423_v16  ;;  %v7424_v18 = vunpack.i.l.bf16 %v7423_v16  ;;  %7624 = vpow2.f32 %v2231_v14  ;;  %v2569_v14 = vld [vmem:[%s9517_s5 + $0x1f0] sm:$0xff] }
0x181f   :  { %v7102_v16 = vpack.c.bf16 %v2569_v14, %v2568_v13  ;;  %v2810_v14 = vld [vmem:[%s9517_s5 + $0x210] sm:$0xff] }
0x1820   :  { %v7076_v19 = vpack.c.bf16 %v7425_v17, %v7424_v18 }
0x1821   :  { %v2333_v38 = vpop.permute.xlu1 %2332 }
0x1822   :  { %7077 = vmatprep.subr.bf16.mxu1 %v7076_v19 }
0x1823   :  { %7079 = vmatpush3.bf16.msra.mxu1 %v7076_v19 }
0x1827   :  { %v7623_v20 = vpop.eup %7622 }
0x1828   :  { %v2238_v45 = vsel %vm414_vm2, %v7623_v20, 0.0  ;;  %v7625_v52 = vpop.eup %7624 }
0x1829   :  { %2239 = vadd.xlane.f32.xlu0 %v2238_v45  ;;  %v2235_v33 = vsel %vm414_vm2, %v7625_v52, 0.0 }
0x182d   :  { %2236 = vadd.xlane.f32.xlu0 %v2235_v33 }
0x1843   :  { %7427 = vrot.lane.b32.xlu0 %v8396_v49, %s7834_s16  ;;  %v2335_v49 = vpop.permute.xlu1 %2334 }
0x18b6   :  { %v2240_v23 = vpop.xlane.xlu0 %2239 }
0x18b7   :  { %7626 = vrcp.f32 %v2240_v23 }
0x18ba   :  { %v2237_v25 = vpop.xlane.xlu0 %2236 }
0x18bb   :  { %7628 = vrcp.f32 %v2237_v25 }
0x18be   :  { %v7428_v26 = vpop.permute.xlu0 %7427 }
0x18bf   :  { %v7430_v44 = vunpack.i.h.bf16 %v7428_v26  ;;  %v7429_v53 = vunpack.i.l.bf16 %v7428_v26 }
0x18c1   :  { %v7080_v27 = vpack.c.bf16 %v7430_v44, %v7429_v53  ;;  %v7627_v28 = vpop.eup %7626 }
0x18c2   :  { %v2244_v31 = vmul.f32 %v7627_v28, %v7623_v20 }
0x18c3   :  { %7082 = vmatprep.subr.msk.bf16.mxu1 %vm8072_vm3, %v7080_v27 }
0x18c5   :  { %v7629_v29 = vpop.eup %7628 }
0x18c6   :  { %v2243_v30 = vmul.f32 %v7629_v29, %v7625_v52 }
0x18c8   :  { %6507 = vmatprep.mubr.msk.f32.mxu1 %vm414_vm2, %v2243_v30 }
0x18c9   :  { %6508 = vmatmul.mubr.msk.f32.vlgmr.msra.gmra.mrb[24].mxu1 %vm414_vm2, %v2244_v31 }
0x18ca   :  { %7085 = vmatpush3.bf16.xpose.msk.msra.mxu1 %vm8072_vm3, %v7080_v27  ;;  %6514 = vmatprep.mubr.msk.f32.mxu1 %vm414_vm2, %v2333_v38 }
0x18d1   :  { %6515 = vmatmul.mubr.msk.f32.vlgmr.msra.gmra.mrb[26].mxu1 %vm414_vm2, %v2335_v49 }
0x199c   :  { %v6509_v39 = vpop.f32.mrb[24].mxu1 }
0x199d   :  { %v2323_v40 = vpop.f32.mrb[25].mxu1 }
0x19a4   :  { %v6516_v43 = vpop.f32.mrb[26].mxu1 }
0x19a5   :  { %v2420_v46 = vadd.f32 %v8437_v24, %v6516_v43  ;;  %v2414_v15 = vpop.f32.mrb[27].mxu1 }
0x19a6   :  { %v2415_v47 = vadd.f32 %v8443_v50, %v2414_v15 }
0x19a7   :  { %v2426_v56 = vsel %vm414_vm2, %v2420_v46, -inf }
0x19a8   :  { %2427 = vmax.xlane.f32.xlu0 %v2426_v56  ;;  %v2423_v48 = vsel %vm414_vm2, %v2415_v47, -inf }
0x19a9   :  { %2424 = vmax.xlane.f32.xlu1 %v2423_v48 }
0x19ba   :  { %7432 = vrot.lane.b32.xlu1 %v8398_v34, %s7835_s17 }
0x19be   :  { %2536 = vrot.lane.b32.xlu1 %v8466_v3, %s7834_s16 }
0x19c2   :  { %2542 = vrot.lane.b32.xlu1 %v2323_v40, %s7832_s14 }
0x19c6   :  { %2544 = vrot.lane.b32.xlu1 %v6509_v39, %s7832_s14  ;;  %s7843_s14 = smov 8  }
0x1a35   :  { %v2428_v60 = vpop.xlane.xlu0 %2427 }
0x1a36   :  { %v2430_v24 = vsub.f32 %v2420_v46, %v2428_v60  ;;  %v2425_v57 = vpop.xlane.xlu1 %2424 }
0x1a37   :  { %v2429_v50 = vsub.f32 %v2415_v47, %v2425_v57  ;;  %v2698_v57 = vld [vmem:[%s9519_s7 + $0x48] sm:$0xff] }
0x1a38   :  { %v2433_v37 = vmul.f32 1.442695, %v2430_v24 }
0x1a39   :  { %v2431_v8 = vmul.f32 1.442695, %v2429_v50  ;;  %v2699_v50 = vld [vmem:[%s9519_s7 + $0x50] sm:$0xff] }
0x1a3a   :  { %v7433_v51 = vpop.permute.xlu1 %7432 }
0x1a3b   :  { %7630 = vpow2.f32 %v2431_v8  ;;  %v7435_v54 = vunpack.i.h.bf16 %v7433_v51  ;;  %v7434_v7 = vunpack.i.l.bf16 %v7433_v51  ;;  %v2700_v8 = vld [vmem:[%s9519_s7 + $0x58] sm:$0xff]  ;;  %v2701_v51 = vld [vmem:[%s9519_s7 + $0x60] sm:$0xff] }
0x1a3c   :  { %7632 = vpow2.f32 %v2433_v37  ;;  %v7106_v37 = vpack.c.bf16 %v2699_v50, %v2698_v57 }
0x1a3d   :  { %v7086_v55 = vpack.c.bf16 %v7435_v54, %v7434_v7  ;;  %v2702_v54 = vld [vmem:[%s9519_s7 + $0x68] sm:$0xff]  ;;  %v7110_v7 = vpack.c.bf16 %v2701_v51, %v2700_v8 }
0x1a3e   :  { %v2537_v19 = vpop.permute.xlu1 %2536  ;;  %7107 = vmatprep.subr.bf16.mxu1 %v7106_v37 }
0x1a3f   :  { %7087 = vmatprep.subr.bf16.mxu0 %v7086_v55  ;;  %v2557_v25 = vsel %vm414_vm2, %v8430_v21, %v2537_v19  ;;  %7109 = vmatpush3.bf16.msra.mxu1 %v7106_v37  ;;  %v2813_v19 = vld [vmem:[%s9517_s5 + $0x228] sm:$0xff] }
0x1a40   :  { %7089 = vmatpush3.bf16.msra.mxu0 %v7086_v55  ;;  %v2703_v55 = vld [vmem:[%s9519_s7 + $0x70] sm:$0xff]  ;;  %7111 = vmatprep.subr.bf16.mxu1 %v7110_v7 }
0x1a42   :  { %v2543_v20 = vpop.permute.xlu1 %2542 }
0x1a43   :  { %7113 = vmatpush3.bf16.msra.mxu1 %v7110_v7 }
0x1a45   :  { %v7631_v34 = vpop.eup %7630 }
0x1a46   :  { %v2435_v58 = vsel %vm414_vm2, %v7631_v34, 0.0  ;;  %v7633_v59 = vpop.eup %7632  ;;  %v2545_v52 = vpop.permute.xlu1 %2544 }
0x1a47   :  { %2436 = vadd.xlane.f32.xlu0 %v2435_v58  ;;  %v2438_v61 = vsel %vm414_vm2, %v7633_v59, 0.0  ;;  %v2559_v53 = vsel %vm171_vm1, %v2557_v25, %v2545_v52  ;;  %v2704_v58 = vld [vmem:[%s9519_s7 + $0x78] sm:$0xff]  ;;  %v2817_v25 = vld [vmem:[%s9517_s5 + $0x248] sm:$0xff] }
0x1a48   :  { %v2815_v52 = vld [vmem:[%s9517_s5 + $0x238] sm:$0xff] }
0x1a4b   :  { %2439 = vadd.xlane.f32.xlu0 %v2438_v61 }
0x1a61   :  { %2534 = vrot.lane.b32.xlu0 %v8468_v42, %s7834_s16  ;;  %v2563_v42 = vld [vmem:[%s9517_s5 + $0x1c0] sm:$0xff] }
0x1a62   :  { %v7090_v10 = vpack.c.bf16 %v2563_v42, %v2562_v5  ;;  %v5849_v42 = vld [vmem:[%s9517_s5 + $0x200] ss:$0 sm:$0xff] }
0x1a64   :  { %7091 = vmatprep.subr.bf16.mxu0 %v7090_v10 }
0x1ad4   :  { %v2437_v62 = vpop.xlane.xlu0 %2436 }
0x1ad5   :  { %7634 = vrcp.f32 %v2437_v62 }
0x1ad8   :  { %v2440_v63 = vpop.xlane.xlu0 %2439 }
0x1ad9   :  { %7636 = vrcp.f32 %v2440_v63 }
0x1adc   :  { %v2535_v45 = vpop.permute.xlu0 %2534 }
0x1add   :  { %v2556_v33 = vsel %vm414_vm2, %v8432_v22, %v2535_v45  ;;  %v5846_v22 = vld [vmem:[%s9517_s5 + $0x1f8] ss:$0 sm:$0xff]  ;;  %v2814_v45 = vld [vmem:[%s9517_s5 + $0x230] sm:$0xff] }
0x1ade   :  { %v2558_v26 = vsel %vm171_vm1, %v2556_v33, %v2543_v20  ;;  %v7130_v33 = vpack.c.bf16 %v2815_v52, %v2814_v45  ;;  %v2950_v45 = vld [vmem:[%s9521_s9 + $0x10] sm:$0xff]  ;;  %v2951_v52 = vld [vmem:[%s9521_s9 + $0x18] sm:$0xff] }
0x1adf   :  { %v7635_v0 = vpop.eup %7634 }
0x1ae0   :  { %v2443_v3 = vmul.f32 %v7635_v0, %v7631_v34  ;;  %v7114_v34 = vpack.c.bf16 %v2703_v55, %v2702_v54 }
0x1ae2   :  { %6521 = vmatprep.mubr.msk.f32.mxu0 %vm414_vm2, %v2443_v3  ;;  %7115 = vmatprep.subr.bf16.mxu1 %v7114_v34 }
0x1ae3   :  { %v7637_v4 = vpop.eup %7636  ;;  %7117 = vmatpush3.bf16.msra.mxu1 %v7114_v34 }
0x1ae4   :  { %v2444_v41 = vmul.f32 %v7637_v4, %v7633_v59  ;;  %v2705_v59 = vld [vmem:[%s9519_s7 + $0x80] sm:$0xff] }
0x1ae5   :  { %v7118_v61 = vpack.c.bf16 %v2705_v59, %v2704_v58 }
0x1ae6   :  { %6522 = vmatmul.mubr.msk.f32.vlgmr.msra.gmra.mrb[22].mxu0 %vm414_vm2, %v2444_v41 }
0x1ae7   :  { %7093 = vmatpush3.bf16.msra.mxu0 %v7090_v10  ;;  %7119 = vmatprep.subr.bf16.mxu1 %v7118_v61  ;;  %v5850_v10 = vld [vmem:[%s9517_s5 + $0x208] ss:$0 sm:$0xff] }
0x1ae8   :  { %7095 = vmatprep.subr.bf16.mxu0 %v7094_v11  ;;  %7121 = vmatpush3.bf16.msra.mxu1 %v7118_v61 }
0x1aeb   :  { %7097 = vmatpush3.bf16.msra.mxu0 %v7094_v11 }
0x1aec   :  { %7099 = vmatprep.subr.bf16.mxu0 %v7098_v1 }
0x1aef   :  { %7101 = vmatpush3.bf16.msra.mxu0 %v7098_v1 }
0x1af0   :  { %7103 = vmatprep.subr.bf16.mxu0 %v7102_v16 }
0x1af3   :  { %7105 = vmatpush3.bf16.msra.mxu0 %v7102_v16  ;;  %v2811_v16 = vld [vmem:[%s9517_s5 + $0x218] sm:$0xff] }
0x1bb9   :  { %v6523_v17 = vpop.f32.mrb[22].mxu0 }
0x1bba   :  { %2552 = vrot.lane.b32.xlu1 %v6523_v17, %s7829_s28  ;;  %v2523_v18 = vpop.f32.mrb[23].mxu0  ;;  %v7122_v17 = vpack.c.bf16 %v2811_v16, %v2810_v14 }
0x1bbb   :  { %2550 = vrot.lane.b32.xlu0 %v2523_v18, %s7829_s28  ;;  %v2812_v18 = vld [vmem:[%s9517_s5 + $0x220] sm:$0xff] }
0x1bbc   :  { %7123 = vmatprep.subr.bf16.mxu0 %v7122_v17  ;;  %v7126_v20 = vpack.c.bf16 %v2813_v19, %v2812_v18  ;;  %v2949_v19 = vld [vmem:[%s9521_s9 + $0x8] sm:$0xff] }
0x1c2c   :  { %v2553_v23 = vpop.permute.xlu1 %2552 }
0x1c2d   :  { %v2551_v44 = vpop.permute.xlu0 %2550  ;;  %v2561_v28 = vsel %vm1233_vm4, %v2559_v53, %v2553_v23  ;;  %v2816_v23 = vld [vmem:[%s9517_s5 + $0x240] sm:$0xff]  ;;  %v2819_v53 = vld [vmem:[%s9517_s5 + $0x258] sm:$0xff] }
0x1c2e   :  { %v2560_v27 = vsel %vm1233_vm4, %v2558_v26, %v2551_v44  ;;  %v7134_v26 = vpack.c.bf16 %v2817_v25, %v2816_v23  ;;  %v2818_v44 = vld [vmem:[%s9517_s5 + $0x250] sm:$0xff]  ;;  %v2952_v23 = vld [vmem:[%s9521_s9 + $0x20] sm:$0xff]  ;;  %v2953_v25 = vld [vmem:[%s9521_s9 + $0x28] sm:$0xff] }
0x1c2f   :  { %6540 = vmatprep.mubr.msk.f32.mxu0 %vm61_vm0, %v2560_v27  ;;  %v2820_v27 = vld [vmem:[%s9517_s5 + $0x260] sm:$0xff] }
0x1c30   :  { %6541 = vmatmul.mubr.msk.f32.vlgmr.msra.gmra.mrb[24].mxu0 %vm61_vm0, %v2561_v28  ;;  %v7138_v28 = vpack.c.bf16 %v2819_v53, %v2818_v44  ;;  %v2954_v44 = vld [vmem:[%s9521_s9 + $0x30] sm:$0xff]  ;;  %v2955_v53 = vld [vmem:[%s9521_s9 + $0x38] sm:$0xff] }
0x1c31   :  { %7125 = vmatpush3.bf16.msra.mxu0 %v7122_v17 }
0x1c32   :  { %7127 = vmatprep.subr.bf16.mxu0 %v7126_v20 }
0x1c35   :  { %7129 = vmatpush3.bf16.msra.mxu0 %v7126_v20 }
0x1c36   :  { %7131 = vmatprep.subr.bf16.mxu0 %v7130_v33 }
0x1c39   :  { %7133 = vmatpush3.bf16.msra.mxu0 %v7130_v33  ;;  %v7158_v33 = vpack.c.bf16 %v2951_v52, %v2950_v45 }
0x1c3a   :  { %7135 = vmatprep.subr.bf16.mxu0 %v7134_v26 }
0x1c3d   :  { %7137 = vmatpush3.bf16.msra.mxu0 %v7134_v26  ;;  %v7162_v26 = vpack.c.bf16 %v2953_v25, %v2952_v23 }
0x1c3e   :  { %7139 = vmatprep.subr.bf16.mxu0 %v7138_v28 }
0x1c41   :  { %7141 = vmatpush3.bf16.msra.mxu0 %v7138_v28 }
0x1d03   :  { %v6542_v29 = vpop.f32.mrb[24].mxu0 }
0x1d04   :  { %v2653_v30 = vadd.f32 %v6542_v29, %v5846_v22  ;;  %v2647_v21 = vpop.f32.mrb[25].mxu0 }
0x1d05   :  { %v2648_v31 = vadd.f32 %v5846_v22, %v2647_v21  ;;  %v2821_v22 = vld [vmem:[%s9517_s5 + $0x268] sm:$0xff]  ;;  %v2823_v21 = vld [vmem:[%s9517_s5 + $0x278] sm:$0xff] }
0x1d06   :  { %v8548_v38 = vadd.f32 %v2653_v30, %v8315_v35  ;;  %v7142_v29 = vpack.c.bf16 %v2821_v22, %v2820_v27  ;;  %v2822_v30 = vld [vmem:[%s9517_s5 + $0x270] sm:$0xff]  ;;  %v7166_v27 = vpack.c.bf16 %v2955_v53, %v2954_v44  ;;  %v3211_v53 = vld [vmem:[%s9521_s9 + $0x68] sm:$0xff] }
0x1d07   :  { %v8551_v49 = vadd.f32 %v2648_v31, %v8318_v36  ;;  %v7146_v31 = vpack.c.bf16 %v2823_v21, %v2822_v30 }
0x1d08   :  { %v2663_v39 = vsel %vm61_vm0, %v8548_v38, 0.0  ;;  %7143 = vmatprep.subr.bf16.mxu0 %v7142_v29 }
0x1d09   :  { %2664 = vadd.xlane.f32.xlu1 %v2663_v39  ;;  %v2660_v40 = vsel %vm61_vm0, %v8551_v49, 0.0  ;;  %v2824_v39 = vld [vmem:[%s9517_s5 + $0x280] sm:$0xff]  ;;  %7145 = vmatpush3.bf16.msra.mxu0 %v7142_v29 }
0x1d0a   :  { %2661 = vadd.xlane.f32.xlu0 %v2660_v40  ;;  %v2825_v40 = vld [vmem:[%s9517_s5 + $0x288] sm:$0xff]  ;;  %7147 = vmatprep.subr.bf16.mxu0 %v7146_v31 }
0x1d0d   :  { %7149 = vmatpush3.bf16.msra.mxu0 %v7146_v31 }
0x1d96   :  { %v2665_v43 = vpop.xlane.xlu1 %2664 }
0x1d97   :  { %v2667_v46 = vmul.f32 0.015625, %v2665_v43  ;;  %v2662_v15 = vpop.xlane.xlu0 %2661  ;;  %v7150_v43 = vpack.c.bf16 %v2825_v40, %v2824_v39  ;;  %v5855_v40 = vld [vmem:[%s9517_s5 + $0x298] ss:$0 sm:$0xff] }
0x1d98   :  { %v2666_v47 = vmul.f32 0.015625, %v2662_v15 }
0x1d99   :  { %v2669_v56 = vsub.f32 %v8548_v38, %v2667_v46  ;;  %7151 = vmatprep.subr.bf16.mxu0 %v7150_v43  ;;  %v5851_v46 = vld [vmem:[%s9519_s7 + $0x88] ss:$0 sm:$0xff] }
0x1d9a   :  { %v2668_v35 = vsub.f32 %v8551_v49, %v2666_v47  ;;  %7153 = vmatpush3.bf16.msra.mxu0 %v7150_v43 }
0x1d9b   :  { %v2671_v60 = vmul.f32 %v2669_v56, %v2669_v56 }
0x1d9c   :  { %v2670_v48 = vmul.f32 %v2668_v35, %v2668_v35 }
0x1d9d   :  { %v2675_v24 = vsel %vm61_vm0, %v2671_v60, 0.0 }
0x1d9e   :  { %v2672_v36 = vsel %vm61_vm0, %v2670_v48, 0.0 }
0x1d9f   :  { %2673 = vadd.xlane.f32.xlu0 %v2672_v36 }
0x1da3   :  { %2676 = vadd.xlane.f32.xlu0 %v2675_v24 }
0x1e2c   :  { %v2674_v62 = vpop.xlane.xlu0 %2673 }
0x1e2d   :  { %v2678_v63 = vmul.f32 0.015625, %v2674_v62 }
0x1e2f   :  { %v2680_v0 = vadd.f32 1e-05, %v2678_v63 }
0x1e30   :  { %v2677_v3 = vpop.xlane.xlu0 %2676 }
0x1e31   :  { %7638 = vrsqrt.f32 %v2680_v0  ;;  %v2679_v4 = vmul.f32 0.015625, %v2677_v3  ;;  %v5854_v0 = vld [vmem:[%s9517_s5 + $0x290] ss:$0 sm:$0xff] }
0x1e33   :  { %v2681_v41 = vadd.f32 1e-05, %v2679_v4 }
0x1e35   :  { %7640 = vrsqrt.f32 %v2681_v41 }
0x1e3b   :  { %v7639_v5 = vpop.eup %7638 }
0x1e3c   :  { %v2684_v6 = vmul.f32 %v7639_v5, %v2668_v35 }
0x1e3e   :  { %v2690_v9 = vmul.f32 %v5849_v42, %v2684_v6 }
0x1e3f   :  { %v7641_v11 = vpop.eup %7640 }
0x1e40   :  { %v2685_v12 = vmul.f32 %v7641_v11, %v2669_v56  ;;  %v2696_v2 = vadd.f32 %v5850_v10, %v2690_v9 }
0x1e42   :  { %v2691_v1 = vmul.f32 %v5849_v42, %v2685_v12  ;;  %6559 = vmatprep.mubr.msk.f32.mxu1 %vm61_vm0, %v2696_v2 }
0x1e44   :  { %v2697_v13 = vadd.f32 %v5850_v10, %v2691_v1 }
0x1e46   :  { %6560 = vmatmul.mubr.msk.f32.vlgmr.msra.gmra.mrb[28].mxu1 %vm61_vm0, %v2697_v13 }
0x1f19   :  { %v6561_v15 = vpop.f32.mrb[28].mxu1 }
0x1f1a   :  { %v2789_v47 = vadd.f32 %v6561_v15, %v5851_v46  ;;  %v2783_v56 = vpop.f32.mrb[29].mxu1 }
0x1f1b   :  { %v2784_v35 = vadd.f32 %v5851_v46, %v2783_v56 }
0x1f1c   :  { %v2793_v48 = vmul.f32 %v2789_v47, %v2789_v47 }
0x1f1d   :  { %v2792_v36 = vmul.f32 %v2784_v35, %v2784_v35 }
0x1f1e   :  { %v2795_v60 = vmul.f32 %v2793_v48, %v2789_v47 }
0x1f1f   :  { %v2794_v24 = vmul.f32 %v2792_v36, %v2784_v35 }
0x1f20   :  { %v2797_v57 = vmul.f32 0.044715, %v2795_v60  ;;  %v3048_v60 = vld [vmem:[%s9515_s3] sm:$0xff] }
0x1f21   :  { %v2796_v50 = vmul.f32 0.044715, %v2794_v24  ;;  %v3043_v24 = vld [vmem:[%s9516_s4 + $0x8] sm:$0xff] }
0x1f22   :  { %v2799_v37 = vadd.f32 %v2797_v57, %v2789_v47  ;;  %v7836_v57 = vmov 0  }
0x1f23   :  { %v2798_v8 = vadd.f32 %v2796_v50, %v2784_v35  ;;  %7437 = vset.pattern.permute.xlu1 %v7836_v57  ;;  %7436 = vset.pattern.permute.xlu0 %v7836_v57  ;;  %v3042_v50 = vld [vmem:[%s9516_s4] sm:$0xff] }
0x1f24   :  { %v2801_v51 = vmul.f32 0.7978846, %v2799_v37  ;;  %v3044_v37 = vld [vmem:[%s9516_s4 + $0x10] sm:$0xff] }
0x1f25   :  { %v2800_v54 = vmul.f32 0.7978846, %v2798_v8  ;;  %v3045_v8 = vld [vmem:[%s9516_s4 + $0x18] sm:$0xff] }
0x1f26   :  { %7642 = vtanh.f32 %v2801_v51  ;;  %v3046_v51 = vld [vmem:[%s9516_s4 + $0x20] sm:$0xff] }
0x1f27   :  { %7644 = vtanh.f32 %v2800_v54  ;;  %v3047_v54 = vld [vmem:[%s9516_s4 + $0x28] sm:$0xff] }
0x1f30   :  { %v7643_v7 = vpop.eup %7642 }
0x1f31   :  { %v7645_v55 = vpop.eup %7644  ;;  %v2805_v34 = vadd.f32 1.0, %v7643_v7  ;;  %v5857_v7 = vld [vmem:[%s9521_s9 + $0x40] ss:$0 sm:$0xff] }
0x1f32   :  { %v2804_v58 = vadd.f32 1.0, %v7645_v55 }
0x1f33   :  { %v2807_v59 = vmul.f32 0.5, %v2805_v34 }
0x1f34   :  { %v2806_v61 = vmul.f32 0.5, %v2804_v58 }
0x1f35   :  { %v2809_v63 = vmul.f32 %v2807_v59, %v2789_v47  ;;  %v5856_v47 = vld [vmem:[%s9517_s5 + $0x2a0] ss:$0 sm:$0xff] }
0x1f36   :  { %v2808_v62 = vmul.f32 %v2806_v61, %v2784_v35 }
0x1f38   :  { %6594 = vmatprep.mubr.f32.mxu0 %v2808_v62  ;;  %v3049_v62 = vld [vmem:[%s9515_s3 + $0x8] sm:$0xff] }
0x1f39   :  { %6595 = vmatmul.mubr.f32.vlgmr.msra.gmra.mrb[26].mxu0 %v2809_v63  ;;  %v3050_v63 = vld [vmem:[%s9515_s3 + $0x10] sm:$0xff] }
0x200c   :  { %v6596_v3 = vpop.f32.mrb[26].mxu0 }
0x200d   :  { %v2903_v4 = vadd.f32 %v6596_v3, %v5854_v0  ;;  %v2897_v41 = vpop.f32.mrb[27].mxu0  ;;  %v3052_v3 = vld [vmem:[%s9515_s3 + $0x20] sm:$0xff] }
0x200e   :  { %v2898_v5 = vadd.f32 %v5854_v0, %v2897_v41  ;;  %v3051_v0 = vld [vmem:[%s9515_s3 + $0x18] sm:$0xff] }
0x200f   :  { %v2907_v42 = vadd.f32 %v2903_v4, %v8548_v38  ;;  %v3053_v4 = vld [vmem:[%s9515_s3 + $0x28] sm:$0xff]  ;;  %s7845_s3 = smov [#allocation2]  }
0x2010   :  { %v2906_v6 = vadd.f32 %v2898_v5, %v8551_v49  ;;  %v2948_v49 = vld [vmem:[%s9521_s9] sm:$0xff] }
0x2011   :  { %v2913_v10 = vsel %vm61_vm0, %v2907_v42, 0.0  ;;  %v7154_v20 = vpack.c.bf16 %v2949_v19, %v2948_v49 }
0x2012   :  { %2914 = vadd.xlane.f32.xlu1 %v2913_v10  ;;  %v2910_v9 = vsel %vm61_vm0, %v2906_v6, 0.0 }
0x2013   :  { %2911 = vadd.xlane.f32.xlu0 %v2910_v9  ;;  %7155 = vmatprep.subr.bf16.mxu1 %v7154_v20 }
0x2014   :  { %7157 = vmatpush3.bf16.msra.mxu1 %v7154_v20 }
0x2015   :  { %7159 = vmatprep.subr.bf16.mxu1 %v7158_v33 }
0x2018   :  { %7161 = vmatpush3.bf16.msra.mxu1 %v7158_v33  ;;  %v3210_v33 = vld [vmem:[%s9521_s9 + $0x60] sm:$0xff] }
0x2019   :  { %7163 = vmatprep.subr.bf16.mxu1 %v7162_v26 }
0x201c   :  { %7165 = vmatpush3.bf16.msra.mxu1 %v7162_v26 }
0x201d   :  { %7167 = vmatprep.subr.bf16.mxu1 %v7166_v27 }
0x2020   :  { %7169 = vmatpush3.bf16.msra.mxu1 %v7166_v27 }
0x209f   :  { %v2915_v11 = vpop.xlane.xlu1 %2914 }
0x20a0   :  { %v2917_v12 = vmul.f32 0.015625, %v2915_v11  ;;  %v2912_v2 = vpop.xlane.xlu0 %2911 }
0x20a1   :  { %v2916_v1 = vmul.f32 0.015625, %v2912_v2 }
0x20a2   :  { %v2919_v13 = vsub.f32 %v2907_v42, %v2917_v12 }
0x20a3   :  { %v2918_v14 = vsub.f32 %v2906_v6, %v2916_v1  ;;  %v5860_v6 = vld [vmem:[%s9521_s9 + $0x48] ss:$0 sm:$0xff]  ;;  %v3209_v1 = vld [vmem:[%s9521_s9 + $0x58] sm:$0xff] }
0x20a4   :  { %v2921_v16 = vmul.f32 %v2919_v13, %v2919_v13 }
0x20a5   :  { %v2920_v17 = vmul.f32 %v2918_v14, %v2918_v14 }
0x20a6   :  { %v2925_v18 = vsel %vm61_vm0, %v2921_v16, 0.0  ;;  %v3208_v16 = vld [vmem:[%s9521_s9 + $0x50] sm:$0xff] }
0x20a7   :  { %2926 = vadd.xlane.f32.xlu1 %v2925_v18  ;;  %v2922_v38 = vsel %vm61_vm0, %v2920_v17, 0.0 }
0x20a8   :  { %2923 = vadd.xlane.f32.xlu0 %v2922_v38 }
0x20b8   :  { %3062 = vperm.xlu1 %7437, %v3043_v24  }
0x20bc   :  { %3067 = vperm.xlu1 %7437, %v3044_v37  }
0x20be   :  { %3057 = vperm.xlu0 %7436, %v3042_v50  }
0x20c0   :  { %3072 = vperm.xlu1 %7437, %v3045_v8  }
0x20c4   :  { %3077 = vperm.xlu1 %7437, %v3046_v51  }
0x20c8   :  { %3082 = vperm.xlu1 %7437, %v3047_v54  }
0x2134   :  { %v2927_v28 = vpop.xlane.xlu1 %2926 }
0x2135   :  { %v2929_v22 = vmul.f32 0.015625, %v2927_v28  ;;  %v2924_v29 = vpop.xlane.xlu0 %2923 }
0x2136   :  { %v2928_v30 = vmul.f32 0.015625, %v2924_v29 }
0x2137   :  { %v2931_v21 = vadd.f32 1e-05, %v2929_v22 }
0x2138   :  { %v2930_v31 = vadd.f32 1e-05, %v2928_v30  ;;  %v3063_v41 = vpop.permute.xlu1 %3062 }
0x2139   :  { %7646 = vrsqrt.f32 %v2931_v21  ;;  %v3090_v9 = vmul.f32 %v5860_v6, %v3063_v41  ;;  %v3212_v21 = vld [vmem:[%s9521_s9 + $0x70] sm:$0xff] }
0x213a   :  { %7648 = vrsqrt.f32 %v2930_v31 }
0x213c   :  { %v3068_v5 = vpop.permute.xlu1 %3067 }
0x213d   :  { %v3058_v10 = vpop.permute.xlu0 %3057  ;;  %v3091_v38 = vmul.f32 %v5860_v6, %v3068_v5 }
0x213e   :  { %v3089_v11 = vmul.f32 %v5860_v6, %v3058_v10 }
0x2140   :  { %v3073_v42 = vpop.permute.xlu1 %3072 }
0x2141   :  { %v3092_v49 = vmul.f32 %v5860_v6, %v3073_v42 }
0x2143   :  { %v7647_v39 = vpop.eup %7646 }
0x2144   :  { %v7649_v43 = vpop.eup %7648  ;;  %v2935_v46 = vmul.f32 %v7647_v39, %v2919_v13  ;;  %v3078_v12 = vpop.permute.xlu1 %3077 }
0x2145   :  { %v2934_v15 = vmul.f32 %v7649_v43, %v2918_v14  ;;  %v3093_v27 = vmul.f32 %v5860_v6, %v3078_v12 }
0x2146   :  { %v2941_v56 = vmul.f32 %v5855_v40, %v2935_v46  ;;  %v3213_v46 = vld [vmem:[%s9521_s9 + $0x78] sm:$0xff] }
0x2147   :  { %v2940_v35 = vmul.f32 %v5855_v40, %v2934_v15 }
0x2148   :  { %v2947_v36 = vadd.f32 %v5856_v47, %v2941_v56  ;;  %v3083_v45 = vpop.permute.xlu1 %3082 }
0x2149   :  { %v2946_v48 = vadd.f32 %v5856_v47, %v2940_v35  ;;  %v3094_v28 = vmul.f32 %v5860_v6, %v3083_v45 }
0x214b   :  { %6613 = vmatprep.mubr.msk.f32.mxu1 %vm61_vm0, %v2946_v48 }
0x214c   :  { %6614 = vmatmul.mubr.msk.f32.vlgmr.msra.gmra.mrb[30].mxu1 %vm61_vm0, %v2947_v36 }
0x214d   :  { %6620 = vmatprep.mubr.msk.f32.mxu1 %vm414_vm2, %v3048_v60 }
0x221f   :  { %v6615_v55 = vpop.f32.mrb[30].mxu1 }
0x2220   :  { %v3039_v34 = vadd.f32 %v6615_v55, %v5857_v7  ;;  %v3033_v58 = vpop.f32.mrb[31].mxu1 }
0x2221   :  { %v3034_v59 = vadd.f32 %v5857_v7, %v3033_v58 }
0x2223   :  { %v7170_v61 = vpack.c.bf16 %v3039_v34, %v3034_v59 }
0x2225   :  { %7171 = vmatprep.subr.bf16.mxu1 %v7170_v61 }
0x2226   :  { %7173 = vmatpush3.bf16.msra.mxu1 %v7170_v61 }
0x2229   :  { %6621 = vmatmul.mubr.msk.f32.vlgmr.msra.gmra.mrb[32].mxu1 %vm414_vm2, %v3049_v62 }
0x222a   :  { %6623 = vmatprep.mubr.msk.f32.mxu1 %vm414_vm2, %v3050_v63 }
0x222d   :  { %6624 = vmatmul.mubr.msk.f32.gmra.mrb[34].mxu1 %vm414_vm2, %v3051_v0 }
0x222e   :  { %6626 = vmatprep.mubr.msk.f32.mxu1 %vm414_vm2, %v3052_v3 }
0x2231   :  { %6627 = vmatmul.mubr.msk.f32.gmra.mrb[36].mxu1 %vm414_vm2, %v3053_v4 }
0x22fc   :  { %v6622_v2 = vpop.f32.mrb[32].mxu1 }
0x22fd   :  { %v3185_v13 = vadd.f32 %v6622_v2, %v3090_v9  ;;  %v3179_v14 = vpop.f32.mrb[33].mxu1 }
0x22fe   :  { %v3180_v17 = vadd.f32 %v3179_v14, %v3089_v11  ;;  %v3322_v14 = vld [vmem:[%s9520_s8 + $0x8] sm:$0xff] }
0x22ff   :  { %v8739_v18 = vadd.f32 %v3209_v1, %v3185_v13  ;;  %v3321_v13 = vld [vmem:[%s9520_s8] sm:$0xff] }
0x2300   :  { %v8741_v19 = vadd.f32 %v3208_v16, %v3180_v17  ;;  %v6625_v20 = vpop.f32.mrb[34].mxu1  ;;  %v7174_v16 = vpack.c.bf16 %v3322_v14, %v3321_v13  ;;  %v3323_v17 = vld [vmem:[%s9520_s8 + $0x10] sm:$0xff] }
0x2301   :  { %v3189_v52 = vpop.f32.mrb[35].mxu1  ;;  %v3225_v23 = vsel %vm171_vm1, %v8739_v18, 0.0  ;;  %v3195_v25 = vadd.f32 %v6625_v20, %v3092_v49 }
0x2302   :  { %v3190_v26 = vadd.f32 %v3189_v52, %v3091_v38  ;;  %3226 = vadd.xlane.f32.xlu0 %v3225_v23  ;;  %v3222_v44 = vsel %vm171_vm1, %v8741_v19, 0.0  ;;  %7175 = vmatprep.subr.bf16.mxu1 %v7174_v16  ;;  %v3324_v38 = vld [vmem:[%s9520_s8 + $0x18] sm:$0xff] }
0x2303   :  { %3223 = vadd.xlane.f32.xlu1 %v3222_v44  ;;  %v8758_v31 = vadd.f32 %v3211_v53, %v3195_v25  ;;  %7177 = vmatpush3.bf16.msra.mxu1 %v7174_v16  ;;  %v7178_v49 = vpack.c.bf16 %v3324_v38, %v3323_v17 }
0x2304   :  { %v8753_v22 = vadd.f32 %v3210_v33, %v3190_v26  ;;  %v6628_v29 = vpop.f32.mrb[36].mxu1 }
0x2305   :  { %v3199_v30 = vpop.f32.mrb[37].mxu1  ;;  %v3205_v39 = vadd.f32 %v6628_v29, %v3094_v28  ;;  %v3231_v35 = vsel %vm171_vm1, %v8758_v31, 0.0  ;;  %7179 = vmatprep.subr.bf16.mxu1 %v7178_v49 }
0x2306   :  { %v3200_v40 = vadd.f32 %v3199_v30, %v3093_v27  ;;  %v3228_v43 = vsel %vm171_vm1, %v8753_v22, 0.0 }
0x2307   :  { %3229 = vadd.xlane.f32.xlu1 %v3228_v43  ;;  %v8767_v47 = vadd.f32 %v3213_v46, %v3205_v39  ;;  %7181 = vmatpush3.bf16.msra.mxu1 %v7178_v49 }
0x2308   :  { %v8765_v15 = vadd.f32 %v3212_v21, %v3200_v40 }
0x2309   :  { %v3237_v48 = vsel %vm171_vm1, %v8767_v47, 0.0 }
0x230a   :  { %v3234_v56 = vsel %vm171_vm1, %v8765_v15, 0.0 }
0x230b   :  { %3235 = vadd.xlane.f32.xlu0 %v3234_v56  ;;  %3232 = vadd.xlane.f32.xlu1 %v3231_v35  ;;  %v5867_v56 = vld [vmem:[%s9521_s9 + $0x80] ss:$0 sm:$0xff] }
0x230f   :  { %3238 = vadd.xlane.f32.xlu1 %v3237_v48 }
0x238f   :  { %v3227_v36 = vpop.xlane.xlu0 %3226 }
0x2390   :  { %v3242_v60 = vmul.f32 0.03125, %v3227_v36  ;;  %v3224_v24 = vpop.xlane.xlu1 %3223 }
0x2391   :  { %v3241_v57 = vmul.f32 0.03125, %v3224_v24 }
0x2392   :  { %v8776_v50 = vsub.f32 %v8739_v18, %v3242_v60 }
0x2393   :  { %v8779_v37 = vsub.f32 %v8741_v19, %v3241_v57  ;;  %v5868_v57 = vld [vmem:[%s9521_s9 + $0x88] ss:$0 sm:$0xff] }
0x2394   :  { %v3230_v8 = vpop.xlane.xlu1 %3229  ;;  %v3254_v51 = vmul.f32 %v8776_v50, %v8776_v50 }
0x2395   :  { %v3243_v54 = vmul.f32 0.03125, %v3230_v8  ;;  %v3253_v7 = vmul.f32 %v8779_v37, %v8779_v37 }
0x2396   :  { %v3262_v55 = vsel %vm171_vm1, %v3254_v51, 0.0 }
0x2397   :  { %v8787_v34 = vsub.f32 %v8753_v22, %v3243_v54  ;;  %3263 = vadd.xlane.f32.xlu1 %v3262_v55  ;;  %v3259_v58 = vsel %vm171_vm1, %v3253_v7, 0.0 }
0x2398   :  { %3260 = vadd.xlane.f32.xlu0 %v3259_v58  ;;  %v3233_v59 = vpop.xlane.xlu1 %3232  ;;  %v3236_v61 = vpop.xlane.xlu0 %3235 }
0x2399   :  { %v3244_v62 = vmul.f32 0.03125, %v3233_v59  ;;  %v3245_v63 = vmul.f32 0.03125, %v3236_v61  ;;  %v3255_v0 = vmul.f32 %v8787_v34, %v8787_v34 }
0x239b   :  { %v8793_v3 = vsub.f32 %v8758_v31, %v3244_v62  ;;  %v8796_v4 = vsub.f32 %v8765_v15, %v3245_v63  ;;  %v3265_v41 = vsel %vm171_vm1, %v3255_v0, 0.0 }
0x239c   :  { %3266 = vadd.xlane.f32.xlu0 %v3265_v41  ;;  %v3239_v5 = vpop.xlane.xlu1 %3238 }
0x239d   :  { %v3246_v42 = vmul.f32 0.03125, %v3239_v5  ;;  %v3256_v6 = vmul.f32 %v8793_v3, %v8793_v3  ;;  %v3257_v10 = vmul.f32 %v8796_v4, %v8796_v4 }
0x239f   :  { %v8804_v9 = vsub.f32 %v8767_v47, %v3246_v42  ;;  %v3268_v11 = vsel %vm171_vm1, %v3256_v6, 0.0  ;;  %v3271_v12 = vsel %vm171_vm1, %v3257_v10, 0.0 }
0x23a0   :  { %3269 = vadd.xlane.f32.xlu1 %v3268_v11  ;;  %3272 = vadd.xlane.f32.xlu0 %v3271_v12 }
0x23a1   :  { %v3258_v2 = vmul.f32 %v8804_v9, %v8804_v9 }
0x23a3   :  { %v3274_v1 = vsel %vm171_vm1, %v3258_v2, 0.0 }
0x23a4   :  { %3275 = vadd.xlane.f32.xlu1 %v3274_v1 }
0x2424   :  { %v3264_v20 = vpop.xlane.xlu1 %3263 }
0x2425   :  { %v3278_v45 = vmul.f32 0.03125, %v3264_v20  ;;  %v3261_v52 = vpop.xlane.xlu0 %3260 }
0x2426   :  { %v3277_v33 = vmul.f32 0.03125, %v3261_v52 }
0x2427   :  { %v3284_v23 = vadd.f32 1e-05, %v3278_v45 }
0x2428   :  { %v3283_v25 = vadd.f32 1e-05, %v3277_v33 }
0x2429   :  { %7650 = vrsqrt.f32 %v3284_v23  ;;  %v3267_v26 = vpop.xlane.xlu0 %3266 }
0x242a   :  { %7652 = vrsqrt.f32 %v3283_v25  ;;  %v3279_v44 = vmul.f32 0.03125, %v3267_v26 }
0x242c   :  { %v3285_v53 = vadd.f32 1e-05, %v3279_v44 }
0x242d   :  { %v3270_v27 = vpop.xlane.xlu1 %3269  ;;  %v3273_v28 = vpop.xlane.xlu0 %3272 }
0x242e   :  { %7654 = vrsqrt.f32 %v3285_v53  ;;  %v3280_v29 = vmul.f32 0.03125, %v3270_v27  ;;  %v3281_v30 = vmul.f32 0.03125, %v3273_v28 }
0x2430   :  { %v3286_v21 = vadd.f32 1e-05, %v3280_v29  ;;  %v3287_v39 = vadd.f32 1e-05, %v3281_v30 }
0x2431   :  { %v3276_v40 = vpop.xlane.xlu1 %3275 }
0x2432   :  { %7656 = vrsqrt.f32 %v3286_v21  ;;  %v3282_v43 = vmul.f32 0.03125, %v3276_v40 }
0x2433   :  { %v7651_v46 = vpop.eup %7650  ;;  %7658 = vrsqrt.f32 %v3287_v39 }
0x2434   :  { %v7653_v35 = vpop.eup %7652  ;;  %v3296_v48 = vmul.f32 %v7651_v46, %v8776_v50  ;;  %v3288_v36 = vadd.f32 1e-05, %v3282_v43 }
0x2435   :  { %v3295_v60 = vmul.f32 %v7653_v35, %v8779_v37 }
0x2436   :  { %v3306_v24 = vmul.f32 %v5867_v56, %v3296_v48  ;;  %7660 = vrsqrt.f32 %v3288_v36 }
0x2437   :  { %v3305_v8 = vmul.f32 %v5867_v56, %v3295_v60  ;;  %v8901_v60 = vld [vmem:[%s9517_s5 + $0x90] sm:$0xff] }
0x2438   :  { %v7655_v51 = vpop.eup %7654  ;;  %v3316_v55 = vadd.f32 %v5868_v57, %v3306_v24  ;;  %v8906_v24 = vld [vmem:[%s9517_s5 + $0x88] sm:$0xff] }
0x2439   :  { %v3315_v54 = vadd.f32 %v5868_v57, %v3305_v8  ;;  %v3297_v7 = vmul.f32 %v7655_v51, %v8787_v34 }
0x243b   :  { %6637 = vmatprep.mubr.msk.f32.mxu1 %vm171_vm1, %v3315_v54  ;;  %v3307_v58 = vmul.f32 %v5867_v56, %v3297_v7  ;;  %v8913_v7 = vld [vmem:[%s9517_s5 + $0xa0] sm:$0xff] }
0x243c   :  { %v7657_v59 = vpop.eup %7656  ;;  %6638 = vmatmul.mubr.msk.f32.vlgmr.msra.gmra.mrb[38].mxu1 %vm171_vm1, %v3316_v55 }
0x243d   :  { %v7659_v50 = vpop.eup %7658  ;;  %v3317_v37 = vadd.f32 %v5868_v57, %v3307_v58  ;;  %v3298_v61 = vmul.f32 %v7657_v59, %v8793_v3  ;;  %v5869_v3 = vld [vmem:[%s9520_s8 + $0x20] ss:$0 sm:$0xff] }
0x243e   :  { %v3299_v62 = vmul.f32 %v7659_v50, %v8796_v4 }
0x243f   :  { %6640 = vmatprep.mubr.msk.f32.mxu1 %vm171_vm1, %v3317_v37  ;;  %v3308_v63 = vmul.f32 %v5867_v56, %v3298_v61  ;;  %v8921_v61 = vld [vmem:[%s9517_s5 + $0x98] sm:$0xff] }
0x2440   :  { %v7661_v0 = vpop.eup %7660  ;;  %v3309_v41 = vmul.f32 %v5867_v56, %v3299_v62  ;;  %v8926_v62 = vld [vmem:[%s9517_s5 + $0xa8] sm:$0xff] }
0x2441   :  { %v3318_v5 = vadd.f32 %v5868_v57, %v3308_v63  ;;  %v3300_v34 = vmul.f32 %v7661_v0, %v8804_v9 }
0x2442   :  { %v3319_v42 = vadd.f32 %v5868_v57, %v3309_v41 }
0x2443   :  { %6641 = vmatmul.mubr.msk.f32.gmra.mrb[40].mxu1 %vm171_vm1, %v3318_v5  ;;  %v3310_v6 = vmul.f32 %v5867_v56, %v3300_v34  ;;  %v8933_v5 = vld [vmem:[%s9517_s5 + $0xb0] sm:$0xff] }
0x2444   :  { %6643 = vmatprep.mubr.msk.f32.mxu1 %vm171_vm1, %v3319_v42 }
0x2445   :  { %v3320_v10 = vadd.f32 %v5868_v57, %v3310_v6 }
0x2447   :  { %6644 = vmatmul.mubr.msk.f32.gmra.mrb[42].mxu1 %vm171_vm1, %v3320_v10 }
0x250f   :  { %v6639_v4 = vpop.f32.mrb[38].mxu1 }
0x2510   :  { %v3420_v11 = vadd.f32 %v6639_v4, %v5869_v3  ;;  %v3414_v12 = vpop.f32.mrb[39].mxu1 }
0x2511   :  { %v3415_v2 = vadd.f32 %v5869_v3, %v3414_v12 }
0x2512   :  { %v8878_v46 = vmul.f32 0.35355338, %v3420_v11 }
0x2513   :  { %v8844_v1 = vpack.i.bf16 %v3420_v11, %v3415_v2  ;;  %v8846_v9 = vmul.f32 0.35355338, %v3415_v2 }
0x2515   :  { %7439 = vrot.lane.b32.xlu0 %v8844_v1, %s7833_s15  ;;  %6658 = vmatprep.mubr.msk.f32.mxu0 %vm3467_vm5, %v8846_v9 }
0x2516   :  { %v6642_v13 = vpop.f32.mrb[40].mxu1 }
0x2517   :  { %v3430_v14 = vadd.f32 %v6642_v13, %v5869_v3  ;;  %v3424_v16 = vpop.f32.mrb[41].mxu1 }
0x2518   :  { %v3425_v17 = vadd.f32 %v5869_v3, %v3424_v16 }
0x2519   :  { %v8886_v35 = vmul.f32 0.35355338, %v3430_v14 }
0x251a   :  { %v6645_v38 = vpop.f32.mrb[42].mxu1  ;;  %v8852_v49 = vpack.i.bf16 %v3430_v14, %v3425_v17  ;;  %v8880_v56 = vmul.f32 0.35355338, %v3425_v17 }
0x251b   :  { %v3440_v20 = vadd.f32 %v6645_v38, %v5869_v3  ;;  %v3434_v45 = vpop.f32.mrb[43].mxu1 }
0x251c   :  { %v3435_v52 = vadd.f32 %v5869_v3, %v3434_v45  ;;  %7444 = vrot.lane.b32.xlu1 %v8852_v49, %s7833_s15 }
0x251d   :  { %v8894_v36 = vmul.f32 0.35355338, %v3440_v20 }
0x251e   :  { %v8856_v33 = vpack.i.bf16 %v3440_v20, %v3435_v52  ;;  %v8888_v48 = vmul.f32 0.35355338, %v3435_v52 }
0x2520   :  { %7449 = vrot.lane.b32.xlu1 %v8856_v33, %s7833_s15  ;;  %s7844_s15 = smov 24  }
0x2587   :  { %v7440_v23 = vpop.permute.xlu0 %7439 }
0x2588   :  { %v7442_v25 = vunpack.i.h.bf16 %v7440_v23  ;;  %v7441_v26 = vunpack.i.l.bf16 %v7440_v23 }
0x258a   :  { %v7182_v53 = vpack.c.bf16 %v7442_v25, %v7441_v26 }
0x258c   :  { %7184 = vmatprep.subr.msk.bf16.mxu0 %vm8862_vm6, %v7182_v53 }
0x258d   :  { %7187 = vmatpush3.bf16.xpose.msk.msra.mxu0 %vm8862_vm6, %v7182_v53 }
0x258e   :  { %v7445_v27 = vpop.permute.xlu1 %7444 }
0x258f   :  { %v7447_v28 = vunpack.i.h.bf16 %v7445_v27  ;;  %v7446_v29 = vunpack.i.l.bf16 %v7445_v27 }
0x2591   :  { %v7188_v30 = vpack.c.bf16 %v7447_v28, %v7446_v29 }
0x2592   :  { %v7450_v21 = vpop.permute.xlu1 %7449 }
0x2593   :  { %v7452_v39 = vunpack.i.h.bf16 %v7450_v21  ;;  %v7451_v40 = vunpack.i.l.bf16 %v7450_v21  ;;  %7190 = vmatprep.subr.msk.bf16.mxu0 %vm8862_vm6, %v7188_v30 }
0x2595   :  { %v7194_v43 = vpack.c.bf16 %v7452_v39, %v7451_v40  ;;  %7193 = vmatpush3.bf16.xpose.msk.msra.mxu0 %vm8862_vm6, %v7188_v30 }
0x2597   :  { %7196 = vmatprep.subr.msk.bf16.mxu0 %vm8862_vm6, %v7194_v43 }
0x259d   :  { %7199 = vmatpush3.bf16.xpose.msk.msra.mxu0 %vm8862_vm6, %v7194_v43 }
0x25a4   :  { %6659 = vmatmul.mubr.msk.f32.vlgmr.msra.gmra.mrb[28].mxu0 %vm3467_vm5, %v8878_v46 }
0x25a5   :  { %6661 = vmatprep.mubr.msk.f32.mxu0 %vm3467_vm5, %v8880_v56 }
0x25a8   :  { %6662 = vmatmul.mubr.msk.f32.gmra.mrb[30].mxu0 %vm3467_vm5, %v8886_v35 }
0x25a9   :  { %6664 = vmatprep.mubr.msk.f32.mxu0 %vm3467_vm5, %v8888_v48 }
0x25ac   :  { %6665 = vmatmul.mubr.msk.f32.gmra.mrb[32].mxu0 %vm3467_vm5, %v8894_v36 }
0x2677   :  { %v6660_v57 = vpop.f32.mrb[28].mxu0 }
0x2678   :  { %v3570_v8 = vadd.f32 %v6660_v57, %v8901_v60  ;;  %v3564_v51 = vpop.f32.mrb[29].mxu0 }
0x2679   :  { %v3565_v54 = vadd.f32 %v3564_v51, %v8906_v24 }
0x267a   :  { %v3596_v55 = vsel %vm1233_vm4, %v3570_v8, -inf }
0x267b   :  { %3597 = vmax.xlane.f32.xlu1 %v3596_v55  ;;  %v6663_v58 = vpop.f32.mrb[30].mxu0  ;;  %v3593_v59 = vsel %vm1233_vm4, %v3565_v54, -inf }
0x267c   :  { %v3580_v50 = vadd.f32 %v6663_v58, %v8913_v7  ;;  %v3574_v37 = vpop.f32.mrb[31].mxu0  ;;  %3594 = vmax.xlane.f32.xlu0 %v3593_v59 }
0x267d   :  { %v3575_v0 = vadd.f32 %v3574_v37, %v8921_v61 }
0x267e   :  { %v3602_v63 = vsel %vm1233_vm4, %v3580_v50, -inf }
0x267f   :  { %v6666_v41 = vpop.f32.mrb[32].mxu0  ;;  %v3599_v3 = vsel %vm1233_vm4, %v3575_v0, -inf }
0x2680   :  { %v3584_v34 = vpop.f32.mrb[33].mxu0  ;;  %3603 = vmax.xlane.f32.xlu0 %v3602_v63  ;;  %v3590_v6 = vadd.f32 %v6666_v41, %v8933_v5 }
0x2681   :  { %v3585_v42 = vadd.f32 %v3584_v34, %v8926_v62 }
0x2682   :  { %v3608_v4 = vsel %vm1233_vm4, %v3590_v6, -inf }
0x2683   :  { %v3605_v10 = vsel %vm1233_vm4, %v3585_v42, -inf }
0x2684   :  { %3606 = vmax.xlane.f32.xlu1 %v3605_v10  ;;  %3600 = vmax.xlane.f32.xlu0 %v3599_v3 }
0x2688   :  { %3609 = vmax.xlane.f32.xlu0 %v3608_v4 }
0x2695   :  { %7454 = vrot.lane.b32.xlu1 %v8844_v1, %s7830_s29 }
0x2699   :  { %7464 = vrot.lane.b32.xlu1 %v8856_v33, %s7830_s29 }
0x269e   :  { %7459 = vrot.lane.b32.xlu0 %v8852_v49, %s7830_s29  ;;  %s7837_s29 = smov 88  }
0x2708   :  { %v3598_v11 = vpop.xlane.xlu1 %3597 }
0x2709   :  { %v3612_v12 = vsub.f32 %v3570_v8, %v3598_v11  ;;  %v3595_v2 = vpop.xlane.xlu0 %3594 }
0x270a   :  { %v3611_v13 = vsub.f32 %v3565_v54, %v3595_v2 }
0x270b   :  { %v3619_v14 = vmul.f32 1.442695, %v3612_v12 }
0x270c   :  { %v3617_v16 = vmul.f32 1.442695, %v3611_v13 }
0x270d   :  { %7662 = vpow2.f32 %v3619_v14  ;;  %v3604_v17 = vpop.xlane.xlu0 %3603 }
0x270e   :  { %7664 = vpow2.f32 %v3617_v16  ;;  %v3614_v38 = vsub.f32 %v3580_v50, %v3604_v17 }
0x2710   :  { %v3623_v20 = vmul.f32 1.442695, %v3614_v38 }
0x2711   :  { %v3607_v45 = vpop.xlane.xlu1 %3606  ;;  %v3601_v52 = vpop.xlane.xlu0 %3600 }
0x2712   :  { %7666 = vpow2.f32 %v3623_v20  ;;  %v3613_v23 = vsub.f32 %v3575_v0, %v3601_v52  ;;  %v3615_v25 = vsub.f32 %v3585_v42, %v3607_v45 }
0x2714   :  { %v3621_v26 = vmul.f32 1.442695, %v3613_v23  ;;  %v3625_v40 = vmul.f32 1.442695, %v3615_v25 }
0x2715   :  { %v7455_v53 = vpop.permute.xlu1 %7454  ;;  %v3610_v27 = vpop.xlane.xlu0 %3609 }
0x2716   :  { %v7457_v28 = vunpack.i.h.bf16 %v7455_v53  ;;  %v7456_v29 = vunpack.i.l.bf16 %v7455_v53  ;;  %v3616_v30 = vsub.f32 %v3590_v6, %v3610_v27  ;;  %7668 = vpow2.f32 %v3621_v26 }
0x2717   :  { %v7663_v21 = vpop.eup %7662 }
0x2718   :  { %v7665_v39 = vpop.eup %7664  ;;  %v3627_v43 = vmul.f32 1.442695, %v3616_v30  ;;  %v3632_v57 = vsel %vm1233_vm4, %v7663_v21, 0.0  ;;  %v7200_v8 = vpack.c.bf16 %v7457_v28, %v7456_v29 }
0x2719   :  { %v7465_v51 = vpop.permute.xlu1 %7464  ;;  %3633 = vadd.xlane.f32.xlu0 %v3632_v57  ;;  %v7460_v54 = vpop.permute.xlu0 %7459  ;;  %v3629_v55 = vsel %vm1233_vm4, %v7665_v39, 0.0 }
0x271a   :  { %7670 = vpow2.f32 %v3627_v43  ;;  %v7462_v58 = vunpack.i.h.bf16 %v7460_v54  ;;  %7201 = vmatprep.subr.bf16.mxu1 %v7200_v8  ;;  %3630 = vadd.xlane.f32.xlu1 %v3629_v55  ;;  %v7467_v59 = vunpack.i.h.bf16 %v7465_v51  ;;  %v7466_v50 = vunpack.i.l.bf16 %v7465_v51 }
0x271b   :  { %v7461_v37 = vunpack.i.l.bf16 %v7460_v54  ;;  %7203 = vmatpush3.bf16.msra.mxu1 %v7200_v8  ;;  %7672 = vpow2.f32 %v3625_v40 }
0x271c   :  { %v7667_v63 = vpop.eup %7666  ;;  %v7208_v34 = vpack.c.bf16 %v7467_v59, %v7466_v50 }
0x271d   :  { %v3638_v0 = vsel %vm1233_vm4, %v7667_v63, 0.0  ;;  %v7204_v41 = vpack.c.bf16 %v7462_v58, %v7461_v37 }
0x271e   :  { %3639 = vadd.xlane.f32.xlu0 %v3638_v0 }
0x271f   :  { %7205 = vmatprep.subr.bf16.mxu1 %v7204_v41 }
0x2720   :  { %7207 = vmatpush3.bf16.msra.mxu1 %v7204_v41  ;;  %v7669_v42 = vpop.eup %7668 }
0x2721   :  { %7209 = vmatprep.subr.bf16.mxu1 %v7208_v34  ;;  %v3635_v6 = vsel %vm1233_vm4, %v7669_v42, 0.0 }
0x2722   :  { %3636 = vadd.xlane.f32.xlu1 %v3635_v6 }
0x2724   :  { %v7671_v10 = vpop.eup %7670  ;;  %7211 = vmatpush3.bf16.msra.mxu1 %v7208_v34 }
0x2725   :  { %v3644_v3 = vsel %vm1233_vm4, %v7671_v10, 0.0  ;;  %v7673_v4 = vpop.eup %7672 }
0x2726   :  { %3645 = vadd.xlane.f32.xlu0 %v3644_v3  ;;  %v3641_v11 = vsel %vm1233_vm4, %v7673_v4, 0.0 }
0x272a   :  { %3642 = vadd.xlane.f32.xlu0 %v3641_v11 }
0x2733   :  { %7474 = vrot.lane.b32.xlu1 %v8852_v49, %s7837_s29 }
0x2737   :  { %7479 = vrot.lane.b32.xlu1 %v8856_v33, %s7837_s29 }
0x273b   :  { %3790 = vrot.lane.b32.xlu1 %v8846_v9, %s7838_s25 }
0x273f   :  { %3792 = vrot.lane.b32.xlu1 %v8878_v46, %s7838_s25 }
0x2740   :  { %7469 = vrot.lane.b32.xlu0 %v8844_v1, %s7837_s29 }
0x2743   :  { %3796 = vrot.lane.b32.xlu1 %v8886_v35, %s7838_s25 }
0x2744   :  { %3794 = vrot.lane.b32.xlu0 %v8880_v56, %s7838_s25 }
0x2747   :  { %3800 = vrot.lane.b32.xlu1 %v8894_v36, %s7838_s25 }
0x2748   :  { %3798 = vrot.lane.b32.xlu0 %v8888_v48, %s7838_s25 }
0x27a6   :  { %v3634_v12 = vpop.xlane.xlu0 %3633 }
0x27a7   :  { %7674 = vrcp.f32 %v3634_v12  ;;  %v3631_v2 = vpop.xlane.xlu1 %3630 }
0x27a8   :  { %7676 = vrcp.f32 %v3631_v2 }
0x27ab   :  { %v3640_v13 = vpop.xlane.xlu0 %3639 }
0x27ac   :  { %7678 = vrcp.f32 %v3640_v13 }
0x27af   :  { %v3637_v14 = vpop.xlane.xlu1 %3636 }
0x27b0   :  { %7680 = vrcp.f32 %v3637_v14 }
0x27b1   :  { %v7675_v16 = vpop.eup %7674 }
0x27b2   :  { %v7677_v17 = vpop.eup %7676  ;;  %v3654_v45 = vmul.f32 %v7675_v16, %v7663_v21 }
0x27b3   :  { %v3646_v38 = vpop.xlane.xlu0 %3645  ;;  %v3653_v20 = vmul.f32 %v7677_v17, %v7665_v39  ;;  %v7475_v23 = vpop.permute.xlu1 %7474 }
0x27b4   :  { %7682 = vrcp.f32 %v3646_v38  ;;  %v7477_v53 = vunpack.i.h.bf16 %v7475_v23  ;;  %v7476_v28 = vunpack.i.l.bf16 %v7475_v23 }
0x27b5   :  { %6679 = vmatprep.mubr.msk.f32.mxu1 %vm1233_vm4, %v3653_v20 }
0x27b6   :  { %6680 = vmatmul.mubr.msk.f32.vlgmr.msra.gmra.mrb[44].mxu1 %vm1233_vm4, %v3654_v45  ;;  %v7679_v25 = vpop.eup %7678  ;;  %v7218_v21 = vpack.c.bf16 %v7477_v53, %v7476_v28 }
0x27b7   :  { %v3643_v52 = vpop.xlane.xlu0 %3642  ;;  %v3656_v43 = vmul.f32 %v7679_v25, %v7667_v63  ;;  %v7480_v39 = vpop.permute.xlu1 %7479 }
0x27b8   :  { %7684 = vrcp.f32 %v3643_v52  ;;  %v7482_v55 = vunpack.i.h.bf16 %v7480_v39  ;;  %v7481_v58 = vunpack.i.l.bf16 %v7480_v39 }
0x27ba   :  { %v7681_v26 = vpop.eup %7680  ;;  %v7224_v37 = vpack.c.bf16 %v7482_v55, %v7481_v58 }
0x27bb   :  { %v7470_v27 = vpop.permute.xlu0 %7469  ;;  %v3655_v40 = vmul.f32 %v7681_v26, %v7669_v42  ;;  %v3791_v50 = vpop.permute.xlu1 %3790 }
0x27bc   :  { %v7472_v29 = vunpack.i.h.bf16 %v7470_v27  ;;  %v7471_v30 = vunpack.i.l.bf16 %v7470_v27 }
0x27bd   :  { %6682 = vmatprep.mubr.msk.f32.mxu1 %vm1233_vm4, %v3655_v40 }
0x27be   :  { %v7212_v57 = vpack.c.bf16 %v7472_v29, %v7471_v30  ;;  %6683 = vmatmul.mubr.msk.f32.gmra.mrb[46].mxu1 %vm1233_vm4, %v3656_v43  ;;  %v7683_v8 = vpop.eup %7682 }
0x27bf   :  { %v3658_v59 = vmul.f32 %v7683_v8, %v7671_v10  ;;  %v3793_v63 = vpop.permute.xlu1 %3792  ;;  %v3795_v0 = vpop.permute.xlu0 %3794 }
0x27c0   :  { %7214 = vmatprep.subr.msk.bf16.mxu1 %vm8862_vm6, %v7212_v57 }
0x27c1   :  { %7217 = vmatpush3.bf16.xpose.msk.msra.mxu1 %vm8862_vm6, %v7212_v57 }
0x27c2   :  { %v7685_v51 = vpop.eup %7684  ;;  %7220 = vmatprep.subr.msk.bf16.mxu1 %vm8862_vm6, %v7218_v21 }
0x27c3   :  { %v3657_v54 = vmul.f32 %v7685_v51, %v7673_v4  ;;  %v3797_v41 = vpop.permute.xlu1 %3796  ;;  %v3799_v34 = vpop.permute.xlu0 %3798 }
0x27c5   :  { %6685 = vmatprep.mubr.msk.f32.mxu1 %vm1233_vm4, %v3657_v54 }
0x27c6   :  { %6686 = vmatmul.mubr.msk.f32.gmra.mrb[48].mxu1 %vm1233_vm4, %v3658_v59 }
0x27c7   :  { %6700 = vmatprep.mubr.msk.f32.mxu1 %vm3467_vm5, %v3791_v50  ;;  %v3801_v42 = vpop.permute.xlu1 %3800 }
0x27c9   :  { %7223 = vmatpush3.bf16.xpose.msk.msra.mxu1 %vm8862_vm6, %v7218_v21 }
0x27ca   :  { %7226 = vmatprep.subr.msk.bf16.mxu1 %vm8862_vm6, %v7224_v37 }
0x27d1   :  { %7229 = vmatpush3.bf16.xpose.msk.msra.mxu1 %vm8862_vm6, %v7224_v37 }
0x27d8   :  { %6701 = vmatmul.mubr.msk.f32.vlgmr.msra.gmra.mrb[50].mxu1 %vm3467_vm5, %v3793_v63 }
0x27d9   :  { %6703 = vmatprep.mubr.msk.f32.mxu1 %vm3467_vm5, %v3795_v0 }
0x27dc   :  { %6704 = vmatmul.mubr.msk.f32.gmra.mrb[52].mxu1 %vm3467_vm5, %v3797_v41 }
0x27dd   :  { %6706 = vmatprep.mubr.msk.f32.mxu1 %vm3467_vm5, %v3799_v34 }
0x27e0   :  { %6707 = vmatmul.mubr.msk.f32.gmra.mrb[54].mxu1 %vm3467_vm5, %v3801_v42 }
0x2889   :  { %v8985_v6 = vpop.f32.mrb[44].mxu1 }
0x288a   :  { %v8987_v10 = vpop.f32.mrb[45].mxu1 }
0x2891   :  { %v8989_v3 = vpop.f32.mrb[46].mxu1 }
0x2892   :  { %v8991_v4 = vpop.f32.mrb[47].mxu1 }
0x2899   :  { %v8993_v11 = vpop.f32.mrb[48].mxu1 }
0x289a   :  { %v8995_v12 = vpop.f32.mrb[49].mxu1 }
0x28ab   :  { %v6702_v2 = vpop.f32.mrb[50].mxu1 }
0x28ac   :  { %v3910_v13 = vadd.f32 %v6702_v2, %v8901_v60  ;;  %v3904_v14 = vpop.f32.mrb[51].mxu1 }
0x28ad   :  { %v3905_v16 = vadd.f32 %v3904_v14, %v8906_v24 }
0x28ae   :  { %v3936_v17 = vsel %vm1233_vm4, %v3910_v13, -inf }
0x28af   :  { %3937 = vmax.xlane.f32.xlu1 %v3936_v17  ;;  %v6705_v38 = vpop.f32.mrb[52].mxu1  ;;  %v3933_v20 = vsel %vm1233_vm4, %v3905_v16, -inf }
0x28b0   :  { %v3920_v45 = vadd.f32 %v6705_v38, %v8913_v7  ;;  %v3914_v52 = vpop.f32.mrb[53].mxu1  ;;  %3934 = vmax.xlane.f32.xlu0 %v3933_v20 }
0x28b1   :  { %v3915_v25 = vadd.f32 %v3914_v52, %v8921_v61 }
0x28b2   :  { %v3942_v23 = vsel %vm1233_vm4, %v3920_v45, -inf }
0x28b3   :  { %v6708_v26 = vpop.f32.mrb[54].mxu1  ;;  %v3939_v30 = vsel %vm1233_vm4, %v3915_v25, -inf }
0x28b4   :  { %v3924_v53 = vpop.f32.mrb[55].mxu1  ;;  %3943 = vmax.xlane.f32.xlu0 %v3942_v23  ;;  %v3930_v28 = vadd.f32 %v6708_v26, %v8933_v5 }
0x28b5   :  { %v3925_v27 = vadd.f32 %v3924_v53, %v8926_v62 }
0x28b6   :  { %v3948_v40 = vsel %vm1233_vm4, %v3930_v28, -inf }
0x28b7   :  { %v3945_v29 = vsel %vm1233_vm4, %v3925_v27, -inf }
0x28b8   :  { %3946 = vmax.xlane.f32.xlu1 %v3945_v29  ;;  %3940 = vmax.xlane.f32.xlu0 %v3939_v30 }
0x28bc   :  { %3949 = vmax.xlane.f32.xlu0 %v3948_v40 }
0x28c9   :  { %7484 = vrot.lane.b32.xlu1 %v8844_v1, %s7839_s26 }
0x28cd   :  { %7494 = vrot.lane.b32.xlu1 %v8856_v33, %s7839_s26 }
0x28d2   :  { %7489 = vrot.lane.b32.xlu0 %v8852_v49, %s7839_s26 }
0x293c   :  { %v3938_v43 = vpop.xlane.xlu1 %3937 }
0x293d   :  { %v3952_v57 = vsub.f32 %v3910_v13, %v3938_v43  ;;  %v3935_v21 = vpop.xlane.xlu0 %3934 }
0x293e   :  { %v3951_v39 = vsub.f32 %v3905_v16, %v3935_v21 }
0x293f   :  { %v3959_v8 = vmul.f32 1.442695, %v3952_v57 }
0x2940   :  { %v3957_v51 = vmul.f32 1.442695, %v3951_v39 }
0x2941   :  { %7686 = vpow2.f32 %v3959_v8  ;;  %v3944_v54 = vpop.xlane.xlu0 %3943 }
0x2942   :  { %7688 = vpow2.f32 %v3957_v51  ;;  %v3954_v55 = vsub.f32 %v3920_v45, %v3944_v54 }
0x2944   :  { %v3963_v58 = vmul.f32 1.442695, %v3954_v55 }
0x2945   :  { %v3947_v59 = vpop.xlane.xlu1 %3946  ;;  %v3941_v50 = vpop.xlane.xlu0 %3940 }
0x2946   :  { %7690 = vpow2.f32 %v3963_v58  ;;  %v3953_v37 = vsub.f32 %v3915_v25, %v3941_v50  ;;  %v3955_v63 = vsub.f32 %v3925_v27, %v3947_v59 }
0x2948   :  { %v3961_v0 = vmul.f32 1.442695, %v3953_v37  ;;  %v3965_v17 = vmul.f32 1.442695, %v3955_v63 }
0x2949   :  { %v7485_v41 = vpop.permute.xlu1 %7484  ;;  %v3950_v34 = vpop.xlane.xlu0 %3949 }
0x294a   :  { %v7487_v42 = vunpack.i.h.bf16 %v7485_v41  ;;  %v7486_v2 = vunpack.i.l.bf16 %v7485_v41  ;;  %v3956_v13 = vsub.f32 %v3930_v28, %v3950_v34  ;;  %7692 = vpow2.f32 %v3961_v0 }
0x294b   :  { %v7687_v14 = vpop.eup %7686 }
0x294c   :  { %v7689_v16 = vpop.eup %7688  ;;  %v3967_v38 = vmul.f32 1.442695, %v3956_v13  ;;  %v3972_v20 = vsel %vm1233_vm4, %v7687_v14, 0.0  ;;  %v7230_v45 = vpack.c.bf16 %v7487_v42, %v7486_v2 }
0x294d   :  { %v7495_v52 = vpop.permute.xlu1 %7494  ;;  %3973 = vadd.xlane.f32.xlu0 %v3972_v20  ;;  %v7490_v23 = vpop.permute.xlu0 %7489  ;;  %v3969_v25 = vsel %vm1233_vm4, %v7689_v16, 0.0 }
0x294e   :  { %7694 = vpow2.f32 %v3967_v38  ;;  %v7492_v26 = vunpack.i.h.bf16 %v7490_v23  ;;  %7231 = vmatprep.subr.bf16.mxu0 %v7230_v45  ;;  %3970 = vadd.xlane.f32.xlu1 %v3969_v25  ;;  %v7497_v53 = vunpack.i.h.bf16 %v7495_v52  ;;  %v7496_v27 = vunpack.i.l.bf16 %v7495_v52 }
0x294f   :  { %v7491_v28 = vunpack.i.l.bf16 %v7490_v23  ;;  %7233 = vmatpush3.bf16.msra.mxu0 %v7230_v45  ;;  %7696 = vpow2.f32 %v3965_v17 }
0x2950   :  { %v7691_v29 = vpop.eup %7690  ;;  %v7238_v43 = vpack.c.bf16 %v7497_v53, %v7496_v27 }
0x2951   :  { %v3978_v30 = vsel %vm1233_vm4, %v7691_v29, 0.0  ;;  %v7234_v40 = vpack.c.bf16 %v7492_v26, %v7491_v28 }
0x2952   :  { %3979 = vadd.xlane.f32.xlu0 %v3978_v30 }
0x2953   :  { %7235 = vmatprep.subr.bf16.mxu0 %v7234_v40 }
0x2954   :  { %7237 = vmatpush3.bf16.msra.mxu0 %v7234_v40  ;;  %v7693_v57 = vpop.eup %7692 }
0x2955   :  { %7239 = vmatprep.subr.bf16.mxu0 %v7238_v43  ;;  %v3975_v21 = vsel %vm1233_vm4, %v7693_v57, 0.0 }
0x2956   :  { %3976 = vadd.xlane.f32.xlu1 %v3975_v21 }
0x2958   :  { %v7695_v39 = vpop.eup %7694  ;;  %7241 = vmatpush3.bf16.msra.mxu0 %v7238_v43 }
0x2959   :  { %v3984_v8 = vsel %vm1233_vm4, %v7695_v39, 0.0  ;;  %v7697_v51 = vpop.eup %7696 }
0x295a   :  { %3985 = vadd.xlane.f32.xlu0 %v3984_v8  ;;  %v3981_v54 = vsel %vm1233_vm4, %v7697_v51, 0.0 }
0x295e   :  { %3982 = vadd.xlane.f32.xlu0 %v3981_v54 }
0x2967   :  { %7504 = vrot.lane.b32.xlu1 %v8852_v49, %s7835_s17 }
0x296b   :  { %7509 = vrot.lane.b32.xlu1 %v8856_v33, %s7835_s17 }
0x296f   :  { %4130 = vrot.lane.b32.xlu1 %v8846_v9, %s7831_s30 }
0x2973   :  { %4132 = vrot.lane.b32.xlu1 %v8878_v46, %s7831_s30 }
0x2974   :  { %7499 = vrot.lane.b32.xlu0 %v8844_v1, %s7835_s17  ;;  %s7842_s17 = smov 40  }
0x2977   :  { %4136 = vrot.lane.b32.xlu1 %v8886_v35, %s7831_s30 }
0x2978   :  { %4134 = vrot.lane.b32.xlu0 %v8880_v56, %s7831_s30 }
0x297b   :  { %4140 = vrot.lane.b32.xlu1 %v8894_v36, %s7831_s30 }
0x297c   :  { %4138 = vrot.lane.b32.xlu0 %v8888_v48, %s7831_s30  ;;  %s7841_s30 = smov 104  }
0x29da   :  { %v3974_v55 = vpop.xlane.xlu0 %3973 }
0x29db   :  { %7698 = vrcp.f32 %v3974_v55  ;;  %v3971_v58 = vpop.xlane.xlu1 %3970 }
0x29dc   :  { %7700 = vrcp.f32 %v3971_v58 }
0x29df   :  { %v3980_v59 = vpop.xlane.xlu0 %3979 }
0x29e0   :  { %7702 = vrcp.f32 %v3980_v59 }
0x29e3   :  { %v3977_v50 = vpop.xlane.xlu1 %3976 }
0x29e4   :  { %7704 = vrcp.f32 %v3977_v50 }
0x29e5   :  { %v7699_v37 = vpop.eup %7698 }
0x29e6   :  { %v7701_v63 = vpop.eup %7700  ;;  %v3994_v34 = vmul.f32 %v7699_v37, %v7687_v14 }
0x29e7   :  { %v3986_v0 = vpop.xlane.xlu0 %3985  ;;  %v3993_v41 = vmul.f32 %v7701_v63, %v7689_v16  ;;  %v7505_v2 = vpop.permute.xlu1 %7504 }
0x29e8   :  { %7706 = vrcp.f32 %v3986_v0  ;;  %v7507_v38 = vunpack.i.h.bf16 %v7505_v2  ;;  %v7506_v45 = vunpack.i.l.bf16 %v7505_v2 }
0x29e9   :  { %6721 = vmatprep.mubr.msk.f32.mxu0 %vm1233_vm4, %v3993_v41 }
0x29ea   :  { %6722 = vmatmul.mubr.msk.f32.vlgmr.msra.gmra.mrb[34].mxu0 %vm1233_vm4, %v3994_v34  ;;  %v7703_v13 = vpop.eup %7702  ;;  %v7248_v14 = vpack.c.bf16 %v7507_v38, %v7506_v45 }
0x29eb   :  { %v3983_v42 = vpop.xlane.xlu0 %3982  ;;  %v3996_v26 = vmul.f32 %v7703_v13, %v7691_v29  ;;  %v7510_v16 = vpop.permute.xlu1 %7509 }
0x29ec   :  { %7708 = vrcp.f32 %v3983_v42  ;;  %v7512_v29 = vunpack.i.h.bf16 %v7510_v16  ;;  %v7511_v40 = vunpack.i.l.bf16 %v7510_v16 }
0x29ee   :  { %v7705_v17 = vpop.eup %7704  ;;  %v7254_v21 = vpack.c.bf16 %v7512_v29, %v7511_v40 }
0x29ef   :  { %v7500_v20 = vpop.permute.xlu0 %7499  ;;  %v3995_v25 = vmul.f32 %v7705_v17, %v7693_v57  ;;  %v4131_v57 = vpop.permute.xlu1 %4130 }
0x29f0   :  { %v7502_v52 = vunpack.i.h.bf16 %v7500_v20  ;;  %v7501_v23 = vunpack.i.l.bf16 %v7500_v20 }
0x29f1   :  { %6724 = vmatprep.mubr.msk.f32.mxu0 %vm1233_vm4, %v3995_v25 }
0x29f2   :  { %v7242_v53 = vpack.c.bf16 %v7502_v52, %v7501_v23  ;;  %6725 = vmatmul.mubr.msk.f32.gmra.mrb[36].mxu0 %vm1233_vm4, %v3996_v26  ;;  %v7707_v27 = vpop.eup %7706 }
0x29f3   :  { %v3998_v43 = vmul.f32 %v7707_v27, %v7695_v39  ;;  %v4133_v8 = vpop.permute.xlu1 %4132 }
0x29f4   :  { %7244 = vmatprep.subr.msk.bf16.mxu0 %vm8862_vm6, %v7242_v53 }
0x29f5   :  { %7247 = vmatpush3.bf16.xpose.msk.msra.mxu0 %vm8862_vm6, %v7242_v53 }
0x29f6   :  { %v7709_v28 = vpop.eup %7708  ;;  %7250 = vmatprep.subr.msk.bf16.mxu0 %vm8862_vm6, %v7248_v14 }
0x29f7   :  { %v3997_v30 = vmul.f32 %v7709_v28, %v7697_v51  ;;  %v4135_v51 = vpop.permute.xlu0 %4134  ;;  %v4137_v39 = vpop.permute.xlu1 %4136 }
0x29f9   :  { %6727 = vmatprep.mubr.msk.f32.mxu0 %vm1233_vm4, %v3997_v30 }
0x29fa   :  { %6728 = vmatmul.mubr.msk.f32.gmra.mrb[38].mxu0 %vm1233_vm4, %v3998_v43 }
0x29fb   :  { %6742 = vmatprep.mubr.msk.f32.mxu0 %vm3467_vm5, %v4131_v57  ;;  %v4139_v54 = vpop.permute.xlu0 %4138  ;;  %v4141_v55 = vpop.permute.xlu1 %4140 }
0x29fd   :  { %7253 = vmatpush3.bf16.xpose.msk.msra.mxu0 %vm8862_vm6, %v7248_v14 }
0x29fe   :  { %7256 = vmatprep.subr.msk.bf16.mxu0 %vm8862_vm6, %v7254_v21 }
0x2a05   :  { %7259 = vmatpush3.bf16.xpose.msk.msra.mxu0 %vm8862_vm6, %v7254_v21 }
0x2a0c   :  { %6743 = vmatmul.mubr.msk.f32.vlgmr.msra.gmra.mrb[40].mxu0 %vm3467_vm5, %v4133_v8 }
0x2a0d   :  { %6745 = vmatprep.mubr.msk.f32.mxu0 %vm3467_vm5, %v4135_v51 }
0x2a10   :  { %6746 = vmatmul.mubr.msk.f32.gmra.mrb[42].mxu0 %vm3467_vm5, %v4137_v39 }
0x2a11   :  { %6748 = vmatprep.mubr.msk.f32.mxu0 %vm3467_vm5, %v4139_v54 }
0x2a14   :  { %6749 = vmatmul.mubr.msk.f32.gmra.mrb[44].mxu0 %vm3467_vm5, %v4141_v55 }
0x2abd   :  { %v9060_v58 = vpop.f32.mrb[34].mxu0 }
0x2abe   :  { %v9062_v59 = vpop.f32.mrb[35].mxu0 }
0x2ac5   :  { %v9064_v50 = vpop.f32.mrb[36].mxu0 }
0x2ac6   :  { %v9066_v37 = vpop.f32.mrb[37].mxu0 }
0x2acd   :  { %v9068_v63 = vpop.f32.mrb[38].mxu0 }
0x2ace   :  { %v9070_v0 = vpop.f32.mrb[39].mxu0 }
0x2adf   :  { %v6744_v41 = vpop.f32.mrb[40].mxu0 }
0x2ae0   :  { %v4250_v34 = vadd.f32 %v6744_v41, %v8901_v60  ;;  %v4244_v42 = vpop.f32.mrb[41].mxu0 }
0x2ae1   :  { %v4245_v2 = vadd.f32 %v4244_v42, %v8906_v24 }
0x2ae2   :  { %v4276_v13 = vsel %vm1233_vm4, %v4250_v34, -inf }
0x2ae3   :  { %4277 = vmax.xlane.f32.xlu1 %v4276_v13  ;;  %v6747_v17 = vpop.f32.mrb[42].mxu0  ;;  %v4273_v38 = vsel %vm1233_vm4, %v4245_v2, -inf }
0x2ae4   :  { %v4260_v20 = vadd.f32 %v6747_v17, %v8913_v7  ;;  %v4254_v45 = vpop.f32.mrb[43].mxu0  ;;  %4274 = vmax.xlane.f32.xlu0 %v4273_v38 }
0x2ae5   :  { %v4255_v23 = vadd.f32 %v4254_v45, %v8921_v61 }
0x2ae6   :  { %v4282_v52 = vsel %vm1233_vm4, %v4260_v20, -inf }
0x2ae7   :  { %v6750_v25 = vpop.f32.mrb[44].mxu0  ;;  %v4279_v27 = vsel %vm1233_vm4, %v4255_v23, -inf }
0x2ae8   :  { %v4264_v26 = vpop.f32.mrb[45].mxu0  ;;  %4283 = vmax.xlane.f32.xlu0 %v4282_v52  ;;  %v4270_v14 = vadd.f32 %v6750_v25, %v8933_v5 }
0x2ae9   :  { %v4265_v53 = vadd.f32 %v4264_v26, %v8926_v62 }
0x2aea   :  { %v4288_v28 = vsel %vm1233_vm4, %v4270_v14, -inf }
0x2aeb   :  { %v4285_v16 = vsel %vm1233_vm4, %v4265_v53, -inf }
0x2aec   :  { %4286 = vmax.xlane.f32.xlu1 %v4285_v16  ;;  %4280 = vmax.xlane.f32.xlu0 %v4279_v27 }
0x2af0   :  { %4289 = vmax.xlane.f32.xlu0 %v4288_v28 }
0x2afd   :  { %7514 = vrot.lane.b32.xlu1 %v8844_v1, %s7829_s28 }
0x2b01   :  { %7524 = vrot.lane.b32.xlu1 %v8856_v33, %s7829_s28 }
0x2b06   :  { %7519 = vrot.lane.b32.xlu0 %v8852_v49, %s7829_s28  ;;  %s7840_s28 = smov 72  }
0x2b70   :  { %v4278_v30 = vpop.xlane.xlu1 %4277 }
0x2b71   :  { %v4292_v29 = vsub.f32 %v4250_v34, %v4278_v30  ;;  %v4275_v40 = vpop.xlane.xlu0 %4274 }
0x2b72   :  { %v4291_v43 = vsub.f32 %v4245_v2, %v4275_v40 }
0x2b73   :  { %v4299_v57 = vmul.f32 1.442695, %v4292_v29 }
0x2b74   :  { %v4297_v21 = vmul.f32 1.442695, %v4291_v43 }
0x2b75   :  { %7710 = vpow2.f32 %v4299_v57  ;;  %v4284_v8 = vpop.xlane.xlu0 %4283 }
0x2b76   :  { %7712 = vpow2.f32 %v4297_v21  ;;  %v4294_v51 = vsub.f32 %v4260_v20, %v4284_v8 }
0x2b78   :  { %v4303_v39 = vmul.f32 1.442695, %v4294_v51 }
0x2b79   :  { %v4287_v54 = vpop.xlane.xlu1 %4286  ;;  %v4281_v55 = vpop.xlane.xlu0 %4280 }
0x2b7a   :  { %7714 = vpow2.f32 %v4303_v39  ;;  %v4293_v41 = vsub.f32 %v4255_v23, %v4281_v55  ;;  %v4295_v42 = vsub.f32 %v4265_v53, %v4287_v54 }
0x2b7c   :  { %v4301_v13 = vmul.f32 1.442695, %v4293_v41  ;;  %v4305_v26 = vmul.f32 1.442695, %v4295_v42 }
0x2b7d   :  { %v7515_v17 = vpop.permute.xlu1 %7514  ;;  %v4290_v38 = vpop.xlane.xlu0 %4289 }
0x2b7e   :  { %v7517_v45 = vunpack.i.h.bf16 %v7515_v17  ;;  %v7516_v52 = vunpack.i.l.bf16 %v7515_v17  ;;  %v4296_v34 = vsub.f32 %v4270_v14, %v4290_v38  ;;  %7716 = vpow2.f32 %v4301_v13 }
0x2b7f   :  { %v7711_v25 = vpop.eup %7710 }
0x2b80   :  { %v7713_v2 = vpop.eup %7712  ;;  %v7260_v16 = vpack.c.bf16 %v7517_v45, %v7516_v52  ;;  %v4307_v27 = vmul.f32 1.442695, %v4296_v34  ;;  %v4312_v20 = vsel %vm1233_vm4, %v7711_v25, 0.0 }
0x2b81   :  { %v7525_v28 = vpop.permute.xlu1 %7524  ;;  %4313 = vadd.xlane.f32.xlu0 %v4312_v20  ;;  %v7520_v30 = vpop.permute.xlu0 %7519  ;;  %v4309_v23 = vsel %vm1233_vm4, %v7713_v2, 0.0 }
0x2b82   :  { %7718 = vpow2.f32 %v4307_v27  ;;  %v7522_v53 = vunpack.i.h.bf16 %v7520_v30  ;;  %7261 = vmatprep.subr.bf16.mxu1 %v7260_v16  ;;  %4310 = vadd.xlane.f32.xlu1 %v4309_v23  ;;  %v7527_v29 = vunpack.i.h.bf16 %v7525_v28  ;;  %v7526_v40 = vunpack.i.l.bf16 %v7525_v28 }
0x2b83   :  { %v7521_v14 = vunpack.i.l.bf16 %v7520_v30  ;;  %7263 = vmatpush3.bf16.msra.mxu1 %v7260_v16  ;;  %7720 = vpow2.f32 %v4305_v26 }
0x2b84   :  { %v7715_v43 = vpop.eup %7714  ;;  %v7268_v8 = vpack.c.bf16 %v7527_v29, %v7526_v40 }
0x2b85   :  { %v7264_v57 = vpack.c.bf16 %v7522_v53, %v7521_v14  ;;  %v4318_v21 = vsel %vm1233_vm4, %v7715_v43, 0.0 }
0x2b86   :  { %4319 = vadd.xlane.f32.xlu0 %v4318_v21 }
0x2b87   :  { %7265 = vmatprep.subr.bf16.mxu1 %v7264_v57 }
0x2b88   :  { %7267 = vmatpush3.bf16.msra.mxu1 %v7264_v57  ;;  %v7717_v51 = vpop.eup %7716 }
0x2b89   :  { %7269 = vmatprep.subr.bf16.mxu1 %v7268_v8  ;;  %v4315_v39 = vsel %vm1233_vm4, %v7717_v51, 0.0 }
0x2b8a   :  { %4316 = vadd.xlane.f32.xlu1 %v4315_v39 }
0x2b8c   :  { %v7719_v54 = vpop.eup %7718  ;;  %7271 = vmatpush3.bf16.msra.mxu1 %v7268_v8 }
0x2b8d   :  { %v4324_v55 = vsel %vm1233_vm4, %v7719_v54, 0.0  ;;  %v7721_v41 = vpop.eup %7720 }
0x2b8e   :  { %4325 = vadd.xlane.f32.xlu0 %v4324_v55  ;;  %v4321_v42 = vsel %vm1233_vm4, %v7721_v41, 0.0 }
0x2b92   :  { %4322 = vadd.xlane.f32.xlu0 %v4321_v42 }
0x2b9b   :  { %7534 = vrot.lane.b32.xlu1 %v8852_v49, %s7840_s28 }
0x2b9f   :  { %7539 = vrot.lane.b32.xlu1 %v8856_v33, %s7840_s28 }
0x2ba3   :  { %4470 = vrot.lane.b32.xlu1 %v8846_v9, %s7841_s30 }
0x2ba7   :  { %4472 = vrot.lane.b32.xlu1 %v8878_v46, %s7841_s30 }
0x2ba8   :  { %7529 = vrot.lane.b32.xlu0 %v8844_v1, %s7840_s28 }
0x2bab   :  { %4476 = vrot.lane.b32.xlu1 %v8886_v35, %s7841_s30 }
0x2bac   :  { %4474 = vrot.lane.b32.xlu0 %v8880_v56, %s7841_s30 }
0x2baf   :  { %4480 = vrot.lane.b32.xlu1 %v8894_v36, %s7841_s30 }
0x2bb0   :  { %4478 = vrot.lane.b32.xlu0 %v8888_v48, %s7841_s30 }
0x2c0e   :  { %v4314_v13 = vpop.xlane.xlu0 %4313 }
0x2c0f   :  { %7722 = vrcp.f32 %v4314_v13  ;;  %v4311_v17 = vpop.xlane.xlu1 %4310 }
0x2c10   :  { %7724 = vrcp.f32 %v4311_v17 }
0x2c13   :  { %v4320_v38 = vpop.xlane.xlu0 %4319 }
0x2c14   :  { %7726 = vrcp.f32 %v4320_v38 }
0x2c17   :  { %v4317_v45 = vpop.xlane.xlu1 %4316 }
0x2c18   :  { %7728 = vrcp.f32 %v4317_v45 }
0x2c19   :  { %v7723_v9 = vpop.eup %7722 }
0x2c1a   :  { %v7725_v46 = vpop.eup %7724  ;;  %v4334_v26 = vmul.f32 %v7723_v9, %v7711_v25 }
0x2c1b   :  { %v4326_v52 = vpop.xlane.xlu0 %4325  ;;  %v4333_v34 = vmul.f32 %v7725_v46, %v7713_v2  ;;  %v7535_v35 = vpop.permute.xlu1 %7534 }
0x2c1c   :  { %7730 = vrcp.f32 %v4326_v52  ;;  %v7537_v16 = vunpack.i.h.bf16 %v7535_v35  ;;  %v7536_v20 = vunpack.i.l.bf16 %v7535_v35 }
0x2c1d   :  { %6763 = vmatprep.mubr.msk.f32.mxu1 %vm1233_vm4, %v4333_v34 }
0x2c1e   :  { %6764 = vmatmul.mubr.msk.f32.vlgmr.msra.gmra.mrb[56].mxu1 %vm1233_vm4, %v4334_v26  ;;  %v7727_v48 = vpop.eup %7726  ;;  %v7278_v25 = vpack.c.bf16 %v7537_v16, %v7536_v20 }
0x2c1f   :  { %v4323_v56 = vpop.xlane.xlu0 %4322  ;;  %v4336_v53 = vmul.f32 %v7727_v48, %v7715_v43  ;;  %v7540_v2 = vpop.permute.xlu1 %7539 }
0x2c20   :  { %7732 = vrcp.f32 %v4323_v56  ;;  %v7542_v43 = vunpack.i.h.bf16 %v7540_v2  ;;  %v7541_v21 = vunpack.i.l.bf16 %v7540_v2 }
0x2c22   :  { %v7729_v36 = vpop.eup %7728  ;;  %v7284_v39 = vpack.c.bf16 %v7542_v43, %v7541_v21 }
0x2c23   :  { %v7530_v27 = vpop.permute.xlu0 %7529  ;;  %v4335_v23 = vmul.f32 %v7729_v36, %v7717_v51  ;;  %v4471_v51 = vpop.permute.xlu1 %4470 }
0x2c24   :  { %v7532_v28 = vunpack.i.h.bf16 %v7530_v27  ;;  %v7531_v30 = vunpack.i.l.bf16 %v7530_v27 }
0x2c25   :  { %6766 = vmatprep.mubr.msk.f32.mxu1 %vm1233_vm4, %v4335_v23 }
0x2c26   :  { %v7272_v29 = vpack.c.bf16 %v7532_v28, %v7531_v30  ;;  %6767 = vmatmul.mubr.msk.f32.gmra.mrb[58].mxu1 %vm1233_vm4, %v4336_v53  ;;  %v7731_v40 = vpop.eup %7730 }
0x2c27   :  { %v4338_v8 = vmul.f32 %v7731_v40, %v7719_v54  ;;  %v4473_v55 = vpop.permute.xlu1 %4472 }
0x2c28   :  { %7274 = vmatprep.subr.msk.bf16.mxu1 %vm8862_vm6, %v7272_v29 }
0x2c29   :  { %7277 = vmatpush3.bf16.xpose.msk.msra.mxu1 %vm8862_vm6, %v7272_v29 }
0x2c2a   :  { %v7733_v14 = vpop.eup %7732  ;;  %7280 = vmatprep.subr.msk.bf16.mxu1 %vm8862_vm6, %v7278_v25 }
0x2c2b   :  { %v4337_v57 = vmul.f32 %v7733_v14, %v7721_v41  ;;  %v4475_v41 = vpop.permute.xlu0 %4474  ;;  %v4477_v54 = vpop.permute.xlu1 %4476 }
0x2c2d   :  { %6769 = vmatprep.mubr.msk.f32.mxu1 %vm1233_vm4, %v4337_v57 }
0x2c2e   :  { %6770 = vmatmul.mubr.msk.f32.gmra.mrb[60].mxu1 %vm1233_vm4, %v4338_v8 }
0x2c2f   :  { %6784 = vmatprep.mubr.msk.f32.mxu1 %vm3467_vm5, %v4471_v51  ;;  %v4479_v42 = vpop.permute.xlu0 %4478  ;;  %v4481_v13 = vpop.permute.xlu1 %4480 }
0x2c31   :  { %7283 = vmatpush3.bf16.xpose.msk.msra.mxu1 %vm8862_vm6, %v7278_v25 }
0x2c32   :  { %7286 = vmatprep.subr.msk.bf16.mxu1 %vm8862_vm6, %v7284_v39 }
0x2c39   :  { %7289 = vmatpush3.bf16.xpose.msk.msra.mxu1 %vm8862_vm6, %v7284_v39 }
0x2c40   :  { %6785 = vmatmul.mubr.msk.f32.vlgmr.msra.gmra.mrb[62].mxu1 %vm3467_vm5, %v4473_v55 }
0x2c41   :  { %6787 = vmatprep.mubr.msk.f32.mxu1 %vm3467_vm5, %v4475_v41 }
0x2c44   :  { %6788 = vmatmul.mubr.msk.f32.gmra.mrb[64].mxu1 %vm3467_vm5, %v4477_v54 }
0x2c45   :  { %6790 = vmatprep.mubr.msk.f32.mxu1 %vm3467_vm5, %v4479_v42 }
0x2c48   :  { %6791 = vmatmul.mubr.msk.f32.gmra.mrb[66].mxu1 %vm3467_vm5, %v4481_v13 }
0x2cf1   :  { %v9129_v17 = vpop.f32.mrb[56].mxu1 }
0x2cf2   :  { %v9131_v38 = vpop.f32.mrb[57].mxu1 }
0x2cf9   :  { %v9133_v44 = vpop.f32.mrb[58].mxu1 }
0x2cfa   :  { %v9135_v45 = vpop.f32.mrb[59].mxu1 }
0x2d01   :  { %v9137_v9 = vpop.f32.mrb[60].mxu1 }
0x2d02   :  { %v9139_v46 = vpop.f32.mrb[61].mxu1 }
0x2d13   :  { %v6786_v52 = vpop.f32.mrb[62].mxu1 }
0x2d14   :  { %v4590_v34 = vadd.f32 %v6786_v52, %v8901_v60  ;;  %v4584_v26 = vpop.f32.mrb[63].mxu1 }
0x2d15   :  { %v4585_v56 = vadd.f32 %v4584_v26, %v8906_v24 }
0x2d16   :  { %v4616_v35 = vsel %vm1233_vm4, %v4590_v34, -inf }
0x2d17   :  { %4617 = vmax.xlane.f32.xlu1 %v4616_v35  ;;  %v6789_v48 = vpop.f32.mrb[64].mxu1  ;;  %v4613_v36 = vsel %vm1233_vm4, %v4585_v56, -inf }
0x2d18   :  { %v4594_v16 = vpop.f32.mrb[65].mxu1  ;;  %4614 = vmax.xlane.f32.xlu0 %v4613_v36  ;;  %v4600_v20 = vadd.f32 %v6789_v48, %v8913_v7 }
0x2d19   :  { %v4595_v27 = vadd.f32 %v4594_v16, %v8921_v61 }
0x2d1a   :  { %v4622_v29 = vsel %vm1233_vm4, %v4600_v20, -inf }
0x2d1b   :  { %v6792_v28 = vpop.f32.mrb[66].mxu1  ;;  %v4619_v30 = vsel %vm1233_vm4, %v4595_v27, -inf }
0x2d1c   :  { %v4604_v23 = vpop.f32.mrb[67].mxu1  ;;  %4620 = vmax.xlane.f32.xlu0 %v4619_v30  ;;  %v4610_v24 = vadd.f32 %v6792_v28, %v8933_v5 }
0x2d1d   :  { %v4605_v60 = vadd.f32 %v4604_v23, %v8926_v62 }
0x2d1e   :  { %v4628_v25 = vsel %vm1233_vm4, %v4610_v24, -inf }
0x2d1f   :  { %v4625_v53 = vsel %vm1233_vm4, %v4605_v60, -inf }
0x2d20   :  { %4626 = vmax.xlane.f32.xlu1 %v4625_v53  ;;  %4623 = vmax.xlane.f32.xlu0 %v4622_v29 }
0x2d24   :  { %4629 = vmax.xlane.f32.xlu0 %v4628_v25 }
0x2d31   :  { %7544 = vrot.lane.b32.xlu1 %v8844_v1, %s7842_s17 }
0x2da4   :  { %v4618_v7 = vpop.xlane.xlu1 %4617 }
0x2da5   :  { %v4632_v61 = vsub.f32 %v4590_v34, %v4618_v7  ;;  %v4615_v2 = vpop.xlane.xlu0 %4614 }
0x2da6   :  { %v4631_v40 = vsub.f32 %v4585_v56, %v4615_v2 }
0x2da7   :  { %v4639_v62 = vmul.f32 1.442695, %v4632_v61 }
0x2da8   :  { %v4637_v14 = vmul.f32 1.442695, %v4631_v40 }
0x2da9   :  { %7734 = vpow2.f32 %v4639_v62  ;;  %v4621_v5 = vpop.xlane.xlu0 %4620 }
0x2daa   :  { %7736 = vpow2.f32 %v4637_v14  ;;  %v4633_v57 = vsub.f32 %v4595_v27, %v4621_v5 }
0x2dac   :  { %v4641_v43 = vmul.f32 1.442695, %v4633_v57 }
0x2dad   :  { %v4627_v21 = vpop.xlane.xlu1 %4626  ;;  %v4624_v8 = vpop.xlane.xlu0 %4623 }
0x2dae   :  { %7738 = vpow2.f32 %v4641_v43  ;;  %v4635_v51 = vsub.f32 %v4605_v60, %v4627_v21  ;;  %v4634_v39 = vsub.f32 %v4600_v20, %v4624_v8  ;;  %v4901_v21 = vld [vmem:[%s9521_s9 + $0x90] sm:$0xff]  ;;  %v4902_v8 = vld [vmem:[%s9521_s9 + $0x98] sm:$0xff] }
0x2db0   :  { %v4645_v55 = vmul.f32 1.442695, %v4635_v51  ;;  %v4643_v41 = vmul.f32 1.442695, %v4634_v39  ;;  %v4903_v51 = vld [vmem:[%s9521_s9 + $0xa0] sm:$0xff]  ;;  %v7302_v39 = vpack.c.bf16 %v4902_v8, %v4901_v21 }
0x2db1   :  { %v7545_v54 = vpop.permute.xlu1 %7544  ;;  %v4630_v1 = vpop.xlane.xlu0 %4629 }
0x2db2   :  { %7740 = vpow2.f32 %v4645_v55  ;;  %v7547_v42 = vunpack.i.h.bf16 %v7545_v54  ;;  %v7546_v13 = vunpack.i.l.bf16 %v7545_v54  ;;  %v4636_v52 = vsub.f32 %v4610_v24, %v4630_v1  ;;  %v4904_v55 = vld [vmem:[%s9521_s9 + $0xa8] sm:$0xff] }
0x2db3   :  { %v9155_v34 = vpop.eup %7734  ;;  %7742 = vpow2.f32 %v4643_v41  ;;  %v7306_v41 = vpack.c.bf16 %v4904_v55, %v4903_v51 }
0x2db4   :  { %v7737_v26 = vpop.eup %7736  ;;  %v7290_v56 = vpack.c.bf16 %v7547_v42, %v7546_v13  ;;  %v4647_v35 = vmul.f32 1.442695, %v4636_v52  ;;  %v4652_v48 = vsel %vm1233_vm4, %v9155_v34, 0.0 }
0x2db5   :  { %4653 = vadd.xlane.f32.xlu0 %v4652_v48  ;;  %v4649_v36 = vsel %vm1233_vm4, %v7737_v26, 0.0 }
0x2db6   :  { %7744 = vpow2.f32 %v4647_v35  ;;  %7291 = vmatprep.subr.bf16.mxu0 %v7290_v56  ;;  %4650 = vadd.xlane.f32.xlu1 %v4649_v36 }
0x2db7   :  { %7293 = vmatpush3.bf16.msra.mxu0 %v7290_v56 }
0x2db8   :  { %v7739_v16 = vpop.eup %7738 }
0x2db9   :  { %v4655_v27 = vsel %vm1233_vm4, %v7739_v16, 0.0 }
0x2dba   :  { %4656 = vadd.xlane.f32.xlu1 %v4655_v27 }
0x2dbc   :  { %v7741_v20 = vpop.eup %7740 }
0x2dbd   :  { %v7743_v28 = vpop.eup %7742  ;;  %v4661_v30 = vsel %vm1233_vm4, %v7741_v20, 0.0 }
0x2dbe   :  { %4662 = vadd.xlane.f32.xlu1 %v4661_v30  ;;  %v4658_v23 = vsel %vm1233_vm4, %v7743_v28, 0.0 }
0x2dbf   :  { %4659 = vadd.xlane.f32.xlu0 %v4658_v23 }
0x2dc0   :  { %v7745_v60 = vpop.eup %7744 }
0x2dc1   :  { %v4664_v24 = vsel %vm1233_vm4, %v7745_v60, 0.0 }
0x2dc3   :  { %4665 = vadd.xlane.f32.xlu0 %v4664_v24 }
0x2dcf   :  { %7554 = vrot.lane.b32.xlu1 %v8856_v33, %s7842_s17 }
0x2dd3   :  { %4816 = vrot.lane.b32.xlu1 %v9062_v59, %s7843_s14 }
0x2dd7   :  { %4840 = vrot.lane.b32.xlu1 %v9131_v38, %s7834_s16 }
0x2dd9   :  { %7549 = vrot.lane.b32.xlu0 %v8852_v49, %s7842_s17 }
0x2ddb   :  { %4820 = vrot.lane.b32.xlu1 %v9066_v37, %s7843_s14 }
0x2ddd   :  { %4818 = vrot.lane.b32.xlu0 %v9060_v58, %s7843_s14 }
0x2ddf   :  { %4844 = vrot.lane.b32.xlu1 %v9135_v45, %s7834_s16 }
0x2de1   :  { %4842 = vrot.lane.b32.xlu0 %v9129_v17, %s7834_s16 }
0x2de3   :  { %4824 = vrot.lane.b32.xlu1 %v9070_v0, %s7843_s14 }
0x2de5   :  { %4822 = vrot.lane.b32.xlu0 %v9064_v50, %s7843_s14 }
0x2de7   :  { %4848 = vrot.lane.b32.xlu1 %v9139_v46, %s7834_s16 }
0x2de9   :  { %4846 = vrot.lane.b32.xlu0 %v9133_v44, %s7834_s16 }
0x2ded   :  { %4826 = vrot.lane.b32.xlu0 %v9068_v63, %s7843_s14 }
0x2df1   :  { %4850 = vrot.lane.b32.xlu0 %v9137_v9, %s7834_s16 }
0x2e42   :  { %v4654_v58 = vpop.xlane.xlu0 %4653 }
0x2e43   :  { %v4651_v49 = vpop.xlane.xlu1 %4650 }
0x2e44   :  { %7746 = vrcp.f32 %v4651_v49 }
0x2e45   :  { %7748 = vrcp.f32 %v4654_v58 }
0x2e47   :  { %v4657_v33 = vpop.xlane.xlu1 %4656 }
0x2e48   :  { %7750 = vrcp.f32 %v4657_v33 }
0x2e4b   :  { %v4663_v59 = vpop.xlane.xlu1 %4662 }
0x2e4c   :  { %v4660_v37 = vpop.xlane.xlu0 %4659 }
0x2e4d   :  { %7752 = vrcp.f32 %v4660_v37 }
0x2e4e   :  { %v7747_v0 = vpop.eup %7746  ;;  %7754 = vrcp.f32 %v4663_v59 }
0x2e4f   :  { %v4673_v17 = vmul.f32 %v7747_v0, %v7737_v26  ;;  %v7555_v38 = vpop.permute.xlu1 %7554  ;;  %v7749_v25 = vpop.eup %7748 }
0x2e50   :  { %v4666_v50 = vpop.xlane.xlu0 %4665  ;;  %v7557_v45 = vunpack.i.h.bf16 %v7555_v38  ;;  %v7556_v63 = vunpack.i.l.bf16 %v7555_v38  ;;  %v4674_v61 = vmul.f32 %v7749_v25, %v9155_v34 }
0x2e51   :  { %6805 = vmatprep.mubr.msk.f32.mxu0 %vm1233_vm4, %v4673_v17  ;;  %7756 = vrcp.f32 %v4666_v50 }
0x2e52   :  { %v7298_v29 = vpack.c.bf16 %v7557_v45, %v7556_v63  ;;  %v7751_v7 = vpop.eup %7750 }
0x2e53   :  { %v4675_v40 = vmul.f32 %v7751_v7, %v7739_v16  ;;  %v4817_v56 = vpop.permute.xlu1 %4816 }
0x2e54   :  { %v7550_v44 = vpop.permute.xlu0 %7549  ;;  %v4882_v24 = vsel %vm3467_vm5, %v8987_v10, %v4817_v56 }
0x2e55   :  { %v7552_v46 = vunpack.i.h.bf16 %v7550_v44  ;;  %v7551_v53 = vunpack.i.l.bf16 %v7550_v44 }
0x2e57   :  { %v7294_v9 = vpack.c.bf16 %v7552_v46, %v7551_v53  ;;  %v7753_v2 = vpop.eup %7752  ;;  %v4841_v48 = vpop.permute.xlu1 %4840 }
0x2e58   :  { %v7755_v62 = vpop.eup %7754  ;;  %v4676_v14 = vmul.f32 %v7753_v2, %v7743_v28  ;;  %v4819_v26 = vpop.permute.xlu0 %4818  ;;  %v4888_v33 = vsel %vm414_vm2, %v4882_v24, %v4841_v48 }
0x2e59   :  { %7295 = vmatprep.subr.bf16.mxu0 %v7294_v9  ;;  %v4677_v57 = vmul.f32 %v7755_v62, %v7741_v20  ;;  %v4883_v58 = vsel %vm3467_vm5, %v8985_v6, %v4819_v26 }
0x2e5a   :  { %7297 = vmatpush3.bf16.msra.mxu0 %v7294_v9 }
0x2e5b   :  { %7299 = vmatprep.subr.bf16.mxu0 %v7298_v29  ;;  %v7757_v5 = vpop.eup %7756  ;;  %v4821_v16 = vpop.permute.xlu1 %4820 }
0x2e5c   :  { %v4678_v43 = vmul.f32 %v7757_v5, %v7745_v60  ;;  %v4843_v35 = vpop.permute.xlu0 %4842  ;;  %v4884_v50 = vsel %vm3467_vm5, %v8991_v4, %v4821_v16 }
0x2e5d   :  { %v4889_v37 = vsel %vm414_vm2, %v4883_v58, %v4843_v35 }
0x2e5e   :  { %7301 = vmatpush3.bf16.msra.mxu0 %v7298_v29 }
0x2e5f   :  { %7303 = vmatprep.subr.bf16.mxu0 %v7302_v39  ;;  %v4845_v20 = vpop.permute.xlu1 %4844 }
0x2e60   :  { %v4823_v36 = vpop.permute.xlu0 %4822  ;;  %v4890_v38 = vsel %vm414_vm2, %v4884_v50, %v4845_v20 }
0x2e61   :  { %6806 = vmatmul.mubr.msk.f32.vlgmr.msra.gmra.mrb[46].mxu0 %vm1233_vm4, %v4674_v61  ;;  %v4885_v6 = vsel %vm3467_vm5, %v8989_v3, %v4823_v36 }
0x2e62   :  { %6808 = vmatprep.mubr.msk.f32.mxu0 %vm1233_vm4, %v4675_v40  ;;  %7305 = vmatpush3.bf16.msra.mxu0 %v7302_v39 }
0x2e63   :  { %7307 = vmatprep.subr.bf16.mxu0 %v7306_v41  ;;  %v4825_v30 = vpop.permute.xlu1 %4824 }
0x2e64   :  { %v4847_v27 = vpop.permute.xlu0 %4846  ;;  %v4886_v4 = vsel %vm3467_vm5, %v8995_v12, %v4825_v30  ;;  %v5948_v12 = vld [vmem:[%s9521_s9 + $0xb0] ss:$0 sm:$0xff] }
0x2e65   :  { %6809 = vmatmul.mubr.msk.f32.gmra.mrb[48].mxu0 %vm1233_vm4, %v4676_v14  ;;  %v4891_v45 = vsel %vm414_vm2, %v4885_v6, %v4847_v27 }
0x2e66   :  { %6811 = vmatprep.mubr.msk.f32.mxu0 %vm1233_vm4, %v4677_v57  ;;  %7309 = vmatpush3.bf16.msra.mxu0 %v7306_v41 }
0x2e67   :  { %v4849_v60 = vpop.permute.xlu1 %4848 }
0x2e68   :  { %v4827_v28 = vpop.permute.xlu0 %4826  ;;  %v4892_v9 = vsel %vm414_vm2, %v4886_v4, %v4849_v60  ;;  %v5129_v4 = vld [vmem:[%s9517_s5 + $0x2a8] sm:$0xff] }
0x2e69   :  { %6812 = vmatmul.mubr.msk.f32.gmra.mrb[50].mxu0 %vm1233_vm4, %v4678_v43  ;;  %v4887_v3 = vsel %vm3467_vm5, %v8993_v11, %v4827_v28 }
0x2e6c   :  { %v4851_v23 = vpop.permute.xlu0 %4850 }
0x2e6d   :  { %v4893_v25 = vsel %vm414_vm2, %v4887_v3, %v4851_v23  ;;  %v5131_v3 = vld [vmem:[%s9517_s5 + $0x2b8] sm:$0xff] }
0x2f34   :  { %v6807_v54 = vpop.f32.mrb[46].mxu0 }
0x2f35   :  { %4866 = vrot.lane.b32.xlu0 %v6807_v54, %s7844_s15  ;;  %v4781_v1 = vpop.f32.mrb[47].mxu0 }
0x2f36   :  { %4864 = vrot.lane.b32.xlu1 %v4781_v1, %s7844_s15 }
0x2f38   :  { %v6810_v42 = vpop.f32.mrb[48].mxu0 }
0x2f39   :  { %4870 = vrot.lane.b32.xlu0 %v6810_v42, %s7844_s15  ;;  %v4791_v13 = vpop.f32.mrb[49].mxu0 }
0x2f3a   :  { %4868 = vrot.lane.b32.xlu1 %v4791_v13, %s7844_s15 }
0x2f3c   :  { %v6813_v52 = vpop.f32.mrb[50].mxu0 }
0x2f3d   :  { %4874 = vrot.lane.b32.xlu0 %v6813_v52, %s7844_s15  ;;  %v4801_v34 = vpop.f32.mrb[51].mxu0 }
0x2f3e   :  { %4872 = vrot.lane.b32.xlu1 %v4801_v34, %s7844_s15 }
0x2fa7   :  { %v4867_v49 = vpop.permute.xlu0 %4866 }
0x2fa8   :  { %v4865_v59 = vpop.permute.xlu1 %4864  ;;  %v4896_v17 = vsel %vm4894_vm7, %v4889_v37, %v4867_v49 }
0x2fa9   :  { %v4895_v0 = vsel %vm4894_vm7, %v4888_v33, %v4865_v59 }
0x2faa   :  { %6822 = vmatprep.mubr.msk.f32.mxu0 %vm171_vm1, %v4895_v0 }
0x2fab   :  { %6823 = vmatmul.mubr.msk.f32.vlgmr.msra.gmra.mrb[52].mxu0 %vm171_vm1, %v4896_v17  ;;  %v4871_v10 = vpop.permute.xlu0 %4870 }
0x2fac   :  { %v4869_v44 = vpop.permute.xlu1 %4868  ;;  %v4898_v46 = vsel %vm4894_vm7, %v4891_v45, %v4871_v10 }
0x2fad   :  { %v4897_v63 = vsel %vm4894_vm7, %v4890_v38, %v4869_v44 }
0x2fae   :  { %6825 = vmatprep.mubr.msk.f32.mxu0 %vm171_vm1, %v4897_v63 }
0x2faf   :  { %6826 = vmatmul.mubr.msk.f32.gmra.mrb[54].mxu0 %vm171_vm1, %v4898_v46  ;;  %v4875_v53 = vpop.permute.xlu0 %4874 }
0x2fb0   :  { %v4873_v29 = vpop.permute.xlu1 %4872  ;;  %v4900_v61 = vsel %vm4894_vm7, %v4893_v25, %v4875_v53  ;;  %v5130_v53 = vld [vmem:[%s9517_s5 + $0x2b0] sm:$0xff] }
0x2fb1   :  { %v4899_v7 = vsel %vm4894_vm7, %v4892_v9, %v4873_v29  ;;  %v7310_v9 = vpack.c.bf16 %v5130_v53, %v5129_v4  ;;  %v5132_v29 = vld [vmem:[%s9517_s5 + $0x2c0] sm:$0xff]  ;;  %v5310_v4 = vld [vmem:[%s9521_s9 + $0xf0] sm:$0xff] }
0x2fb2   :  { %6828 = vmatprep.mubr.msk.f32.mxu0 %vm171_vm1, %v4899_v7  ;;  %v7314_v25 = vpack.c.bf16 %v5132_v29, %v5131_v3  ;;  %v5312_v3 = vld [vmem:[%s9521_s9 + $0x100] sm:$0xff] }
0x2fb3   :  { %6829 = vmatmul.mubr.msk.f32.gmra.mrb[56].mxu0 %vm171_vm1, %v4900_v61  ;;  %7311 = vmatprep.subr.bf16.mxu1 %v7310_v9 }
0x2fb4   :  { %7313 = vmatpush3.bf16.msra.mxu1 %v7310_v9  ;;  %v5311_v9 = vld [vmem:[%s9521_s9 + $0xf8] sm:$0xff] }
0x2fb5   :  { %7315 = vmatprep.subr.bf16.mxu1 %v7314_v25  ;;  %v7330_v29 = vpack.c.bf16 %v5312_v3, %v5311_v9 }
0x2fb8   :  { %7317 = vmatpush3.bf16.msra.mxu1 %v7314_v25  ;;  %v5957_v25 = vld [vmem:[%s9517_s5 + $0x2c8] ss:$0 sm:$0xff] }
0x307e   :  { %v6824_v2 = vpop.f32.mrb[52].mxu0 }
0x307f   :  { %v5000_v40 = vadd.f32 %v6824_v2, %v5948_v12  ;;  %v4994_v62 = vpop.f32.mrb[53].mxu0 }
0x3080   :  { %v4995_v14 = vadd.f32 %v5948_v12, %v4994_v62 }
0x3081   :  { %v9239_v11 = vadd.f32 %v5000_v40, %v8739_v18 }
0x3082   :  { %v9242_v5 = vadd.f32 %v4995_v14, %v8741_v19  ;;  %v6827_v57 = vpop.f32.mrb[54].mxu0 }
0x3083   :  { %v5010_v43 = vadd.f32 %v6827_v57, %v5948_v12  ;;  %v5004_v21 = vpop.f32.mrb[55].mxu0  ;;  %v5034_v8 = vsel %vm171_vm1, %v9239_v11, 0.0 }
0x3084   :  { %v5005_v51 = vadd.f32 %v5948_v12, %v5004_v21  ;;  %5035 = vadd.xlane.f32.xlu0 %v5034_v8  ;;  %v5031_v39 = vsel %vm171_vm1, %v9242_v5, 0.0 }
0x3085   :  { %v9249_v55 = vadd.f32 %v5010_v43, %v8758_v31  ;;  %5032 = vadd.xlane.f32.xlu1 %v5031_v39 }
0x3086   :  { %v9252_v18 = vadd.f32 %v5005_v51, %v8753_v22  ;;  %v6830_v19 = vpop.f32.mrb[56].mxu0 }
0x3087   :  { %v5020_v41 = vadd.f32 %v6830_v19, %v5948_v12  ;;  %v5014_v54 = vpop.f32.mrb[57].mxu0  ;;  %v5040_v1 = vsel %vm171_vm1, %v9249_v55, 0.0 }
0x3088   :  { %v5015_v42 = vadd.f32 %v5948_v12, %v5014_v54  ;;  %v5037_v13 = vsel %vm171_vm1, %v9252_v18, 0.0 }
0x3089   :  { %v9259_v52 = vadd.f32 %v5020_v41, %v8767_v47  ;;  %5038 = vadd.xlane.f32.xlu0 %v5037_v13  ;;  %5041 = vadd.xlane.f32.xlu1 %v5040_v1 }
0x308a   :  { %v9262_v31 = vadd.f32 %v5015_v42, %v8765_v15 }
0x308b   :  { %v5046_v22 = vsel %vm171_vm1, %v9259_v52, 0.0 }
0x308c   :  { %v5043_v34 = vsel %vm171_vm1, %v9262_v31, 0.0 }
0x308d   :  { %5044 = vadd.xlane.f32.xlu0 %v5043_v34  ;;  %5047 = vadd.xlane.f32.xlu1 %v5046_v22  ;;  %v5955_v22 = vld [vmem:[%s9521_s9 + $0xb8] ss:$0 sm:$0xff] }
0x3111   :  { %v5036_v26 = vpop.xlane.xlu0 %5035 }
0x3112   :  { %v5050_v56 = vmul.f32 0.03125, %v5036_v26  ;;  %v5033_v35 = vpop.xlane.xlu1 %5032 }
0x3113   :  { %v5049_v48 = vmul.f32 0.03125, %v5033_v35  ;;  %v5956_v35 = vld [vmem:[%s9521_s9 + $0xc0] ss:$0 sm:$0xff] }
0x3114   :  { %v9269_v47 = vsub.f32 %v9239_v11, %v5050_v56 }
0x3115   :  { %v9272_v36 = vsub.f32 %v9242_v5, %v5049_v48 }
0x3116   :  { %v5039_v15 = vpop.xlane.xlu0 %5038  ;;  %v5042_v16 = vpop.xlane.xlu1 %5041  ;;  %v5062_v27 = vmul.f32 %v9269_v47, %v9269_v47 }
0x3117   :  { %v5051_v20 = vmul.f32 0.03125, %v5039_v15  ;;  %v5052_v28 = vmul.f32 0.03125, %v5042_v16  ;;  %v5061_v30 = vmul.f32 %v9272_v36, %v9272_v36 }
0x3118   :  { %v5070_v23 = vsel %vm171_vm1, %v5062_v27, 0.0 }
0x3119   :  { %v9280_v60 = vsub.f32 %v9252_v18, %v5051_v20  ;;  %v9283_v24 = vsub.f32 %v9249_v55, %v5052_v28  ;;  %5071 = vadd.xlane.f32.xlu1 %v5070_v23  ;;  %v5067_v49 = vsel %vm171_vm1, %v5061_v30, 0.0 }
0x311a   :  { %v5045_v33 = vpop.xlane.xlu0 %5044  ;;  %5068 = vadd.xlane.f32.xlu0 %v5067_v49  ;;  %v5048_v58 = vpop.xlane.xlu1 %5047 }
0x311b   :  { %v5053_v59 = vmul.f32 0.03125, %v5045_v33  ;;  %v5054_v37 = vmul.f32 0.03125, %v5048_v58  ;;  %v5063_v0 = vmul.f32 %v9280_v60, %v9280_v60  ;;  %v5064_v17 = vmul.f32 %v9283_v24, %v9283_v24 }
0x311d   :  { %v9291_v50 = vsub.f32 %v9262_v31, %v5053_v59  ;;  %v9294_v10 = vsub.f32 %v9259_v52, %v5054_v37  ;;  %v5073_v38 = vsel %vm171_vm1, %v5063_v0, 0.0  ;;  %v5076_v6 = vsel %vm171_vm1, %v5064_v17, 0.0 }
0x311e   :  { %5074 = vadd.xlane.f32.xlu0 %v5073_v38  ;;  %5077 = vadd.xlane.f32.xlu1 %v5076_v6  ;;  %v5305_v6 = vld [vmem:[%s9521_s9 + $0xc8] sm:$0xff] }
0x311f   :  { %v5065_v44 = vmul.f32 %v9291_v50, %v9291_v50  ;;  %v5066_v45 = vmul.f32 %v9294_v10, %v9294_v10 }
0x3121   :  { %v5079_v63 = vsel %vm171_vm1, %v5065_v44, 0.0  ;;  %v5082_v46 = vsel %vm171_vm1, %v5066_v45, 0.0  ;;  %v5307_v44 = vld [vmem:[%s9521_s9 + $0xd8] sm:$0xff]  ;;  %v5308_v45 = vld [vmem:[%s9521_s9 + $0xe0] sm:$0xff] }
0x3122   :  { %5080 = vadd.xlane.f32.xlu0 %v5079_v63  ;;  %5083 = vadd.xlane.f32.xlu1 %v5082_v46  ;;  %v7322_v63 = vpack.c.bf16 %v5308_v45, %v5307_v44  ;;  %v5309_v46 = vld [vmem:[%s9521_s9 + $0xe8] sm:$0xff] }
0x3123   :  { %v7326_v53 = vpack.c.bf16 %v5310_v4, %v5309_v46 }
0x31a6   :  { %v5072_v7 = vpop.xlane.xlu1 %5071 }
0x31a7   :  { %v5086_v61 = vmul.f32 0.03125, %v5072_v7  ;;  %v5069_v12 = vpop.xlane.xlu0 %5068 }
0x31a8   :  { %v5085_v2 = vmul.f32 0.03125, %v5069_v12 }
0x31a9   :  { %v5092_v40 = vadd.f32 1e-05, %v5086_v61 }
0x31aa   :  { %v5091_v62 = vadd.f32 1e-05, %v5085_v2 }
0x31ab   :  { %7758 = vrsqrt.f32 %v5092_v40  ;;  %v5075_v14 = vpop.xlane.xlu0 %5074  ;;  %v5078_v57 = vpop.xlane.xlu1 %5077 }
0x31ac   :  { %7760 = vrsqrt.f32 %v5091_v62  ;;  %v5087_v43 = vmul.f32 0.03125, %v5075_v14  ;;  %v5088_v21 = vmul.f32 0.03125, %v5078_v57 }
0x31ae   :  { %v5093_v8 = vadd.f32 1e-05, %v5087_v43  ;;  %v5094_v51 = vadd.f32 1e-05, %v5088_v21 }
0x31af   :  { %v5081_v39 = vpop.xlane.xlu0 %5080  ;;  %v5084_v19 = vpop.xlane.xlu1 %5083 }
0x31b0   :  { %7762 = vrsqrt.f32 %v5093_v8  ;;  %v5089_v41 = vmul.f32 0.03125, %v5081_v39  ;;  %v5090_v54 = vmul.f32 0.03125, %v5084_v19 }
0x31b1   :  { %7764 = vrsqrt.f32 %v5094_v51 }
0x31b2   :  { %v5095_v1 = vadd.f32 1e-05, %v5089_v41  ;;  %v5096_v42 = vadd.f32 1e-05, %v5090_v54 }
0x31b4   :  { %7766 = vrsqrt.f32 %v5095_v1 }
0x31b5   :  { %v7759_v13 = vpop.eup %7758  ;;  %7768 = vrsqrt.f32 %v5096_v42 }
0x31b6   :  { %v7761_v34 = vpop.eup %7760  ;;  %v5104_v26 = vmul.f32 %v7759_v13, %v9269_v47 }
0x31b7   :  { %v5103_v56 = vmul.f32 %v7761_v34, %v9272_v36 }
0x31b8   :  { %v5114_v48 = vmul.f32 %v5955_v22, %v5104_v26 }
0x31b9   :  { %v5113_v15 = vmul.f32 %v5955_v22, %v5103_v56 }
0x31ba   :  { %v7763_v16 = vpop.eup %7762  ;;  %v5124_v30 = vadd.f32 %v5956_v35, %v5114_v48 }
0x31bb   :  { %v7765_v27 = vpop.eup %7764  ;;  %v5123_v20 = vadd.f32 %v5956_v35, %v5113_v15  ;;  %v5105_v28 = vmul.f32 %v7763_v16, %v9280_v60 }
0x31bc   :  { %v5106_v23 = vmul.f32 %v7765_v27, %v9283_v24 }
0x31bd   :  { %6839 = vmatprep.mubr.msk.f32.mxu1 %vm171_vm1, %v5123_v20  ;;  %v5115_v49 = vmul.f32 %v5955_v22, %v5105_v28 }
0x31be   :  { %v7767_v47 = vpop.eup %7766  ;;  %6840 = vmatmul.mubr.msk.f32.vlgmr.msra.gmra.mrb[68].mxu1 %vm171_vm1, %v5124_v30  ;;  %v5116_v36 = vmul.f32 %v5955_v22, %v5106_v23 }
0x31bf   :  { %v7769_v33 = vpop.eup %7768  ;;  %v5125_v58 = vadd.f32 %v5956_v35, %v5115_v49  ;;  %v5107_v59 = vmul.f32 %v7767_v47, %v9291_v50  ;;  %v5306_v50 = vld [vmem:[%s9521_s9 + $0xd0] sm:$0xff] }
0x31c0   :  { %v5126_v37 = vadd.f32 %v5956_v35, %v5116_v36  ;;  %v5108_v0 = vmul.f32 %v7769_v33, %v9294_v10  ;;  %v7318_v10 = vpack.c.bf16 %v5306_v50, %v5305_v6 }
0x31c1   :  { %6842 = vmatprep.mubr.msk.f32.mxu1 %vm171_vm1, %v5125_v58  ;;  %v5117_v60 = vmul.f32 %v5955_v22, %v5107_v59 }
0x31c2   :  { %6843 = vmatmul.mubr.msk.f32.gmra.mrb[70].mxu1 %vm171_vm1, %v5126_v37  ;;  %v5118_v24 = vmul.f32 %v5955_v22, %v5108_v0  ;;  %7319 = vmatprep.subr.bf16.mxu0 %v7318_v10 }
0x31c3   :  { %v5127_v17 = vadd.f32 %v5956_v35, %v5117_v60  ;;  %7321 = vmatpush3.bf16.msra.mxu0 %v7318_v10 }
0x31c4   :  { %v5128_v38 = vadd.f32 %v5956_v35, %v5118_v24  ;;  %7323 = vmatprep.subr.bf16.mxu0 %v7322_v63 }
0x31c5   :  { %6845 = vmatprep.mubr.msk.f32.mxu1 %vm171_vm1, %v5127_v17 }
0x31c6   :  { %6846 = vmatmul.mubr.msk.f32.gmra.mrb[72].mxu1 %vm171_vm1, %v5128_v38 }
0x31c7   :  { %7325 = vmatpush3.bf16.msra.mxu0 %v7322_v63 }
0x31c8   :  { %7327 = vmatprep.subr.bf16.mxu0 %v7326_v53 }
0x31cb   :  { %7329 = vmatpush3.bf16.msra.mxu0 %v7326_v53 }
0x31cc   :  { %7331 = vmatprep.subr.bf16.mxu0 %v7330_v29 }
0x31cf   :  { %7333 = vmatpush3.bf16.msra.mxu0 %v7330_v29 }
0x3291   :  { %v6841_v7 = vpop.f32.mrb[68].mxu1 }
0x3292   :  { %v5228_v61 = vadd.f32 %v6841_v7, %v5957_v25  ;;  %v5222_v12 = vpop.f32.mrb[69].mxu1 }
0x3293   :  { %v5223_v2 = vadd.f32 %v5957_v25, %v5222_v12 }
0x3294   :  { %v5252_v40 = vmul.f32 %v5228_v61, %v5228_v61 }
0x3295   :  { %v5251_v62 = vmul.f32 %v5223_v2, %v5223_v2  ;;  %v6844_v14 = vpop.f32.mrb[70].mxu1 }
0x3296   :  { %v5258_v57 = vmul.f32 %v5252_v40, %v5228_v61  ;;  %v5238_v43 = vadd.f32 %v6844_v14, %v5957_v25  ;;  %v5232_v21 = vpop.f32.mrb[71].mxu1 }
0x3297   :  { %v5257_v8 = vmul.f32 %v5251_v62, %v5223_v2  ;;  %v5233_v51 = vadd.f32 %v5957_v25, %v5232_v21 }
0x3298   :  { %v5264_v39 = vmul.f32 0.044715, %v5258_v57  ;;  %v5254_v19 = vmul.f32 %v5238_v43, %v5238_v43 }
0x3299   :  { %v5263_v41 = vmul.f32 0.044715, %v5257_v8  ;;  %v5253_v54 = vmul.f32 %v5233_v51, %v5233_v51  ;;  %v6847_v1 = vpop.f32.mrb[72].mxu1  ;;  %v5964_v8 = vld [vmem:[%s9521_s9 + $0x108] ss:$0 sm:$0xff] }
0x329a   :  { %v5270_v42 = vadd.f32 %v5264_v39, %v5228_v61  ;;  %v5260_v13 = vmul.f32 %v5254_v19, %v5238_v43  ;;  %v5248_v22 = vadd.f32 %v6847_v1, %v5957_v25  ;;  %v5242_v34 = vpop.f32.mrb[73].mxu1 }
0x329b   :  { %v5269_v26 = vadd.f32 %v5263_v41, %v5223_v2  ;;  %v5259_v56 = vmul.f32 %v5253_v54, %v5233_v51  ;;  %v5243_v35 = vadd.f32 %v5957_v25, %v5242_v34 }
0x329c   :  { %v5276_v48 = vmul.f32 0.7978846, %v5270_v42  ;;  %v5266_v15 = vmul.f32 0.044715, %v5260_v13  ;;  %v5256_v16 = vmul.f32 %v5248_v22, %v5248_v22 }
0x329d   :  { %v5275_v27 = vmul.f32 0.7978846, %v5269_v26  ;;  %v5265_v20 = vmul.f32 0.044715, %v5259_v56  ;;  %v5255_v28 = vmul.f32 %v5243_v35, %v5243_v35 }
0x329e   :  { %7770 = vtanh.f32 %v5276_v48  ;;  %v5272_v30 = vadd.f32 %v5266_v15, %v5238_v43  ;;  %v5262_v23 = vmul.f32 %v5256_v16, %v5248_v22 }
0x329f   :  { %7772 = vtanh.f32 %v5275_v27  ;;  %v5271_v49 = vadd.f32 %v5265_v20, %v5233_v51  ;;  %v5261_v47 = vmul.f32 %v5255_v28, %v5243_v35 }
0x32a0   :  { %v5278_v36 = vmul.f32 0.7978846, %v5272_v30  ;;  %v5268_v33 = vmul.f32 0.044715, %v5262_v23 }
0x32a1   :  { %v5277_v58 = vmul.f32 0.7978846, %v5271_v49  ;;  %v5267_v59 = vmul.f32 0.044715, %v5261_v47 }
0x32a2   :  { %7774 = vtanh.f32 %v5278_v36  ;;  %v5274_v37 = vadd.f32 %v5268_v33, %v5248_v22 }
0x32a3   :  { %7776 = vtanh.f32 %v5277_v58  ;;  %v5273_v0 = vadd.f32 %v5267_v59, %v5243_v35 }
0x32a4   :  { %v5280_v60 = vmul.f32 0.7978846, %v5274_v37 }
0x32a5   :  { %v5279_v24 = vmul.f32 0.7978846, %v5273_v0 }
0x32a6   :  { %7778 = vtanh.f32 %v5280_v60 }
0x32a7   :  { %7780 = vtanh.f32 %v5279_v24 }
0x32a8   :  { %v7771_v17 = vpop.eup %7770 }
0x32a9   :  { %v7773_v38 = vpop.eup %7772  ;;  %v5288_v6 = vadd.f32 1.0, %v7771_v17 }
0x32aa   :  { %v5287_v50 = vadd.f32 1.0, %v7773_v38 }
0x32ab   :  { %v5294_v10 = vmul.f32 0.5, %v5288_v6 }
0x32ac   :  { %v7775_v44 = vpop.eup %7774  ;;  %v5293_v45 = vmul.f32 0.5, %v5287_v50 }
0x32ad   :  { %v7777_v63 = vpop.eup %7776  ;;  %v5290_v46 = vadd.f32 1.0, %v7775_v44  ;;  %v5300_v9 = vmul.f32 %v5294_v10, %v5228_v61 }
0x32ae   :  { %v5299_v4 = vmul.f32 %v5293_v45, %v5223_v2  ;;  %v5289_v53 = vadd.f32 1.0, %v7777_v63 }
0x32af   :  { %v5296_v3 = vmul.f32 0.5, %v5290_v46 }
0x32b0   :  { %v7779_v29 = vpop.eup %7778  ;;  %6864 = vmatprep.mubr.msk.f32.mxu0 %vm61_vm0, %v5299_v4  ;;  %v5295_v25 = vmul.f32 0.5, %v5289_v53 }
0x32b1   :  { %v7781_v7 = vpop.eup %7780  ;;  %6865 = vmatmul.mubr.msk.f32.vlgmr.msra.gmra.mrb[58].mxu0 %vm61_vm0, %v5300_v9  ;;  %v5292_v12 = vadd.f32 1.0, %v7779_v29  ;;  %v5302_v14 = vmul.f32 %v5296_v3, %v5238_v43 }
0x32b2   :  { %v5301_v40 = vmul.f32 %v5295_v25, %v5233_v51  ;;  %v5291_v62 = vadd.f32 1.0, %v7781_v7 }
0x32b3   :  { %v5298_v57 = vmul.f32 0.5, %v5292_v12  ;;  %v5537_v12 = vld [vmem:[%s9517_s5 + $0x2d0] sm:$0xff] }
0x32b4   :  { %6867 = vmatprep.mubr.msk.f32.mxu0 %vm61_vm0, %v5301_v40  ;;  %v5297_v21 = vmul.f32 0.5, %v5291_v62  ;;  %v5538_v40 = vld [vmem:[%s9517_s5 + $0x2d8] sm:$0xff] }
0x32b5   :  { %6868 = vmatmul.mubr.msk.f32.gmra.mrb[60].mxu0 %vm61_vm0, %v5302_v14  ;;  %v5304_v61 = vmul.f32 %v5298_v57, %v5248_v22  ;;  %v7334_v62 = vpack.c.bf16 %v5538_v40, %v5537_v12  ;;  %v5539_v14 = vld [vmem:[%s9517_s5 + $0x2e0] sm:$0xff]  ;;  %v5540_v57 = vld [vmem:[%s9517_s5 + $0x2e8] sm:$0xff]  ;;  %v5661_v40 = vld [vmem:[%s9513_s1 + $0x10] sm:$0xff] }
0x32b6   :  { %v5303_v2 = vmul.f32 %v5297_v21, %v5243_v35  ;;  %v7338_v21 = vpack.c.bf16 %v5540_v57, %v5539_v14 }
0x32b7   :  { %7335 = vmatprep.subr.bf16.mxu1 %v7334_v62 }
0x32b8   :  { %6870 = vmatprep.mubr.msk.f32.mxu0 %vm61_vm0, %v5303_v2  ;;  %7337 = vmatpush3.bf16.msra.mxu1 %v7334_v62 }
0x32b9   :  { %6871 = vmatmul.mubr.msk.f32.gmra.mrb[62].mxu0 %vm61_vm0, %v5304_v61  ;;  %7339 = vmatprep.subr.bf16.mxu1 %v7338_v21 }
0x32bc   :  { %7341 = vmatpush3.bf16.msra.mxu1 %v7338_v21 }
0x3384   :  { %v6866_v39 = vpop.f32.mrb[58].mxu0 }
0x3385   :  { %v5408_v51 = vadd.f32 %v6866_v39, %v5964_v8  ;;  %v5402_v19 = vpop.f32.mrb[59].mxu0 }
0x3386   :  { %v5403_v43 = vadd.f32 %v5964_v8, %v5402_v19 }
0x3387   :  { %v5432_v41 = vadd.f32 %v5408_v51, %v9239_v11 }
0x3388   :  { %v5431_v54 = vadd.f32 %v5403_v43, %v9242_v5  ;;  %v6869_v1 = vpop.f32.mrb[60].mxu0 }
0x3389   :  { %v5418_v42 = vadd.f32 %v6869_v1, %v5964_v8  ;;  %v5412_v13 = vpop.f32.mrb[61].mxu0  ;;  %v5442_v22 = vsel %vm171_vm1, %v5432_v41, 0.0 }
0x338a   :  { %v5413_v34 = vadd.f32 %v5964_v8, %v5412_v13  ;;  %5443 = vadd.xlane.f32.xlu1 %v5442_v22  ;;  %v5439_v26 = vsel %vm171_vm1, %v5431_v54, 0.0 }
0x338b   :  { %v5434_v56 = vadd.f32 %v5418_v42, %v9249_v55  ;;  %5440 = vadd.xlane.f32.xlu0 %v5439_v26 }
0x338c   :  { %v5433_v35 = vadd.f32 %v5413_v34, %v9252_v18  ;;  %v6872_v48 = vpop.f32.mrb[62].mxu0 }
0x338d   :  { %v5428_v15 = vadd.f32 %v6872_v48, %v5964_v8  ;;  %v5422_v16 = vpop.f32.mrb[63].mxu0  ;;  %v5448_v11 = vsel %vm171_vm1, %v5434_v56, 0.0 }
0x338e   :  { %v5423_v5 = vadd.f32 %v5964_v8, %v5422_v16  ;;  %5449 = vadd.xlane.f32.xlu1 %v5448_v11  ;;  %v5445_v27 = vsel %vm171_vm1, %v5433_v35, 0.0  ;;  %v5971_v16 = vld [vmem:[%s9521_s9 + $0x110] ss:$0 sm:$0xff] }
0x338f   :  { %v5436_v20 = vadd.f32 %v5428_v15, %v9259_v52  ;;  %5446 = vadd.xlane.f32.xlu0 %v5445_v27 }
0x3390   :  { %v5435_v28 = vadd.f32 %v5423_v5, %v9262_v31 }
0x3391   :  { %v5454_v30 = vsel %vm171_vm1, %v5436_v20, 0.0 }
0x3392   :  { %5455 = vadd.xlane.f32.xlu1 %v5454_v30  ;;  %v5451_v55 = vsel %vm171_vm1, %v5435_v28, 0.0 }
0x3393   :  { %5452 = vadd.xlane.f32.xlu0 %v5451_v55 }
0x3417   :  { %v5444_v18 = vpop.xlane.xlu1 %5443 }
0x3418   :  { %v5458_v23 = vmul.f32 0.03125, %v5444_v18  ;;  %v5441_v49 = vpop.xlane.xlu0 %5440 }
0x3419   :  { %v5457_v47 = vmul.f32 0.03125, %v5441_v49 }
0x341a   :  { %v9382_v36 = vsub.f32 %v5432_v41, %v5458_v23 }
0x341b   :  { %v9384_v33 = vsub.f32 %v5431_v54, %v5457_v47  ;;  %v5450_v58 = vpop.xlane.xlu1 %5449 }
0x341c   :  { %v5460_v59 = vmul.f32 0.03125, %v5450_v58  ;;  %v5447_v52 = vpop.xlane.xlu0 %5446  ;;  %v5470_v31 = vmul.f32 %v9382_v36, %v9382_v36 }
0x341d   :  { %v5459_v37 = vmul.f32 0.03125, %v5447_v52  ;;  %v5469_v0 = vmul.f32 %v9384_v33, %v9384_v33 }
0x341e   :  { %v9390_v60 = vsub.f32 %v5434_v56, %v5460_v59  ;;  %v5478_v24 = vsel %vm171_vm1, %v5470_v31, 0.0 }
0x341f   :  { %v9393_v17 = vsub.f32 %v5433_v35, %v5459_v37  ;;  %5479 = vadd.xlane.f32.xlu1 %v5478_v24  ;;  %v5456_v38 = vpop.xlane.xlu1 %5455  ;;  %v5475_v6 = vsel %vm171_vm1, %v5469_v0, 0.0 }
0x3420   :  { %v5462_v50 = vmul.f32 0.03125, %v5456_v38  ;;  %5476 = vadd.xlane.f32.xlu0 %v5475_v6  ;;  %v5453_v10 = vpop.xlane.xlu0 %5452  ;;  %v5472_v44 = vmul.f32 %v9390_v60, %v9390_v60 }
0x3421   :  { %v5461_v45 = vmul.f32 0.03125, %v5453_v10  ;;  %v5471_v63 = vmul.f32 %v9393_v17, %v9393_v17 }
0x3422   :  { %v9400_v46 = vsub.f32 %v5436_v20, %v5462_v50  ;;  %v5484_v4 = vsel %vm171_vm1, %v5472_v44, 0.0  ;;  %v5972_v20 = vld [vmem:[%s9521_s9 + $0x118] ss:$0 sm:$0xff]  ;;  %v5973_v50 = vld [vmem:[%s9517_s5 + $0x2f0] ss:$0 sm:$0xff]  ;;  %v5660_v44 = vld [vmem:[%s9513_s1 + $0x8] sm:$0xff] }
0x3423   :  { %v9403_v53 = vsub.f32 %v5435_v28, %v5461_v45  ;;  %5485 = vadd.xlane.f32.xlu1 %v5484_v4  ;;  %v5481_v9 = vsel %vm171_vm1, %v5471_v63, 0.0  ;;  %s5764_s9 = sshll.u32 %s7845_s3, 4  ;;  %s5765_s9 = int_to_ptr.vmem [resolvable:$true] %s5764_s9 }
0x3424   :  { %5482 = vadd.xlane.f32.xlu0 %v5481_v9  ;;  %v5474_v3 = vmul.f32 %v9400_v46, %v9400_v46  ;;  %s7804_s12 = scalar_lea.vmem %s5765_s9, 16  ;;  %s7808_s7 = scalar_lea.vmem %s5765_s9, 32 }
0x3425   :  { %v5473_v29 = vmul.f32 %v9403_v53, %v9403_v53  ;;  %p7805_p0 = scmp.ne.s32.totalorder %s5765_s9, %s7804_s12  ;;  %p7809_p1 = scmp.lt.s32.totalorder %s5765_s9, %s5765_s9 }
0x3426   :  { %v5490_v25 = vsel %vm171_vm1, %v5474_v3, 0.0  ;;  %p7810_p2 = scmp.lt.s32.totalorder %s7808_s7, %s7804_s12 }
0x3427   :  { %5491 = vadd.xlane.f32.xlu1 %v5490_v25  ;;  %v5487_v7 = vsel %vm171_vm1, %v5473_v29, 0.0  ;;  %v5662_v29 = vld [vmem:[%s9513_s1 + $0x18] sm:$0xff] }
0x3428   :  { %5488 = vadd.xlane.f32.xlu0 %v5487_v7  ;;  %p7811_p3 = por %p7810_p2, %p7809_p1 }
0x342a   :  { %p7812_p4 = pnand %p7811_p3, %p7805_p0 }
0x34ac   :  { %v5480_v2 = vpop.xlane.xlu1 %5479 }
0x34ad   :  { %v5494_v61 = vmul.f32 0.03125, %v5480_v2  ;;  %v5477_v8 = vpop.xlane.xlu0 %5476 }
0x34ae   :  { %v5493_v39 = vmul.f32 0.03125, %v5477_v8  ;;  %v5664_v8 = vld [vmem:[%s9513_s1 + $0x28] sm:$0xff] }
0x34af   :  { %v5500_v51 = vadd.f32 1e-05, %v5494_v61 }
0x34b0   :  { %v5499_v19 = vadd.f32 1e-05, %v5493_v39  ;;  %v5486_v43 = vpop.xlane.xlu1 %5485 }
0x34b1   :  { %7782 = vrsqrt.f32 %v5500_v51  ;;  %v5496_v41 = vmul.f32 0.03125, %v5486_v43  ;;  %v5483_v54 = vpop.xlane.xlu0 %5482 }
0x34b2   :  { %7784 = vrsqrt.f32 %v5499_v19  ;;  %v5495_v1 = vmul.f32 0.03125, %v5483_v54 }
0x34b3   :  { %v5502_v42 = vadd.f32 1e-05, %v5496_v41  ;;  %v5663_v41 = vld [vmem:[%s9513_s1 + $0x20] sm:$0xff] }
0x34b4   :  { %v5501_v13 = vadd.f32 1e-05, %v5495_v1  ;;  %v5492_v22 = vpop.xlane.xlu1 %5491 }
0x34b5   :  { %7786 = vrsqrt.f32 %v5502_v42  ;;  %v5498_v34 = vmul.f32 0.03125, %v5492_v22  ;;  %v5489_v26 = vpop.xlane.xlu0 %5488 }
0x34b6   :  { %7788 = vrsqrt.f32 %v5501_v13  ;;  %v5497_v56 = vmul.f32 0.03125, %v5489_v26 }
0x34b7   :  { %v5504_v35 = vadd.f32 1e-05, %v5498_v34 }
0x34b8   :  { %v5503_v48 = vadd.f32 1e-05, %v5497_v56 }
0x34b9   :  { %7790 = vrsqrt.f32 %v5504_v35 }
0x34ba   :  { %7792 = vrsqrt.f32 %v5503_v48 }
0x34bb   :  { %v7783_v15 = vpop.eup %7782 }
0x34bc   :  { %v7785_v11 = vpop.eup %7784  ;;  %v5512_v5 = vmul.f32 %v7783_v15, %v9382_v36  ;;  %v7798_v15 = vld [vmem:[%s9516_s4 + $0x8] sm:$0xff] }
0x34bd   :  { %v5511_v27 = vmul.f32 %v7785_v11, %v9384_v33  ;;  %v7799_v11 = vld [vmem:[%s9516_s4] sm:$0xff] }
0x34be   :  { %v5522_v28 = vmul.f32 %v5971_v16, %v5512_v5  ;;  %v5728_v5 = vsel %vm5707_vm8, %v7799_v11, 0.0 }
0x34bf   :  { %v7787_v30 = vpop.eup %7786  ;;  %v5521_v55 = vmul.f32 %v5971_v16, %v5511_v27 }
0x34c0   :  { %v7789_v18 = vpop.eup %7788  ;;  %v5514_v23 = vmul.f32 %v7787_v30, %v9390_v60  ;;  %v5532_v58 = vadd.f32 %v5972_v20, %v5522_v28 }
0x34c1   :  { %v5531_v49 = vadd.f32 %v5972_v20, %v5521_v55  ;;  %v5513_v47 = vmul.f32 %v7789_v18, %v9393_v17  ;;  %v7801_v55 = vld [vmem:[%s9516_s4 + $0x18] sm:$0xff] }
0x34c2   :  { %v5524_v59 = vmul.f32 %v5971_v16, %v5514_v23  ;;  %v5733_v18 = vsel %vm5707_vm8, %v7801_v55, 0.0  ;;  %v7802_v23 = vld [vmem:[%s9516_s4 + $0x20] sm:$0xff] }
0x34c3   :  { %v7791_v52 = vpop.eup %7790  ;;  %6881 = vmatprep.mubr.msk.f32.mxu1 %vm171_vm1, %v5531_v49  ;;  %v5523_v36 = vmul.f32 %v5971_v16, %v5513_v47  ;;  %v5735_v49 = vsel %vm5707_vm8, %v7802_v23, 0.0 }
0x34c4   :  { %v7793_v33 = vpop.eup %7792  ;;  %6882 = vmatmul.mubr.msk.f32.vlgmr.msra.gmra.mrb[74].mxu1 %vm171_vm1, %v5532_v58  ;;  %v5516_v31 = vmul.f32 %v7791_v52, %v9400_v46  ;;  %v5534_v24 = vadd.f32 %v5972_v20, %v5524_v59  ;;  %v5659_v46 = vld [vmem:[%s9513_s1] sm:$0xff]  ;;  %v7803_v59 = vld [vmem:[%s9516_s4 + $0x28] sm:$0xff] }
0x34c5   :  { %v5533_v37 = vadd.f32 %v5972_v20, %v5523_v36  ;;  %v5515_v0 = vmul.f32 %v7793_v33, %v9403_v53  ;;  %v5737_v52 = vsel %vm5707_vm8, %v7803_v59, 0.0 }
0x34c6   :  { %v5526_v38 = vmul.f32 %v5971_v16, %v5516_v31 }
0x34c7   :  { %6884 = vmatprep.mubr.msk.f32.mxu1 %vm171_vm1, %v5533_v37  ;;  %v5525_v60 = vmul.f32 %v5971_v16, %v5515_v0  ;;  %v5729_v16 = vsel %vm5707_vm8, %v7798_v15, 0.0 }
0x34c8   :  { %6885 = vmatmul.mubr.msk.f32.gmra.mrb[76].mxu1 %vm171_vm1, %v5534_v24  ;;  %v5536_v6 = vadd.f32 %v5972_v20, %v5526_v38  ;;  %v5730_v27 = vadd.f32 %v5729_v16, %v5728_v5 }
0x34c9   :  { %v5535_v17 = vadd.f32 %v5972_v20, %v5525_v60  ;;  %v7800_v20 = vld [vmem:[%s9516_s4 + $0x10] sm:$0xff] }
0x34ca   :  { %v5731_v28 = vsel %vm5707_vm8, %v7800_v20, 0.0 }
0x34cb   :  { %6887 = vmatprep.mubr.msk.f32.mxu1 %vm171_vm1, %v5535_v17  ;;  %v5732_v30 = vadd.f32 %v5731_v28, %v5730_v27 }
0x34cc   :  { %6888 = vmatmul.mubr.msk.f32.gmra.mrb[78].mxu1 %vm171_vm1, %v5536_v6 }
0x34cd   :  { %v5734_v47 = vadd.f32 %v5733_v18, %v5732_v30 }
0x34cf   :  { %v5736_v58 = vadd.f32 %v5735_v49, %v5734_v47 }
0x34d1   :  { %v5738_v36 = vadd.f32 %v5737_v52, %v5736_v58 }
0x3597   :  { %v6883_v10 = vpop.f32.mrb[74].mxu1 }
0x3598   :  { %v5636_v45 = vadd.f32 %v6883_v10, %v5973_v50  ;;  %v5630_v63 = vpop.f32.mrb[75].mxu1 }
0x3599   :  { %v5631_v4 = vadd.f32 %v5973_v50, %v5630_v63 }
0x359a   :  { %v5666_v53 = vsub.f32 %v5636_v45, %v5660_v44 }
0x359b   :  { %v5665_v9 = vsub.f32 %v5631_v4, %v5659_v46  ;;  %v6886_v3 = vpop.f32.mrb[76].mxu1 }
0x359c   :  { %v5672_v25 = vmul.f32 %v5666_v53, %v5666_v53  ;;  %v5646_v7 = vadd.f32 %v6886_v3, %v5973_v50  ;;  %v5640_v12 = vpop.f32.mrb[77].mxu1 }
0x359d   :  { %v5671_v62 = vmul.f32 %v5665_v9, %v5665_v9  ;;  %v5641_v14 = vadd.f32 %v5973_v50, %v5640_v12 }
0x359e   :  { %v5668_v57 = vsub.f32 %v5646_v7, %v5662_v29  ;;  %v5680_v21 = vsel %vm61_vm0, %v5672_v25, 0.0 }
0x359f   :  { %v5667_v2 = vsub.f32 %v5641_v14, %v5661_v40  ;;  %5681 = vadd.xlane.f32.xlu1 %v5680_v21  ;;  %v6889_v61 = vpop.f32.mrb[78].mxu1  ;;  %v5677_v39 = vsel %vm61_vm0, %v5671_v62, 0.0 }
0x35a0   :  { %v5674_v51 = vmul.f32 %v5668_v57, %v5668_v57  ;;  %v5656_v19 = vadd.f32 %v6889_v61, %v5973_v50  ;;  %5678 = vadd.xlane.f32.xlu0 %v5677_v39  ;;  %v5650_v43 = vpop.f32.mrb[79].mxu1 }
0x35a1   :  { %v5673_v54 = vmul.f32 %v5667_v2, %v5667_v2  ;;  %v5651_v1 = vadd.f32 %v5973_v50, %v5650_v43 }
0x35a2   :  { %v5670_v42 = vsub.f32 %v5656_v19, %v5664_v8  ;;  %v5686_v13 = vsel %vm61_vm0, %v5674_v51, 0.0 }
0x35a3   :  { %v5669_v22 = vsub.f32 %v5651_v1, %v5663_v41  ;;  %5687 = vadd.xlane.f32.xlu1 %v5686_v13  ;;  %v5683_v34 = vsel %vm61_vm0, %v5673_v54, 0.0 }
0x35a4   :  { %v5676_v26 = vmul.f32 %v5670_v42, %v5670_v42  ;;  %5684 = vadd.xlane.f32.xlu0 %v5683_v34 }
0x35a5   :  { %v5675_v56 = vmul.f32 %v5669_v22, %v5669_v22 }
0x35a6   :  { %v5692_v35 = vsel %vm61_vm0, %v5676_v26, 0.0 }
0x35a7   :  { %5693 = vadd.xlane.f32.xlu1 %v5692_v35  ;;  %v5689_v48 = vsel %vm61_vm0, %v5675_v56, 0.0 }
0x35a8   :  { %5690 = vadd.xlane.f32.xlu0 %v5689_v48  ;;  %v5753_v48 = vand.u32 127, %v313_v32 }
0x35aa   :  { %vm5754_vm9 = vcmp.eq.s32.totalorder %v5753_v48, 0 }
0x35ab   :  { %5739 = vadd.xlane.f32.xlu1 %v5738_v36 }
0x362c   :  { %v5682_v33 = vpop.xlane.xlu1 %5681 }
0x362d   :  { %v5696_v31 = vmul.f32 0.015625, %v5682_v33  ;;  %v5679_v37 = vpop.xlane.xlu0 %5678 }
0x362e   :  { %v5695_v0 = vmul.f32 0.015625, %v5679_v37 }
0x362f   :  { %v5702_v24 = vmul.f32 %v7798_v15, %v5696_v31 }
0x3630   :  { %v5701_v38 = vmul.f32 %v7799_v11, %v5695_v0  ;;  %v5688_v60 = vpop.xlane.xlu1 %5687 }
0x3631   :  { %v5698_v17 = vmul.f32 0.015625, %v5688_v60  ;;  %v5685_v6 = vpop.xlane.xlu0 %5684  ;;  %v5709_v50 = vsel %vm5707_vm8, %v5702_v24, 0.0 }
0x3632   :  { %v5708_v10 = vsel %vm5707_vm8, %v5701_v38, 0.0  ;;  %v5697_v44 = vmul.f32 0.015625, %v5685_v6 }
0x3633   :  { %v5704_v45 = vmul.f32 %v7801_v55, %v5698_v17  ;;  %v5710_v4 = vadd.f32 %v5709_v50, %v5708_v10 }
0x3634   :  { %v5703_v63 = vmul.f32 %v7800_v20, %v5697_v44  ;;  %v5694_v46 = vpop.xlane.xlu1 %5693 }
0x3635   :  { %v5700_v53 = vmul.f32 0.015625, %v5694_v46  ;;  %v5691_v9 = vpop.xlane.xlu0 %5690  ;;  %v5713_v7 = vsel %vm5707_vm8, %v5704_v45, 0.0 }
0x3636   :  { %v5711_v3 = vsel %vm5707_vm8, %v5703_v63, 0.0  ;;  %v5699_v29 = vmul.f32 0.015625, %v5691_v9 }
0x3637   :  { %v5712_v25 = vadd.f32 %v5711_v3, %v5710_v4  ;;  %v5706_v12 = vmul.f32 %v7803_v59, %v5700_v53 }
0x3638   :  { %v5705_v40 = vmul.f32 %v7802_v23, %v5699_v29  ;;  %v5740_v61 = vpop.xlane.xlu1 %5739 }
0x3639   :  { %v5714_v62 = vadd.f32 %v5713_v7, %v5712_v25  ;;  %v5717_v21 = vsel %vm5707_vm8, %v5706_v12, 0.0  ;;  %v5741_v8 = vrot.slane %v5740_v61, 4 }
0x363a   :  { %v5715_v14 = vsel %vm5707_vm8, %v5705_v40, 0.0 }
0x363b   :  { %v5716_v57 = vadd.f32 %v5715_v14, %v5714_v62  ;;  %v5742_v39 = vadd.f32 %v5741_v8, %v5740_v61 }
0x363d   :  { %v5718_v2 = vadd.f32 %v5717_v21, %v5716_v57  ;;  %v5743_v51 = vrot.slane %v5742_v39, 2 }
0x363f   :  { %5719 = vadd.xlane.f32.xlu0 %v5718_v2  ;;  %v5744_v54 = vadd.f32 %v5743_v51, %v5742_v39 }
0x3641   :  { %v5745_v13 = vrot.slane %v5744_v54, 1 }
0x3643   :  { %v5746_v26 = vadd.f32 %v5745_v13, %v5744_v54 }
0x36cc   :  { %v5720_v19 = vpop.xlane.xlu0 %5719 }
0x36cd   :  { %v5721_v43 = vrot.slane %v5720_v19, 4 }
0x36cf   :  { %v5722_v41 = vadd.f32 %v5721_v43, %v5720_v19 }
0x36d1   :  { %v5723_v1 = vrot.slane %v5722_v41, 2 }
0x36d3   :  { %v5724_v42 = vadd.f32 %v5723_v1, %v5722_v41 }
0x36d5   :  { %v5725_v22 = vrot.slane %v5724_v42, 1 }
0x36d7   :  { %v5726_v34 = vadd.f32 %v5725_v22, %v5724_v42 }
0x36d9   :  { %7342 = vpush %v5726_v34 }
0x36da   :  { %7344 = vpush %v5746_v26 }
0x370a   :  { %s7343_s4 = spop %7342 }
0x370b   :  { %s7345_s16 = spop %7344 }
0x370c   :  { %v5748_v56 = vstv %s7345_s16 }
0x370d   :  { %7794 = vrcp.f32 %v5748_v56 }
0x3717   :  { %v7795_v35 = vpop.eup %7794 }
0x3718   :  { %7346 = vpush %v7795_v35 }
0x3749   :  { %s7347_s27 = spop %7346 }
0x374a   :  { %s5751_s11 = smul.f32 %s7347_s27, %s7343_s4 }
0x374c   :  { %v5755_v15 = vstv %s5751_s11 }
0x374d   :  { %v5756_v16 = vsel %vm5754_vm9, %v5755_v15, 0.0 }
0x374e   :  { %5757 = vst [vmem:[#allocation2] sm:$0x1] %v5756_v16 }
0x374f   :  { %7815 = shalt.err (!%p7812_p4)
}
0x3750   :  { %s7816_s15 = scalar_lea.hbm %s9522_s10, 16 }
0x3751   :  { %p7817_p5 = scmp.ne.s32.totalorder %s9522_s10, %s7816_s15  ;;  %p7820_p6 = scmp.lt.u32.totalorder %s7816_s15, %s9522_s10 }
0x3753   :  { %p7822_p7 = pnand %p7820_p6, %p7817_p5 }
0x3755   :  { %7825 = shalt.err (!%p7822_p7)
}
0x3756   :  { %5767 = dma.vmem_to_hbm [thread:$0]  %s5765_s9, 16, %s9522_s10, [#allocation3]  }
0x3757   :  { %7826 = dma.done.wait [#allocation3], 16  }
0x3758   :  { %7827 = vsyncadd [#allocation3], 4294967280 }
0x3759   :  { %5771 = vsyncpa [#allocation3], 1 }

</bundles_post_ra>
